<compile_context>
chip_gen: v7x
topology: tpu7x:2x2x1
jax: 0.10.0
libtpu: 0.0.40
codegen_flags: <defaults>
</compile_context>

<pallas_src>
import jax
import jax.numpy as jnp
from jax.experimental import pallas as pl
from jax.experimental.pallas import tpu as pltpu

EPS = 1e-5  # BatchNorm2d default eps


def _round_up(x, m):
    return (x + m - 1) // m * m


def _vmem_limit_bytes():
    # ~3/4 of physical VMEM, capped at 100 MiB: ≈96 MiB on v5e/v6e (128 MiB),
    # ≈48 MiB on v7x (64 MiB).  Falls back conservatively if the query fails.
    try:
        cap = int(pltpu.get_tpu_info().vmem_capacity_bytes)
    except Exception:
        cap = 64 * 1024 * 1024
    return int(min(cap * 3 // 4, 100 * 1024 * 1024))


# ----------------------------------------------------------------------------
# Kernels
# ----------------------------------------------------------------------------
def _make_conv1_relu_stats_kernel(act_dtype):
    """Tap-folded conv1 (single matmul) + bias + ReLU; per-image bn1 sum/sumsq."""

    def kernel(lhs_ref, w_ref, b_ref, mask_ref, h_ref, s_ref, q_ref):
        acc = jnp.dot(lhs_ref[...], w_ref[...],
                      preferred_element_type=jnp.float32)
        h16 = jnp.maximum(acc + b_ref[...], 0.0).astype(act_dtype)
        h_ref[...] = h16
        # Stats from the bf16-rounded activations (what pass 2 will normalize);
        # the mask drops the padded-width junk columns.
        hm = h16.astype(jnp.float32) * mask_ref[...]
        s_ref[...] = jnp.sum(hm, axis=0, keepdims=True)
        q_ref[...] = jnp.sum(hm * hm, axis=0, keepdims=True)

    return kernel


def _make_conv2_kernel(H, W, Wp, lead, Cp, act_dtype):
    """bn1-apply (+temb via shift) -> padded bf16 slab -> 9-tap conv2 + ReLU
    accumulated in an f32 VMEM scratch; per-image bn2 sum/sumsq."""
    R = H * Wp
    interior = lead + Wp + 1          # sublane-pack aligned interior row offset

    def kernel(h1_ref, sc1_ref, sh1_ref, mask_ref, w2_ref, b2_ref,
               h2_ref, s_ref, q_ref, ypad_ref, acc_ref):
        # bn1 apply; shift already contains (beta - mean*scale + time_emb).
        # Masked junk columns map exactly onto conv2's zero-halo positions.
        y = (h1_ref[...].astype(jnp.float32) * sc1_ref[...] + sh1_ref[...]) \
            * mask_ref[...]
        ypad_ref[...] = jnp.zeros_like(ypad_ref)       # halo rows must be zero
        ypad_ref[interior:interior + R, :] = y.astype(act_dtype)

        # 3x3 conv as 9 row-shifted bf16 matmuls, f32 VMEM accumulator.
        acc_ref[...] = jnp.dot(ypad_ref[lead:lead + R, :], w2_ref[0],
                               preferred_element_type=jnp.float32)
        for t in range(1, 9):
            dy, dx = divmod(t, 3)
            off = lead + dy * Wp + dx
            acc_ref[...] += jnp.dot(ypad_ref[off:off + R, :], w2_ref[t],
                                    preferred_element_type=jnp.float32)

        h16 = jnp.maximum(acc_ref[...] + b2_ref[...], 0.0).astype(act_dtype)
        h2_ref[...] = h16
        hm = h16.astype(jnp.float32) * mask_ref[...]
        s_ref[...] = jnp.sum(hm, axis=0, keepdims=True)
        q_ref[...] = jnp.sum(hm * hm, axis=0, keepdims=True)

    return kernel


def _make_bn2_out_kernel(H, W, Cp, Cout):
    """bn2 apply; drop junk columns, transpose to channel-major, write a
    lane-dense (Cout, H*W) f32 block (wrapper reshape to NCHW is free)."""

    def kernel(h2_ref, sc_ref, sh_ref, o_ref):
        h = h2_ref[:, :W, :].astype(jnp.float32).reshape(H * W, Cp)
        y = h * sc_ref[...] + sh_ref[...]
        o_ref[...] = jnp.transpose(y)[:Cout, :]

    return kernel


# ----------------------------------------------------------------------------
# Wrapper (layout / padding / parameter packing glue + pallas_call plumbing)
# ----------------------------------------------------------------------------
def conv_block_forward(params, inputs_nchw, t):
    N, Cin, H, W = inputs_nchw.shape
    Cout = params["conv1_w"].shape[0]
    f32, bf16 = jnp.float32, jnp.bfloat16

    Wp = W + 2                        # padded width (2 junk columns per row)
    R = H * Wp                        # rows per image in padded-width coords
    lead = (-(Wp + 1)) % 16           # align ypad interior store (bf16 packing)
    PPa = _round_up(lead + (H + 2) * Wp + 2, 16)   # padded-slab rows
    Cp = _round_up(Cout, 128)         # lane-aligned channel dim
    K1 = 9 * Cin
    K1p = _round_up(K1, 8)            # conv1 folded contraction dim
    M = N * H * W                     # BatchNorm population size
    pad_c = Cp - Cout

    # ---- conv1 tap-folded im2col LHS: (N, R, K1p) bf16 ----------------------
    x = jnp.transpose(inputs_nchw, (0, 2, 3, 1))                       # NHWC
    xp = jnp.pad(x, ((0, 0), (1, 1), (1, 1), (0, 0)))
    xflat = jnp.pad(xp.reshape(N, (H + 2) * Wp, Cin), ((0, 0), (0, 2), (0, 0)))
    taps = [xflat[:, dy * Wp + dx: dy * Wp + dx + R, :]
            for dy in range(3) for dx in range(3)]
    lhs = jnp.concatenate(taps, axis=-1)                               # (N,R,9*Cin)
    lhs = jnp.pad(lhs, ((0, 0), (0, 0), (0, K1p - K1))).astype(bf16)

    def row(v, dtype=f32):
        return jnp.pad(v.reshape(1, -1), ((0, 0), (0, pad_c))).astype(dtype)

    # weights packed per tap, channel-last, lane padded, bf16
    w1 = jnp.transpose(params["conv1_w"], (2, 3, 1, 0)).reshape(K1, Cout)
    w1 = jnp.pad(w1, ((0, K1p - K1), (0, pad_c))).astype(bf16)         # (K1p, Cp)
    w2 = jnp.transpose(params["conv2_w"], (2, 3, 1, 0)).reshape(9, Cout, Cout)
    w2 = jnp.pad(w2, ((0, 0), (0, pad_c), (0, pad_c))).astype(bf16)    # (9, Cp, Cp)
    b1, b2 = row(params["conv1_b"]), row(params["conv2_b"])

    # relu(time_mlp(t)) once per batch element (not per pixel)
    temb = jnp.maximum(t.astype(f32) @ params["time_w"].T.astype(f32)
                       + params["time_b"].astype(f32), 0.0)            # (N, Cout)
    temb = jnp.pad(temb, ((0, 0), (0, pad_c)))                          # (N, Cp)

    # valid-column mask for the padded-width (H, Wp) row layout
    mask = (jnp.arange(R, dtype=jnp.int32) % Wp < W).astype(f32).reshape(R, 1)

    cparams = pltpu.CompilerParams(dimension_semantics=("parallel",),
                                   vmem_limit_bytes=_vmem_limit_bytes())

    img = pl.BlockSpec((None, R, Cp), lambda n: (n, 0, 0))
    per_img_vec = pl.BlockSpec((None, 1, Cp), lambda n: (n, 0, 0))
    cvec = pl.BlockSpec((1, Cp), lambda n: (0, 0))
    cmask = pl.BlockSpec((R, 1), lambda n: (0, 0))

    def bn_affine(s, q, gamma, beta):
        # tiny (N,Cp) reductions + per-channel scale/shift prep (wrapper side)
        s = jnp.sum(s, axis=0)
        q = jnp.sum(q, axis=0)
        mean = s / M
        var = jnp.maximum(q / M - mean * mean, 0.0)
        scale = jax.lax.rsqrt(var + EPS) * row(gamma)
        shift = row(beta) - mean * scale
        return scale, shift

    # --- pass 1: conv1 (tap-folded) + bias + ReLU, per-image bn1 stats -------
    h1, s1, q1 = pl.pallas_call(
        _make_conv1_relu_stats_kernel(bf16),
        out_shape=(jax.ShapeDtypeStruct((N, R, Cp), bf16),
                   jax.ShapeDtypeStruct((N, 1, Cp), f32),
                   jax.ShapeDtypeStruct((N, 1, Cp), f32)),
        grid_spec=pltpu.PrefetchScalarGridSpec(
            num_scalar_prefetch=0,
            grid=(N,),
            in_specs=[pl.BlockSpec((None, R, K1p), lambda n: (n, 0, 0)),
                      pl.BlockSpec((K1p, Cp), lambda n: (0, 0)),
                      cvec, cmask],
            out_specs=(img, per_img_vec, per_img_vec)),
        compiler_params=cparams,
        cost_estimate=pl.CostEstimate(
            flops=int(2 * N * R * K1p * Cp),
            transcendentals=0,
            bytes_accessed=int(lhs.size * 2 + w1.size * 2 + N * R * Cp * 2)),
    )(lhs, w1, b1, mask)

    sc1, sh1 = bn_affine(s1, q1, params["bn1_g"], params["bn1_b"])
    sh1n = (sh1 + temb).reshape(N, 1, Cp)      # fold time embedding into shift

    # --- pass 2: bn1 apply + temb, conv2 + bias + ReLU, per-image bn2 stats --
    h2, s2, q2 = pl.pallas_call(
        _make_conv2_kernel(H, W, Wp, lead, Cp, bf16),
        out_shape=(jax.ShapeDtypeStruct((N, R, Cp), bf16),
                   jax.ShapeDtypeStruct((N, 1, Cp), f32),
                   jax.ShapeDtypeStruct((N, 1, Cp), f32)),
        grid_spec=pltpu.PrefetchScalarGridSpec(
            num_scalar_prefetch=0,
            grid=(N,),
            in_specs=[img, cvec, per_img_vec, cmask,
                      pl.BlockSpec((9, Cp, Cp), lambda n: (0, 0, 0)),
                      cvec],
            out_specs=(img, per_img_vec, per_img_vec),
            scratch_shapes=[pltpu.VMEM((PPa, Cp), bf16),
                            pltpu.VMEM((R, Cp), f32)]),
        compiler_params=cparams,
        cost_estimate=pl.CostEstimate(
            flops=int(2 * N * R * 9 * Cp * Cp),
            transcendentals=0,
            bytes_accessed=int(N * R * Cp * 2 * 2 + w2.size * 2)),
    )(h1, sc1, sh1n, mask, w2, b2)

    sc2, sh2 = bn_affine(s2, q2, params["bn2_g"], params["bn2_b"])

    # --- pass 3: bn2 apply, drop junk columns, channel-major lane-dense out --
    h2v = h2.reshape(N, H, Wp, Cp)             # free (layout-preserving) view
    y = pl.pallas_call(
        _make_bn2_out_kernel(H, W, Cp, Cout),
        out_shape=jax.ShapeDtypeStruct((N, Cout, H * W), f32),
        grid_spec=pltpu.PrefetchScalarGridSpec(
            num_scalar_prefetch=0,
            grid=(N,),
            in_specs=[pl.BlockSpec((None, H, Wp, Cp), lambda n: (n, 0, 0, 0)),
                      cvec, cvec],
            out_specs=pl.BlockSpec((None, Cout, H * W), lambda n: (n, 0, 0))),
        compiler_params=cparams,
        cost_estimate=pl.CostEstimate(
            flops=int(2 * N * H * W * Cp),
            transcendentals=0,
            bytes_accessed=int(N * R * Cp * 2 + N * Cout * H * W * 4)),
    )(h2v, sc2, sh2)

    return y.reshape(N, Cout, H, W)            # free reshape, no XLA transpose


# ----------------------------------------------------------------------------
# Parameters + pure-JAX reference (for validation only)
# ----------------------------------------------------------------------------
def init_params(key, in_c, out_c, time_emb_dim):
    ks = jax.random.split(key, 6)
    s = 0.1
    return {
        "time_w": s * jax.random.normal(ks[0], (out_c, time_emb_dim), jnp.float32),
        "time_b": s * jax.random.normal(ks[1], (out_c,), jnp.float32),
        "conv1_w": s * jax.random.normal(ks[2], (out_c, in_c, 3, 3), jnp.float32),
        "conv1_b": s * jax.random.normal(ks[3], (out_c,), jnp.float32),
        "conv2_w": s * jax.random.normal(ks[4], (out_c, out_c, 3, 3), jnp.float32),
        "conv2_b": s * jax.random.normal(ks[5], (out_c,), jnp.float32),
        # BatchNorm2d default init (weight=1, bias=0)
        "bn1_g": jnp.ones((out_c,), jnp.float32),
        "bn1_b": jnp.zeros((out_c,), jnp.float32),
        "bn2_g": jnp.ones((out_c,), jnp.float32),
        "bn2_b": jnp.zeros((out_c,), jnp.float32),
    }


def _reference_forward(params, x, t):
    """Pure-JAX reference matching the PyTorch module in training mode."""
    dn = ("NCHW", "OIHW", "NCHW")

    def bn(h, g, b):
        mean = jnp.mean(h, axis=(0, 2, 3), keepdims=True)
        var = jnp.mean((h - mean) ** 2, axis=(0, 2, 3), keepdims=True)
        return ((h - mean) * jax.lax.rsqrt(var + EPS) * g[None, :, None, None]
                + b[None, :, None, None])

    h = jax.lax.conv_general_dilated(x, params["conv1_w"], (1, 1), "SAME",
                                     dimension_numbers=dn)
    h = jnp.maximum(h + params["conv1_b"][None, :, None, None], 0.0)
    h = bn(h, params["bn1_g"], params["bn1_b"])
    temb = jnp.maximum(t @ params["time_w"].T + params["time_b"], 0.0)
    h = h + temb[:, :, None, None]
    h = jax.lax.conv_general_dilated(h, params["conv2_w"], (1, 1), "SAME",
                                     dimension_numbers=dn)
    h = jnp.maximum(h + params["conv2_b"][None, :, None, None], 0.0)
    return bn(h, params["bn2_g"], params["bn2_b"])


if __name__ == "__main__":
    N, in_c, out_c, H, W, T = 2, 4, 8, 16, 16, 32

    key = jax.random.PRNGKey(0)
    kx, kt, kp = jax.random.split(key, 3)
    x = jax.random.normal(kx, (N, in_c, H, W), jnp.float32)   # NCHW like PyTorch
    t = jax.random.normal(kt, (N, T), jnp.float32)
    params = init_params(kp, in_c, out_c, T)

    out = jax.jit(conv_block_forward)(params, x, t)
    out = jax.block_until_ready(out)
    assert out.shape == (N, out_c, H, W) and out.dtype == jnp.float32

    ref = _reference_forward(params, x, t)
    max_err = float(jnp.max(jnp.abs(out - ref)))
    assert max_err < 0.1, f"mismatch vs reference: max abs err {max_err}"
    print("KERNEL_OK")
</pallas_src>

<mosaic_0001>
module attributes {stable_mosaic.version = 11 : i64} {
  func.func @kernel(%arg0: i32, %arg1: memref<1x288x40xbf16, #tpu.memory_space<vmem>>, %arg2: memref<40x128xbf16, #tpu.memory_space<vmem>>, %arg3: memref<1x128xf32, #tpu.memory_space<vmem>>, %arg4: memref<288x1xf32, #tpu.memory_space<vmem>>, %arg5: memref<1x288x128xbf16, #tpu.memory_space<vmem>>, %arg6: memref<1x1x128xf32, #tpu.memory_space<vmem>>, %arg7: memref<1x1x128xf32, #tpu.memory_space<vmem>>) attributes {dimension_semantics = [#tpu.dimension_semantics<parallel>], iteration_bounds = array<i64: 2>, scalar_prefetch = 0 : i64, scratch_operands = 0 : i64, tpu.core_type = #tpu.core_type<tc>, window_params = [{transform_indices = @transform_0, window_bounds = array<i64: 1, 288, 40>}, {pipeline_mode = #tpu.pipeline_mode<synchronous>, transform_indices = @transform_1, window_bounds = array<i64: 40, 128>}, {pipeline_mode = #tpu.pipeline_mode<synchronous>, transform_indices = @transform_2, window_bounds = array<i64: 1, 128>}, {pipeline_mode = #tpu.pipeline_mode<synchronous>, transform_indices = @transform_3, window_bounds = array<i64: 288, 1>}, {transform_indices = @transform_4, window_bounds = array<i64: 1, 288, 128>}, {transform_indices = @transform_5, window_bounds = array<i64: 1, 1, 128>}, {transform_indices = @transform_6, window_bounds = array<i64: 1, 1, 128>}]} {
    %c0 = arith.constant 0 : index
    %c0_0 = arith.constant 0 : index
    %c0_1 = arith.constant 0 : index
    %0 = vector.load %arg1[%c0, %c0_0, %c0_1] : memref<1x288x40xbf16, #tpu.memory_space<vmem>>, vector<1x288x40xbf16>
    %1 = vector.shape_cast %0 : vector<1x288x40xbf16> to vector<288x40xbf16>
    %c0_2 = arith.constant 0 : index
    %c0_3 = arith.constant 0 : index
    %2 = vector.load %arg2[%c0_2, %c0_3] : memref<40x128xbf16, #tpu.memory_space<vmem>>, vector<40x128xbf16>
    %cst = arith.constant dense<0.000000e+00> : vector<288x128xf32>
    %3 = tpu.matmul %1, %2, %cst {dimension_numbers = #tpu.dot_dimension_numbers<[1], [0], [0], [1], [0, 0, 1, 1], [], []>} : vector<288x40xbf16>, vector<40x128xbf16>, vector<288x128xf32> -> vector<288x128xf32>
    %c0_4 = arith.constant 0 : index
    %c0_5 = arith.constant 0 : index
    %4 = vector.load %arg3[%c0_4, %c0_5] : memref<1x128xf32, #tpu.memory_space<vmem>>, vector<1x128xf32>
    %5 = vector.broadcast %4 : vector<1x128xf32> to vector<288x128xf32>
    %6 = arith.addf %3, %5 : vector<288x128xf32>
    %cst_6 = arith.constant 0.000000e+00 : f32
    %7 = vector.broadcast %cst_6 : f32 to vector<288x128xf32>
    %8 = arith.maximumf %6, %7 : vector<288x128xf32>
    %9 = arith.truncf %8 : vector<288x128xf32> to vector<288x128xbf16>
    %c0_7 = arith.constant 0 : index
    %c0_8 = arith.constant 0 : index
    %c0_9 = arith.constant 0 : index
    %10 = vector.load %arg5[%c0_7, %c0_8, %c0_9] : memref<1x288x128xbf16, #tpu.memory_space<vmem>>, vector<1x288x128xbf16>
    %11 = vector.shape_cast %10 : vector<1x288x128xbf16> to vector<288x128xbf16>
    %12 = vector.shape_cast %9 : vector<288x128xbf16> to vector<1x288x128xbf16>
    tpu.vector_store %arg5[%c0_7, %c0_8, %c0_9], %12 {strides = array<i32>} : memref<1x288x128xbf16, #tpu.memory_space<vmem>>, vector<1x288x128xbf16>,
    %13 = arith.extf %9 : vector<288x128xbf16> to vector<288x128xf32>
    %c0_10 = arith.constant 0 : index
    %c0_11 = arith.constant 0 : index
    %14 = vector.load %arg4[%c0_10, %c0_11] : memref<288x1xf32, #tpu.memory_space<vmem>>, vector<288x1xf32>
    %15 = vector.broadcast %14 : vector<288x1xf32> to vector<288x128xf32>
    %16 = arith.mulf %13, %15 : vector<288x128xf32>
    %cst_12 = arith.constant dense<0.000000e+00> : vector<128xf32>
    %17 = vector.multi_reduction <add>, %16, %cst_12 [0] : vector<288x128xf32> to vector<128xf32>
    %18 = vector.shape_cast %17 : vector<128xf32> to vector<1x128xf32>
    %c0_13 = arith.constant 0 : index
    %c0_14 = arith.constant 0 : index
    %c0_15 = arith.constant 0 : index
    %19 = vector.load %arg6[%c0_13, %c0_14, %c0_15] : memref<1x1x128xf32, #tpu.memory_space<vmem>>, vector<1x1x128xf32>
    %20 = vector.shape_cast %19 : vector<1x1x128xf32> to vector<1x128xf32>
    %21 = vector.shape_cast %18 : vector<1x128xf32> to vector<1x1x128xf32>
    tpu.vector_store %arg6[%c0_13, %c0_14, %c0_15], %21 {strides = array<i32>} : memref<1x1x128xf32, #tpu.memory_space<vmem>>, vector<1x1x128xf32>,
    %22 = arith.mulf %16, %16 : vector<288x128xf32>
    %cst_16 = arith.constant dense<0.000000e+00> : vector<128xf32>
    %23 = vector.multi_reduction <add>, %22, %cst_16 [0] : vector<288x128xf32> to vector<128xf32>
    %24 = vector.shape_cast %23 : vector<128xf32> to vector<1x128xf32>
    %c0_17 = arith.constant 0 : index
    %c0_18 = arith.constant 0 : index
    %c0_19 = arith.constant 0 : index
    %25 = vector.load %arg7[%c0_17, %c0_18, %c0_19] : memref<1x1x128xf32, #tpu.memory_space<vmem>>, vector<1x1x128xf32>
    %26 = vector.shape_cast %25 : vector<1x1x128xf32> to vector<1x128xf32>
    %27 = vector.shape_cast %24 : vector<1x128xf32> to vector<1x1x128xf32>
    tpu.vector_store %arg7[%c0_17, %c0_18, %c0_19], %27 {strides = array<i32>} : memref<1x1x128xf32, #tpu.memory_space<vmem>>, vector<1x1x128xf32>,
    return
  }
  func.func @transform_0(%arg0: i32) -> (i32, i32, i32) {
    %c0_i32 = arith.constant 0 : i32
    %c0_i32_0 = arith.constant 0 : i32
    %c0_i32_1 = arith.constant 0 : i32
    return %arg0, %c0_i32, %c0_i32_0 : i32, i32, i32
  }
  func.func @transform_1(%arg0: i32) -> (i32, i32) {
    %c0_i32 = arith.constant 0 : i32
    %c0_i32_0 = arith.constant 0 : i32
    %c0_i32_1 = arith.constant 0 : i32
    return %c0_i32, %c0_i32_0 : i32, i32
  }
  func.func @transform_2(%arg0: i32) -> (i32, i32) {
    %c0_i32 = arith.constant 0 : i32
    %c0_i32_0 = arith.constant 0 : i32
    %c0_i32_1 = arith.constant 0 : i32
    return %c0_i32, %c0_i32_0 : i32, i32
  }
  func.func @transform_3(%arg0: i32) -> (i32, i32) {
    %c0_i32 = arith.constant 0 : i32
    %c0_i32_0 = arith.constant 0 : i32
    %c0_i32_1 = arith.constant 0 : i32
    return %c0_i32, %c0_i32_0 : i32, i32
  }
  func.func @transform_4(%arg0: i32) -> (i32, i32, i32) {
    %c0_i32 = arith.constant 0 : i32
    %c0_i32_0 = arith.constant 0 : i32
    %c0_i32_1 = arith.constant 0 : i32
    return %arg0, %c0_i32, %c0_i32_0 : i32, i32, i32
  }
  func.func @transform_5(%arg0: i32) -> (i32, i32, i32) {
    %c0_i32 = arith.constant 0 : i32
    %c0_i32_0 = arith.constant 0 : i32
    %c0_i32_1 = arith.constant 0 : i32
    return %arg0, %c0_i32, %c0_i32_0 : i32, i32, i32
  }
  func.func @transform_6(%arg0: i32) -> (i32, i32, i32) {
    %c0_i32 = arith.constant 0 : i32
    %c0_i32_0 = arith.constant 0 : i32
    %c0_i32_1 = arith.constant 0 : i32
    return %arg0, %c0_i32, %c0_i32_0 : i32, i32, i32
  }
}

module attributes {stable_mosaic.version = 11 : i64} {
  func.func @kernel(%arg0: i32, %arg1: memref<1x288x128xbf16, #tpu.memory_space<vmem>>, %arg2: memref<1x128xf32, #tpu.memory_space<vmem>>, %arg3: memref<1x1x128xf32, #tpu.memory_space<vmem>>, %arg4: memref<288x1xf32, #tpu.memory_space<vmem>>, %arg5: memref<9x128x128xbf16, #tpu.memory_space<vmem>>, %arg6: memref<1x128xf32, #tpu.memory_space<vmem>>, %arg7: memref<1x288x128xbf16, #tpu.memory_space<vmem>>, %arg8: memref<1x1x128xf32, #tpu.memory_space<vmem>>, %arg9: memref<1x1x128xf32, #tpu.memory_space<vmem>>, %arg10: memref<352x128xbf16, #tpu.memory_space<vmem>>, %arg11: memref<288x128xf32, #tpu.memory_space<vmem>>) attributes {dimension_semantics = [#tpu.dimension_semantics<parallel>], iteration_bounds = array<i64: 2>, scalar_prefetch = 0 : i64, scratch_operands = 2 : i64, tpu.core_type = #tpu.core_type<tc>, window_params = [{transform_indices = @transform_0, window_bounds = array<i64: 1, 288, 128>}, {pipeline_mode = #tpu.pipeline_mode<synchronous>, transform_indices = @transform_1, window_bounds = array<i64: 1, 128>}, {transform_indices = @transform_2, window_bounds = array<i64: 1, 1, 128>}, {pipeline_mode = #tpu.pipeline_mode<synchronous>, transform_indices = @transform_3, window_bounds = array<i64: 288, 1>}, {pipeline_mode = #tpu.pipeline_mode<synchronous>, transform_indices = @transform_4, window_bounds = array<i64: 9, 128, 128>}, {pipeline_mode = #tpu.pipeline_mode<synchronous>, transform_indices = @transform_5, window_bounds = array<i64: 1, 128>}, {transform_indices = @transform_6, window_bounds = array<i64: 1, 288, 128>}, {transform_indices = @transform_7, window_bounds = array<i64: 1, 1, 128>}, {transform_indices = @transform_8, window_bounds = array<i64: 1, 1, 128>}]} {
    %c0 = arith.constant 0 : index
    %c0_0 = arith.constant 0 : index
    %c0_1 = arith.constant 0 : index
    %0 = vector.load %arg1[%c0, %c0_0, %c0_1] : memref<1x288x128xbf16, #tpu.memory_space<vmem>>, vector<1x288x128xbf16>
    %1 = vector.shape_cast %0 : vector<1x288x128xbf16> to vector<288x128xbf16>
    %2 = arith.extf %1 : vector<288x128xbf16> to vector<288x128xf32>
    %c0_2 = arith.constant 0 : index
    %c0_3 = arith.constant 0 : index
    %3 = vector.load %arg2[%c0_2, %c0_3] : memref<1x128xf32, #tpu.memory_space<vmem>>, vector<1x128xf32>
    %4 = vector.broadcast %3 : vector<1x128xf32> to vector<288x128xf32>
    %5 = arith.mulf %2, %4 : vector<288x128xf32>
    %c0_4 = arith.constant 0 : index
    %c0_5 = arith.constant 0 : index
    %c0_6 = arith.constant 0 : index
    %6 = vector.load %arg3[%c0_4, %c0_5, %c0_6] : memref<1x1x128xf32, #tpu.memory_space<vmem>>, vector<1x1x128xf32>
    %7 = vector.shape_cast %6 : vector<1x1x128xf32> to vector<1x128xf32>
    %8 = vector.broadcast %7 : vector<1x128xf32> to vector<288x128xf32>
    %9 = arith.addf %5, %8 : vector<288x128xf32>
    %c0_7 = arith.constant 0 : index
    %c0_8 = arith.constant 0 : index
    %10 = vector.load %arg4[%c0_7, %c0_8] : memref<288x1xf32, #tpu.memory_space<vmem>>, vector<288x1xf32>
    %11 = vector.broadcast %10 : vector<288x1xf32> to vector<288x128xf32>
    %12 = arith.mulf %9, %11 : vector<288x128xf32>
    %cst = arith.constant 0.000000e+00 : bf16
    %13 = vector.broadcast %cst : bf16 to vector<352x128xbf16>
    %c0_9 = arith.constant 0 : index
    %c0_10 = arith.constant 0 : index
    %14 = vector.load %arg10[%c0_9, %c0_10] : memref<352x128xbf16, #tpu.memory_space<vmem>>, vector<352x128xbf16>
    tpu.vector_store %arg10[%c0_9, %c0_10], %13 {strides = array<i32>} : memref<352x128xbf16, #tpu.memory_space<vmem>>, vector<352x128xbf16>,
    %15 = arith.truncf %12 : vector<288x128xf32> to vector<288x128xbf16>
    %c32 = arith.constant 32 : index
    %c0_11 = arith.constant 0 : index
    %16 = vector.load %arg10[%c32, %c0_11] : memref<352x128xbf16, #tpu.memory_space<vmem>>, vector<288x128xbf16>
    tpu.vector_store %arg10[%c32, %c0_11], %15 {strides = array<i32>} : memref<352x128xbf16, #tpu.memory_space<vmem>>, vector<288x128xbf16>,
    %c13 = arith.constant 13 : index
    %c0_12 = arith.constant 0 : index
    %17 = vector.load %arg10[%c13, %c0_12] : memref<352x128xbf16, #tpu.memory_space<vmem>>, vector<288x128xbf16>
    %c0_13 = arith.constant 0 : index
    %c0_14 = arith.constant 0 : index
    %c0_15 = arith.constant 0 : index
    %18 = vector.load %arg5[%c0_13, %c0_14, %c0_15] : memref<9x128x128xbf16, #tpu.memory_space<vmem>>, vector<1x128x128xbf16>
    %19 = vector.shape_cast %18 : vector<1x128x128xbf16> to vector<128x128xbf16>
    %cst_16 = arith.constant dense<0.000000e+00> : vector<288x128xf32>
    %20 = tpu.matmul %17, %19, %cst_16 {dimension_numbers = #tpu.dot_dimension_numbers<[1], [0], [0], [1], [0, 0, 1, 1], [], []>} : vector<288x128xbf16>, vector<128x128xbf16>, vector<288x128xf32> -> vector<288x128xf32>
    %c0_17 = arith.constant 0 : index
    %c0_18 = arith.constant 0 : index
    %21 = vector.load %arg11[%c0_17, %c0_18] : memref<288x128xf32, #tpu.memory_space<vmem>>, vector<288x128xf32>
    tpu.vector_store %arg11[%c0_17, %c0_18], %20 {strides = array<i32>} : memref<288x128xf32, #tpu.memory_space<vmem>>, vector<288x128xf32>,
    %c0_19 = arith.constant 0 : index
    %c0_20 = arith.constant 0 : index
    %22 = vector.load %arg11[%c0_19, %c0_20] : memref<288x128xf32, #tpu.memory_space<vmem>>, vector<288x128xf32>
    %c14 = arith.constant 14 : index
    %c0_21 = arith.constant 0 : index
    %23 = vector.load %arg10[%c14, %c0_21] : memref<352x128xbf16, #tpu.memory_space<vmem>>, vector<288x128xbf16>
    %c1 = arith.constant 1 : index
    %c0_22 = arith.constant 0 : index
    %c0_23 = arith.constant 0 : index
    %24 = vector.load %arg5[%c1, %c0_22, %c0_23] : memref<9x128x128xbf16, #tpu.memory_space<vmem>>, vector<1x128x128xbf16>
    %25 = vector.shape_cast %24 : vector<1x128x128xbf16> to vector<128x128xbf16>
    %cst_24 = arith.constant dense<0.000000e+00> : vector<288x128xf32>
    %26 = tpu.matmul %23, %25, %cst_24 {dimension_numbers = #tpu.dot_dimension_numbers<[1], [0], [0], [1], [0, 0, 1, 1], [], []>} : vector<288x128xbf16>, vector<128x128xbf16>, vector<288x128xf32> -> vector<288x128xf32>
    %27 = arith.addf %22, %26 : vector<288x128xf32>
    %c0_25 = arith.constant 0 : index
    %c0_26 = arith.constant 0 : index
    %28 = vector.load %arg11[%c0_25, %c0_26] : memref<288x128xf32, #tpu.memory_space<vmem>>, vector<288x128xf32>
    tpu.vector_store %arg11[%c0_25, %c0_26], %27 {strides = array<i32>} : memref<288x128xf32, #tpu.memory_space<vmem>>, vector<288x128xf32>,
    %c0_27 = arith.constant 0 : index
    %c0_28 = arith.constant 0 : index
    %29 = vector.load %arg11[%c0_27, %c0_28] : memref<288x128xf32, #tpu.memory_space<vmem>>, vector<288x128xf32>
    %c15 = arith.constant 15 : index
    %c0_29 = arith.constant 0 : index
    %30 = vector.load %arg10[%c15, %c0_29] : memref<352x128xbf16, #tpu.memory_space<vmem>>, vector<288x128xbf16>
    %c2 = arith.constant 2 : index
    %c0_30 = arith.constant 0 : index
    %c0_31 = arith.constant 0 : index
    %31 = vector.load %arg5[%c2, %c0_30, %c0_31] : memref<9x128x128xbf16, #tpu.memory_space<vmem>>, vector<1x128x128xbf16>
    %32 = vector.shape_cast %31 : vector<1x128x128xbf16> to vector<128x128xbf16>
    %cst_32 = arith.constant dense<0.000000e+00> : vector<288x128xf32>
    %33 = tpu.matmul %30, %32, %cst_32 {dimension_numbers = #tpu.dot_dimension_numbers<[1], [0], [0], [1], [0, 0, 1, 1], [], []>} : vector<288x128xbf16>, vector<128x128xbf16>, vector<288x128xf32> -> vector<288x128xf32>
    %34 = arith.addf %29, %33 : vector<288x128xf32>
    %c0_33 = arith.constant 0 : index
    %c0_34 = arith.constant 0 : index
    %35 = vector.load %arg11[%c0_33, %c0_34] : memref<288x128xf32, #tpu.memory_space<vmem>>, vector<288x128xf32>
    tpu.vector_store %arg11[%c0_33, %c0_34], %34 {strides = array<i32>} : memref<288x128xf32, #tpu.memory_space<vmem>>, vector<288x128xf32>,
    %c0_35 = arith.constant 0 : index
    %c0_36 = arith.constant 0 : index
    %36 = vector.load %arg11[%c0_35, %c0_36] : memref<288x128xf32, #tpu.memory_space<vmem>>, vector<288x128xf32>
    %c31 = arith.constant 31 : index
    %c0_37 = arith.constant 0 : index
    %37 = vector.load %arg10[%c31, %c0_37] : memref<352x128xbf16, #tpu.memory_space<vmem>>, vector<288x128xbf16>
    %c3 = arith.constant 3 : index
    %c0_38 = arith.constant 0 : index
    %c0_39 = arith.constant 0 : index
    %38 = vector.load %arg5[%c3, %c0_38, %c0_39] : memref<9x128x128xbf16, #tpu.memory_space<vmem>>, vector<1x128x128xbf16>
    %39 = vector.shape_cast %38 : vector<1x128x128xbf16> to vector<128x128xbf16>
    %cst_40 = arith.constant dense<0.000000e+00> : vector<288x128xf32>
    %40 = tpu.matmul %37, %39, %cst_40 {dimension_numbers = #tpu.dot_dimension_numbers<[1], [0], [0], [1], [0, 0, 1, 1], [], []>} : vector<288x128xbf16>, vector<128x128xbf16>, vector<288x128xf32> -> vector<288x128xf32>
    %41 = arith.addf %36, %40 : vector<288x128xf32>
    %c0_41 = arith.constant 0 : index
    %c0_42 = arith.constant 0 : index
    %42 = vector.load %arg11[%c0_41, %c0_42] : memref<288x128xf32, #tpu.memory_space<vmem>>, vector<288x128xf32>
    tpu.vector_store %arg11[%c0_41, %c0_42], %41 {strides = array<i32>} : memref<288x128xf32, #tpu.memory_space<vmem>>, vector<288x128xf32>,
    %c0_43 = arith.constant 0 : index
    %c0_44 = arith.constant 0 : index
    %43 = vector.load %arg11[%c0_43, %c0_44] : memref<288x128xf32, #tpu.memory_space<vmem>>, vector<288x128xf32>
    %c32_45 = arith.constant 32 : index
    %c0_46 = arith.constant 0 : index
    %44 = vector.load %arg10[%c32_45, %c0_46] : memref<352x128xbf16, #tpu.memory_space<vmem>>, vector<288x128xbf16>
    %c4 = arith.constant 4 : index
    %c0_47 = arith.constant 0 : index
    %c0_48 = arith.constant 0 : index
    %45 = vector.load %arg5[%c4, %c0_47, %c0_48] : memref<9x128x128xbf16, #tpu.memory_space<vmem>>, vector<1x128x128xbf16>
    %46 = vector.shape_cast %45 : vector<1x128x128xbf16> to vector<128x128xbf16>
    %cst_49 = arith.constant dense<0.000000e+00> : vector<288x128xf32>
    %47 = tpu.matmul %44, %46, %cst_49 {dimension_numbers = #tpu.dot_dimension_numbers<[1], [0], [0], [1], [0, 0, 1, 1], [], []>} : vector<288x128xbf16>, vector<128x128xbf16>, vector<288x128xf32> -> vector<288x128xf32>
    %48 = arith.addf %43, %47 : vector<288x128xf32>
    %c0_50 = arith.constant 0 : index
    %c0_51 = arith.constant 0 : index
    %49 = vector.load %arg11[%c0_50, %c0_51] : memref<288x128xf32, #tpu.memory_space<vmem>>, vector<288x128xf32>
    tpu.vector_store %arg11[%c0_50, %c0_51], %48 {strides = array<i32>} : memref<288x128xf32, #tpu.memory_space<vmem>>, vector<288x128xf32>,
    %c0_52 = arith.constant 0 : index
    %c0_53 = arith.constant 0 : index
    %50 = vector.load %arg11[%c0_52, %c0_53] : memref<288x128xf32, #tpu.memory_space<vmem>>, vector<288x128xf32>
    %c33 = arith.constant 33 : index
    %c0_54 = arith.constant 0 : index
    %51 = vector.load %arg10[%c33, %c0_54] : memref<352x128xbf16, #tpu.memory_space<vmem>>, vector<288x128xbf16>
    %c5 = arith.constant 5 : index
    %c0_55 = arith.constant 0 : index
    %c0_56 = arith.constant 0 : index
    %52 = vector.load %arg5[%c5, %c0_55, %c0_56] : memref<9x128x128xbf16, #tpu.memory_space<vmem>>, vector<1x128x128xbf16>
    %53 = vector.shape_cast %52 : vector<1x128x128xbf16> to vector<128x128xbf16>
    %cst_57 = arith.constant dense<0.000000e+00> : vector<288x128xf32>
    %54 = tpu.matmul %51, %53, %cst_57 {dimension_numbers = #tpu.dot_dimension_numbers<[1], [0], [0], [1], [0, 0, 1, 1], [], []>} : vector<288x128xbf16>, vector<128x128xbf16>, vector<288x128xf32> -> vector<288x128xf32>
    %55 = arith.addf %50, %54 : vector<288x128xf32>
    %c0_58 = arith.constant 0 : index
    %c0_59 = arith.constant 0 : index
    %56 = vector.load %arg11[%c0_58, %c0_59] : memref<288x128xf32, #tpu.memory_space<vmem>>, vector<288x128xf32>
    tpu.vector_store %arg11[%c0_58, %c0_59], %55 {strides = array<i32>} : memref<288x128xf32, #tpu.memory_space<vmem>>, vector<288x128xf32>,
    %c0_60 = arith.constant 0 : index
    %c0_61 = arith.constant 0 : index
    %57 = vector.load %arg11[%c0_60, %c0_61] : memref<288x128xf32, #tpu.memory_space<vmem>>, vector<288x128xf32>
    %c49 = arith.constant 49 : index
    %c0_62 = arith.constant 0 : index
    %58 = vector.load %arg10[%c49, %c0_62] : memref<352x128xbf16, #tpu.memory_space<vmem>>, vector<288x128xbf16>
    %c6 = arith.constant 6 : index
    %c0_63 = arith.constant 0 : index
    %c0_64 = arith.constant 0 : index
    %59 = vector.load %arg5[%c6, %c0_63, %c0_64] : memref<9x128x128xbf16, #tpu.memory_space<vmem>>, vector<1x128x128xbf16>
    %60 = vector.shape_cast %59 : vector<1x128x128xbf16> to vector<128x128xbf16>
    %cst_65 = arith.constant dense<0.000000e+00> : vector<288x128xf32>
    %61 = tpu.matmul %58, %60, %cst_65 {dimension_numbers = #tpu.dot_dimension_numbers<[1], [0], [0], [1], [0, 0, 1, 1], [], []>} : vector<288x128xbf16>, vector<128x128xbf16>, vector<288x128xf32> -> vector<288x128xf32>
    %62 = arith.addf %57, %61 : vector<288x128xf32>
    %c0_66 = arith.constant 0 : index
    %c0_67 = arith.constant 0 : index
    %63 = vector.load %arg11[%c0_66, %c0_67] : memref<288x128xf32, #tpu.memory_space<vmem>>, vector<288x128xf32>
    tpu.vector_store %arg11[%c0_66, %c0_67], %62 {strides = array<i32>} : memref<288x128xf32, #tpu.memory_space<vmem>>, vector<288x128xf32>,
    %c0_68 = arith.constant 0 : index
    %c0_69 = arith.constant 0 : index
    %64 = vector.load %arg11[%c0_68, %c0_69] : memref<288x128xf32, #tpu.memory_space<vmem>>, vector<288x128xf32>
    %c50 = arith.constant 50 : index
    %c0_70 = arith.constant 0 : index
    %65 = vector.load %arg10[%c50, %c0_70] : memref<352x128xbf16, #tpu.memory_space<vmem>>, vector<288x128xbf16>
    %c7 = arith.constant 7 : index
    %c0_71 = arith.constant 0 : index
    %c0_72 = arith.constant 0 : index
    %66 = vector.load %arg5[%c7, %c0_71, %c0_72] : memref<9x128x128xbf16, #tpu.memory_space<vmem>>, vector<1x128x128xbf16>
    %67 = vector.shape_cast %66 : vector<1x128x128xbf16> to vector<128x128xbf16>
    %cst_73 = arith.constant dense<0.000000e+00> : vector<288x128xf32>
    %68 = tpu.matmul %65, %67, %cst_73 {dimension_numbers = #tpu.dot_dimension_numbers<[1], [0], [0], [1], [0, 0, 1, 1], [], []>} : vector<288x128xbf16>, vector<128x128xbf16>, vector<288x128xf32> -> vector<288x128xf32>
    %69 = arith.addf %64, %68 : vector<288x128xf32>
    %c0_74 = arith.constant 0 : index
    %c0_75 = arith.constant 0 : index
    %70 = vector.load %arg11[%c0_74, %c0_75] : memref<288x128xf32, #tpu.memory_space<vmem>>, vector<288x128xf32>
    tpu.vector_store %arg11[%c0_74, %c0_75], %69 {strides = array<i32>} : memref<288x128xf32, #tpu.memory_space<vmem>>, vector<288x128xf32>,
    %c0_76 = arith.constant 0 : index
    %c0_77 = arith.constant 0 : index
    %71 = vector.load %arg11[%c0_76, %c0_77] : memref<288x128xf32, #tpu.memory_space<vmem>>, vector<288x128xf32>
    %c51 = arith.constant 51 : index
    %c0_78 = arith.constant 0 : index
    %72 = vector.load %arg10[%c51, %c0_78] : memref<352x128xbf16, #tpu.memory_space<vmem>>, vector<288x128xbf16>
    %c8 = arith.constant 8 : index
    %c0_79 = arith.constant 0 : index
    %c0_80 = arith.constant 0 : index
    %73 = vector.load %arg5[%c8, %c0_79, %c0_80] : memref<9x128x128xbf16, #tpu.memory_space<vmem>>, vector<1x128x128xbf16>
    %74 = vector.shape_cast %73 : vector<1x128x128xbf16> to vector<128x128xbf16>
    %cst_81 = arith.constant dense<0.000000e+00> : vector<288x128xf32>
    %75 = tpu.matmul %72, %74, %cst_81 {dimension_numbers = #tpu.dot_dimension_numbers<[1], [0], [0], [1], [0, 0, 1, 1], [], []>} : vector<288x128xbf16>, vector<128x128xbf16>, vector<288x128xf32> -> vector<288x128xf32>
    %76 = arith.addf %71, %75 : vector<288x128xf32>
    %c0_82 = arith.constant 0 : index
    %c0_83 = arith.constant 0 : index
    %77 = vector.load %arg11[%c0_82, %c0_83] : memref<288x128xf32, #tpu.memory_space<vmem>>, vector<288x128xf32>
    tpu.vector_store %arg11[%c0_82, %c0_83], %76 {strides = array<i32>} : memref<288x128xf32, #tpu.memory_space<vmem>>, vector<288x128xf32>,
    %c0_84 = arith.constant 0 : index
    %c0_85 = arith.constant 0 : index
    %78 = vector.load %arg11[%c0_84, %c0_85] : memref<288x128xf32, #tpu.memory_space<vmem>>, vector<288x128xf32>
    %c0_86 = arith.constant 0 : index
    %c0_87 = arith.constant 0 : index
    %79 = vector.load %arg6[%c0_86, %c0_87] : memref<1x128xf32, #tpu.memory_space<vmem>>, vector<1x128xf32>
    %80 = vector.broadcast %79 : vector<1x128xf32> to vector<288x128xf32>
    %81 = arith.addf %78, %80 : vector<288x128xf32>
    %cst_88 = arith.constant 0.000000e+00 : f32
    %82 = vector.broadcast %cst_88 : f32 to vector<288x128xf32>
    %83 = arith.maximumf %81, %82 : vector<288x128xf32>
    %84 = arith.truncf %83 : vector<288x128xf32> to vector<288x128xbf16>
    %c0_89 = arith.constant 0 : index
    %c0_90 = arith.constant 0 : index
    %c0_91 = arith.constant 0 : index
    %85 = vector.load %arg7[%c0_89, %c0_90, %c0_91] : memref<1x288x128xbf16, #tpu.memory_space<vmem>>, vector<1x288x128xbf16>
    %86 = vector.shape_cast %85 : vector<1x288x128xbf16> to vector<288x128xbf16>
    %87 = vector.shape_cast %84 : vector<288x128xbf16> to vector<1x288x128xbf16>
    tpu.vector_store %arg7[%c0_89, %c0_90, %c0_91], %87 {strides = array<i32>} : memref<1x288x128xbf16, #tpu.memory_space<vmem>>, vector<1x288x128xbf16>,
    %88 = arith.extf %84 : vector<288x128xbf16> to vector<288x128xf32>
    %c0_92 = arith.constant 0 : index
    %c0_93 = arith.constant 0 : index
    %89 = vector.load %arg4[%c0_92, %c0_93] : memref<288x1xf32, #tpu.memory_space<vmem>>, vector<288x1xf32>
    %90 = vector.broadcast %89 : vector<288x1xf32> to vector<288x128xf32>
    %91 = arith.mulf %88, %90 : vector<288x128xf32>
    %cst_94 = arith.constant dense<0.000000e+00> : vector<128xf32>
    %92 = vector.multi_reduction <add>, %91, %cst_94 [0] : vector<288x128xf32> to vector<128xf32>
    %93 = vector.shape_cast %92 : vector<128xf32> to vector<1x128xf32>
    %c0_95 = arith.constant 0 : index
    %c0_96 = arith.constant 0 : index
    %c0_97 = arith.constant 0 : index
    %94 = vector.load %arg8[%c0_95, %c0_96, %c0_97] : memref<1x1x128xf32, #tpu.memory_space<vmem>>, vector<1x1x128xf32>
    %95 = vector.shape_cast %94 : vector<1x1x128xf32> to vector<1x128xf32>
    %96 = vector.shape_cast %93 : vector<1x128xf32> to vector<1x1x128xf32>
    tpu.vector_store %arg8[%c0_95, %c0_96, %c0_97], %96 {strides = array<i32>} : memref<1x1x128xf32, #tpu.memory_space<vmem>>, vector<1x1x128xf32>,
    %97 = arith.mulf %91, %91 : vector<288x128xf32>
    %cst_98 = arith.constant dense<0.000000e+00> : vector<128xf32>
    %98 = vector.multi_reduction <add>, %97, %cst_98 [0] : vector<288x128xf32> to vector<128xf32>
    %99 = vector.shape_cast %98 : vector<128xf32> to vector<1x128xf32>
    %c0_99 = arith.constant 0 : index
    %c0_100 = arith.constant 0 : index
    %c0_101 = arith.constant 0 : index
    %100 = vector.load %arg9[%c0_99, %c0_100, %c0_101] : memref<1x1x128xf32, #tpu.memory_space<vmem>>, vector<1x1x128xf32>
    %101 = vector.shape_cast %100 : vector<1x1x128xf32> to vector<1x128xf32>
    %102 = vector.shape_cast %99 : vector<1x128xf32> to vector<1x1x128xf32>
    tpu.vector_store %arg9[%c0_99, %c0_100, %c0_101], %102 {strides = array<i32>} : memref<1x1x128xf32, #tpu.memory_space<vmem>>, vector<1x1x128xf32>,
    return
  }
  func.func @transform_0(%arg0: i32) -> (i32, i32, i32) {
    %c0_i32 = arith.constant 0 : i32
    %c0_i32_0 = arith.constant 0 : i32
    %c0_i32_1 = arith.constant 0 : i32
    return %arg0, %c0_i32, %c0_i32_0 : i32, i32, i32
  }
  func.func @transform_1(%arg0: i32) -> (i32, i32) {
    %c0_i32 = arith.constant 0 : i32
    %c0_i32_0 = arith.constant 0 : i32
    %c0_i32_1 = arith.constant 0 : i32
    return %c0_i32, %c0_i32_0 : i32, i32
  }
  func.func @transform_2(%arg0: i32) -> (i32, i32, i32) {
    %c0_i32 = arith.constant 0 : i32
    %c0_i32_0 = arith.constant 0 : i32
    %c0_i32_1 = arith.constant 0 : i32
    return %arg0, %c0_i32, %c0_i32_0 : i32, i32, i32
  }
  func.func @transform_3(%arg0: i32) -> (i32, i32) {
    %c0_i32 = arith.constant 0 : i32
    %c0_i32_0 = arith.constant 0 : i32
    %c0_i32_1 = arith.constant 0 : i32
    return %c0_i32, %c0_i32_0 : i32, i32
  }
  func.func @transform_4(%arg0: i32) -> (i32, i32, i32) {
    %c0_i32 = arith.constant 0 : i32
    %c0_i32_0 = arith.constant 0 : i32
    %c0_i32_1 = arith.constant 0 : i32
    %c0_i32_2 = arith.constant 0 : i32
    return %c0_i32, %c0_i32_0, %c0_i32_1 : i32, i32, i32
  }
  func.func @transform_5(%arg0: i32) -> (i32, i32) {
    %c0_i32 = arith.constant 0 : i32
    %c0_i32_0 = arith.constant 0 : i32
    %c0_i32_1 = arith.constant 0 : i32
    return %c0_i32, %c0_i32_0 : i32, i32
  }
  func.func @transform_6(%arg0: i32) -> (i32, i32, i32) {
    %c0_i32 = arith.constant 0 : i32
    %c0_i32_0 = arith.constant 0 : i32
    %c0_i32_1 = arith.constant 0 : i32
    return %arg0, %c0_i32, %c0_i32_0 : i32, i32, i32
  }
  func.func @transform_7(%arg0: i32) -> (i32, i32, i32) {
    %c0_i32 = arith.constant 0 : i32
    %c0_i32_0 = arith.constant 0 : i32
    %c0_i32_1 = arith.constant 0 : i32
    return %arg0, %c0_i32, %c0_i32_0 : i32, i32, i32
  }
  func.func @transform_8(%arg0: i32) -> (i32, i32, i32) {
    %c0_i32 = arith.constant 0 : i32
    %c0_i32_0 = arith.constant 0 : i32
    %c0_i32_1 = arith.constant 0 : i32
    return %arg0, %c0_i32, %c0_i32_0 : i32, i32, i32
  }
}

module attributes {stable_mosaic.version = 11 : i64} {
  func.func @kernel(%arg0: i32, %arg1: memref<1x16x18x128xbf16, #tpu.memory_space<vmem>>, %arg2: memref<1x128xf32, #tpu.memory_space<vmem>>, %arg3: memref<1x128xf32, #tpu.memory_space<vmem>>, %arg4: memref<1x8x256xf32, #tpu.memory_space<vmem>>) attributes {dimension_semantics = [#tpu.dimension_semantics<parallel>], iteration_bounds = array<i64: 2>, scalar_prefetch = 0 : i64, scratch_operands = 0 : i64, tpu.core_type = #tpu.core_type<tc>, window_params = [{transform_indices = @transform_0, window_bounds = array<i64: 1, 16, 18, 128>}, {pipeline_mode = #tpu.pipeline_mode<synchronous>, transform_indices = @transform_1, window_bounds = array<i64: 1, 128>}, {pipeline_mode = #tpu.pipeline_mode<synchronous>, transform_indices = @transform_2, window_bounds = array<i64: 1, 128>}, {transform_indices = @transform_3, window_bounds = array<i64: 1, 8, 256>}]} {
    %c0 = arith.constant 0 : index
    %c0_0 = arith.constant 0 : index
    %c0_1 = arith.constant 0 : index
    %c0_2 = arith.constant 0 : index
    %0 = vector.load %arg1[%c0, %c0_0, %c0_1, %c0_2] : memref<1x16x18x128xbf16, #tpu.memory_space<vmem>>, vector<1x16x16x128xbf16>
    %1 = vector.shape_cast %0 : vector<1x16x16x128xbf16> to vector<16x16x128xbf16>
    %2 = arith.extf %1 : vector<16x16x128xbf16> to vector<16x16x128xf32>
    %3 = vector.shape_cast %2 : vector<16x16x128xf32> to vector<256x128xf32>
    %c0_3 = arith.constant 0 : index
    %c0_4 = arith.constant 0 : index
    %4 = vector.load %arg2[%c0_3, %c0_4] : memref<1x128xf32, #tpu.memory_space<vmem>>, vector<1x128xf32>
    %5 = vector.broadcast %4 : vector<1x128xf32> to vector<256x128xf32>
    %6 = arith.mulf %3, %5 : vector<256x128xf32>
    %c0_5 = arith.constant 0 : index
    %c0_6 = arith.constant 0 : index
    %7 = vector.load %arg3[%c0_5, %c0_6] : memref<1x128xf32, #tpu.memory_space<vmem>>, vector<1x128xf32>
    %8 = vector.broadcast %7 : vector<1x128xf32> to vector<256x128xf32>
    %9 = arith.addf %6, %8 : vector<256x128xf32>
    %10 = tpu.transpose %9, [1, 0] : vector<256x128xf32> -> vector<128x256xf32>
    %11 = vector.extract_strided_slice %10 {offsets = [0, 0], sizes = [8, 256], strides = [1, 1]} : vector<128x256xf32> to vector<8x256xf32>
    %c0_7 = arith.constant 0 : index
    %c0_8 = arith.constant 0 : index
    %c0_9 = arith.constant 0 : index
    %12 = vector.load %arg4[%c0_7, %c0_8, %c0_9] : memref<1x8x256xf32, #tpu.memory_space<vmem>>, vector<1x8x256xf32>
    %13 = vector.shape_cast %12 : vector<1x8x256xf32> to vector<8x256xf32>
    %14 = vector.shape_cast %11 : vector<8x256xf32> to vector<1x8x256xf32>
    tpu.vector_store %arg4[%c0_7, %c0_8, %c0_9], %14 {strides = array<i32>} : memref<1x8x256xf32, #tpu.memory_space<vmem>>, vector<1x8x256xf32>,
    return
  }
  func.func @transform_0(%arg0: i32) -> (i32, i32, i32, i32) {
    %c0_i32 = arith.constant 0 : i32
    %c0_i32_0 = arith.constant 0 : i32
    %c0_i32_1 = arith.constant 0 : i32
    %c0_i32_2 = arith.constant 0 : i32
    return %arg0, %c0_i32, %c0_i32_0, %c0_i32_1 : i32, i32, i32, i32
  }
  func.func @transform_1(%arg0: i32) -> (i32, i32) {
    %c0_i32 = arith.constant 0 : i32
    %c0_i32_0 = arith.constant 0 : i32
    %c0_i32_1 = arith.constant 0 : i32
    return %c0_i32, %c0_i32_0 : i32, i32
  }
  func.func @transform_2(%arg0: i32) -> (i32, i32) {
    %c0_i32 = arith.constant 0 : i32
    %c0_i32_0 = arith.constant 0 : i32
    %c0_i32_1 = arith.constant 0 : i32
    return %c0_i32, %c0_i32_0 : i32, i32
  }
  func.func @transform_3(%arg0: i32) -> (i32, i32, i32) {
    %c0_i32 = arith.constant 0 : i32
    %c0_i32_0 = arith.constant 0 : i32
    %c0_i32_1 = arith.constant 0 : i32
    return %arg0, %c0_i32, %c0_i32_0 : i32, i32, i32
  }
}

</mosaic_0001>

<bundles_post_ra>
// kernel: conv_block_forward.3
= control target key start
LH: loop header
LB: loop body
LE: loop exit
PB: predicated region body
PF: predicated region fallthrough
CT: control target
= control target key end

     0   :  { %s1764_s21 = smov 0   ;;  %s2124_s0 = inlined_call_operand.vmem [shape: bf16[2,288,40], index: 0, kind: input, shape index: {}]   ;;  %s2125_s1 = inlined_call_operand.vmem [shape: bf16[40,128], index: 1, kind: input, shape index: {}]   ;;  %s2126_s2 = inlined_call_operand.vmem [shape: f32[1,128], index: 2, kind: input, shape index: {}]   ;;  %s2127_s3 = inlined_call_operand.vmem [shape: f32[288,1], index: 3, kind: input, shape index: {}]   ;;  %s2128_s4 = inlined_call_operand.vmem [shape: bf16[2,288,128], index: 4, kind: output, shape index: {0}]   ;;  %s2129_s5 = inlined_call_operand.vmem [shape: f32[2,1,128], index: 5, kind: output, shape index: {1}]   ;;  %s2130_s6 = inlined_call_operand.vmem [shape: f32[2,1,128], index: 6, kind: output, shape index: {2}]  }
   0x1 LB: > { %s1388_s22 = sadd.s32 4294967295, %s1726_s21   ;;  %p1392_p0 = scmp.ge.s32.totalorder %s1726_s21, 1  ;;  %s1726_s21 = sphi %s1764_s21, %s17_s21  }
   0x2   : > { %p217_p1 = scmp.lt.s32.totalorder %s1726_s21, 3 }
   0x4   : > { %p218_p2 = pnand %p1392_p0, %p217_p1 }
   0x5   : > { %v1699_v0 = vld [vmem:[%s2125_s1] sm:$0xff] (!%p218_p2)   ;;  %v1700_v1 = vld [vmem:[%s2125_s1 + $0x8] sm:$0xff] (!%p218_p2)   ;;  %p253_p3 = scmp.lt.s32.totalorder (!%p218_p2), %s1388_s22, 1  ;;  %v913_v3 = vld [vmem:[%s2127_s3 + $0x10] sm:$0xff] (!%p218_p2)  ;;  %vm478_vm0 = vcmask (!%p218_p2), 1043456   ;;  %v1728_v5 = vmov (!%p218_p2), 0  }
   0x6   : > { %221 = sbr.rel (%p218_p2) target bundleno = 337 (0x151), region = 36  ;;  %1637 = vmatprep.subr.bf16.mxu0 (!%p218_p2), %v1699_v0  ;;  %1679 = vmatprep.subr.bf16.mxu1 (!%p218_p2), %v1699_v0  ;;  %v911_v2 = vld [vmem:[%s2127_s3] sm:$0xff] (!%p218_p2)  ;;  %v1701_v4 = vld [vmem:[%s2125_s1 + $0x10] ss:$0 sps:$4 sm:$0xff] (!%p218_p2)   ;;  %vm423_vm1 = vcmask (!%p218_p2), 326656   ;;  %v912_v6 = vld [vmem:[%s2127_s3 + $0x8] sm:$0xff] (!%p218_p2) }
   0x7   : > { %1638 = vmatpush3.bf16.msra.mxu0 (!%p218_p2), %v1699_v0  ;;  %1682 = vmatpush3.bf16.msra.mxu1 (!%p218_p2), %v1699_v0  ;;  %v914_v7 = vld [vmem:[%s2127_s3 + $0x18] sm:$0xff] (!%p218_p2)  ;;  %v480_v8 = vsel (!%p218_p2), %vm478_vm0, %v1701_v4, 0  ;;  %v915_v13 = vld [vmem:[%s2127_s3 + $0x20] sm:$0xff] (!%p218_p2)  ;;  %v916_v14 = vld [vmem:[%s2127_s3 + $0x28] sm:$0xff] (!%p218_p2) }
   0x8   : > { %1639 = vmatprep.subr.bf16.mxu0 (!%p218_p2), %v1700_v1  ;;  %1680 = vmatprep.subr.bf16.mxu1 (!%p218_p2), %v1700_v1  ;;  %v917_v17 = vld [vmem:[%s2127_s3 + $0x30] sm:$0xff] (!%p218_p2)  ;;  %v918_v18 = vld [vmem:[%s2127_s3 + $0x38] sm:$0xff] (!%p218_p2)  ;;  %v919_v23 = vld [vmem:[%s2127_s3 + $0x40] sm:$0xff] (!%p218_p2) }
   0x9   : > { %1697 = vset.pattern.permute.xlu0 (!%p218_p2), %v1728_v5  ;;  %1698 = vset.pattern.permute.xlu1 (!%p218_p2), %v1728_v5  ;;  %v920_v24 = vld [vmem:[%s2127_s3 + $0x48] sm:$0xff] (!%p218_p2)  ;;  %v921_v25 = vld [vmem:[%s2127_s3 + $0x50] sm:$0xff] (!%p218_p2)  ;;  %v922_v26 = vld [vmem:[%s2127_s3 + $0x58] sm:$0xff] (!%p218_p2) }
   0xa   : > { %949 = vperm.xlu0 (!%p218_p2), %1697, %v911_v2   ;;  %959 = vperm.xlu1 (!%p218_p2), %1698, %v913_v3   ;;  %v923_v31 = vld [vmem:[%s2127_s3 + $0x60] sm:$0xff] (!%p218_p2)  ;;  %v924_v32 = vld [vmem:[%s2127_s3 + $0x68] sm:$0xff] (!%p218_p2)  ;;  %v925_v33 = vld [vmem:[%s2127_s3 + $0x70] sm:$0xff] (!%p218_p2) }
   0xb   : > { %1640 = vmatpush3.bf16.msra.mxu0 (!%p218_p2), %v1700_v1  ;;  %1683 = vmatpush3.bf16.msra.mxu1 (!%p218_p2), %v1700_v1  ;;  %v926_v34 = vld [vmem:[%s2127_s3 + $0x78] sm:$0xff] (!%p218_p2)  ;;  %v927_v38 = vld [vmem:[%s2127_s3 + $0x80] sm:$0xff] (!%p218_p2)  ;;  %v928_v39 = vld [vmem:[%s2127_s3 + $0x88] sm:$0xff] (!%p218_p2) }
   0xc   : > { %1685 = vmatprep.subr.msk.bf16.mxu0 (!%p218_p2), %vm478_vm0, %v1701_v4  ;;  %1686 = vmatprep.subr.msk.bf16.mxu1 (!%p218_p2), %vm478_vm0, %v1701_v4  ;;  %v929_v40 = vld [vmem:[%s2127_s3 + $0x90] sm:$0xff] (!%p218_p2)  ;;  %v930_v41 = vld [vmem:[%s2127_s3 + $0x98] sm:$0xff] (!%p218_p2)  ;;  %v931_v43 = vld [vmem:[%s2127_s3 + $0xa0] sm:$0xff] (!%p218_p2) }
   0xd   : > { %s2132_s22 = smov (!%p253_p3, %s1388_s22), 1  ;;  %v932_v44 = vld [vmem:[%s2127_s3 + $0xa8] sm:$0xff]  ;;  %v933_v45 = vld [vmem:[%s2127_s3 + $0xb0] sm:$0xff]  ;;  %v934_v46 = vld [vmem:[%s2127_s3 + $0xb8] sm:$0xff] }
   0xe   : > { %s1687_s9 = smul.u32 144, %s2132_s22  ;;  %954 = vperm.xlu0 %1697, %v912_v6   ;;  %964 = vperm.xlu1 %1698, %v914_v7   ;;  %v935_v47 = vld [vmem:[%s2127_s3 + $0xc0] sm:$0xff]  ;;  %v936_v48 = vld [vmem:[%s2127_s3 + $0xc8] sm:$0xff]  ;;  %v937_v49 = vld [vmem:[%s2127_s3 + $0xd0] sm:$0xff]  ;;  %s265_s27 = scalar_lea.vmem %s2129_s5, %s2132_s22 }
   0xf   : > { %1642 = vmatpush3.bf16.msra.mxu0 %v480_v8  ;;  %1684 = vmatpush3.bf16.msra.mxu1 %v480_v8  ;;  %v938_v50 = vld [vmem:[%s2127_s3 + $0xd8] sm:$0xff]  ;;  %v939_v51 = vld [vmem:[%s2127_s3 + $0xe0] sm:$0xff]  ;;  %v940_v52 = vld [vmem:[%s2127_s3 + $0xe8] sm:$0xff]  ;;  %s268_s30 = scalar_lea.vmem %s2130_s6, %s2132_s22 }
  0x10   : > { %s1795_s12 = scalar_lea.vmem %s2124_s0, %s1687_s9  ;;  %v941_v53 = vld [vmem:[%s2127_s3 + $0xf0] sm:$0xff]  ;;  %v942_v54 = vld [vmem:[%s2127_s3 + $0xf8] sm:$0xff]  ;;  %v943_v55 = vld [vmem:[%s2127_s3 + $0x100] sm:$0xff]  ;;  %s1957_s25 = scalar_lea.vmem %s2128_s4, %s1687_s9 }
  0x11   : > { %v1702_v9 = vld [vmem:[%s1795_s12] sm:$0xff]   ;;  %v1703_v10 = vld [vmem:[%s1795_s12 + $0x50] sm:$0xff]   ;;  %v1704_v11 = vld [vmem:[%s1795_s12 + $0x8] sm:$0xff]  }
  0x12   : > { %1643 = vmatprep.mubr.msk.bf16.mxu0 %vm423_vm1, %v1702_v9  ;;  %v1705_v12 = vld [vmem:[%s1795_s12 + $0x58] sm:$0xff]   ;;  %1663 = vmatprep.mubr.msk.bf16.mxu1 %vm423_vm1, %v1703_v10  ;;  %v1706_v15 = vld [vmem:[%s1795_s12 + $0x10] sm:$0xff]   ;;  %v1707_v16 = vld [vmem:[%s1795_s12 + $0x60] sm:$0xff]  }
  0x13   : > { %1644 = vmatmul.mubr.msk.bf16.vlgmr.msra.gmra.mrb[0].mxu0 %vm423_vm1, %v1704_v11  ;;  %1664 = vmatmul.mubr.msk.bf16.vlgmr.msra.gmra.mrb[0].mxu1 %vm423_vm1, %v1705_v12  ;;  %v1708_v19 = vld [vmem:[%s1795_s12 + $0x18] sm:$0xff]   ;;  %v1709_v20 = vld [vmem:[%s1795_s12 + $0x68] sm:$0xff]   ;;  %v1710_v21 = vld [vmem:[%s1795_s12 + $0x20] sm:$0xff]  }
  0x14   : > { %1647 = vmatprep.mubr.msk.bf16.mxu0 %vm423_vm1, %v1706_v15  ;;  %1667 = vmatprep.mubr.msk.bf16.mxu1 %vm423_vm1, %v1707_v16  ;;  %v1711_v22 = vld [vmem:[%s1795_s12 + $0x70] sm:$0xff]   ;;  %v1712_v27 = vld [vmem:[%s1795_s12 + $0x28] sm:$0xff]   ;;  %v1713_v28 = vld [vmem:[%s1795_s12 + $0x78] sm:$0xff]  }
  0x15   : > { %969 = vperm.xlu0 %1697, %v915_v13   ;;  %974 = vperm.xlu1 %1698, %v916_v14   ;;  %v1714_v29 = vld [vmem:[%s1795_s12 + $0x30] sm:$0xff]   ;;  %v1715_v30 = vld [vmem:[%s1795_s12 + $0x80] sm:$0xff]   ;;  %v1716_v35 = vld [vmem:[%s1795_s12 + $0x38] sm:$0xff]  }
  0x16   : > { %v1717_v36 = vld [vmem:[%s1795_s12 + $0x88] sm:$0xff]   ;;  %v1718_v37 = vld [vmem:[%s1795_s12 + $0x40] sm:$0xff]   ;;  %v945_v57 = vld [vmem:[%s2127_s3 + $0x110] sm:$0xff] }
  0x17   : > { %v1719_v42 = vld [vmem:[%s1795_s12 + $0x48] sm:$0xff]   ;;  %v946_v58 = vld [vmem:[%s2127_s3 + $0x118] sm:$0xff]  ;;  %v1938_v63 = vld [vmem:[%s2126_s2] ss:$0 sm:$0xff] }
  0x18   : > { %v944_v56 = vld [vmem:[%s2127_s3 + $0x108] sm:$0xff] }
  0x19   : > { %979 = vperm.xlu0 %1697, %v917_v17   ;;  %984 = vperm.xlu1 %1698, %v918_v18  }
  0x1b   : > { %1648 = vmatmul.mubr.msk.bf16.gmra.mrb[4].mxu0 %vm423_vm1, %v1708_v19  ;;  %1668 = vmatmul.mubr.msk.bf16.gmra.mrb[4].mxu1 %vm423_vm1, %v1709_v20 }
  0x1c   : > { %1651 = vmatprep.mubr.msk.bf16.mxu0 %vm423_vm1, %v1710_v21  ;;  %1671 = vmatprep.mubr.msk.bf16.mxu1 %vm423_vm1, %v1711_v22 }
  0x1d   : > { %989 = vperm.xlu0 %1697, %v919_v23   ;;  %994 = vperm.xlu1 %1698, %v920_v24  }
  0x21   : > { %999 = vperm.xlu0 %1697, %v921_v25   ;;  %1004 = vperm.xlu1 %1698, %v922_v26  }
  0x23   : > { %1652 = vmatmul.mubr.msk.bf16.gmra.mrb[8].mxu0 %vm423_vm1, %v1712_v27  ;;  %1672 = vmatmul.mubr.msk.bf16.gmra.mrb[8].mxu1 %vm423_vm1, %v1713_v28 }
  0x24   : > { %1655 = vmatprep.mubr.msk.bf16.mxu0 %vm423_vm1, %v1714_v29  ;;  %1675 = vmatprep.mubr.msk.bf16.mxu1 %vm423_vm1, %v1715_v30 }
  0x25   : > { %1009 = vperm.xlu0 %1697, %v923_v31   ;;  %1014 = vperm.xlu1 %1698, %v924_v32  }
  0x29   : > { %1019 = vperm.xlu0 %1697, %v925_v33   ;;  %1024 = vperm.xlu1 %1698, %v926_v34  }
  0x2b   : > { %1656 = vmatmul.mubr.msk.bf16.gmra.mrb[12].mxu0 %vm423_vm1, %v1716_v35  ;;  %1676 = vmatmul.mubr.msk.bf16.gmra.mrb[12].mxu1 %vm423_vm1, %v1717_v36 }
  0x2c   : > { %1659 = vmatprep.mubr.msk.bf16.mxu0 %vm423_vm1, %v1718_v37 }
  0x2d   : > { %1029 = vperm.xlu0 %1697, %v927_v38   ;;  %1034 = vperm.xlu1 %1698, %v928_v39  }
  0x31   : > { %1039 = vperm.xlu0 %1697, %v929_v40   ;;  %1044 = vperm.xlu1 %1698, %v930_v41  }
  0x33   : > { %1660 = vmatmul.mubr.msk.bf16.gmra.mrb[16].mxu0 %vm423_vm1, %v1719_v42 }
  0x35   : > { %1049 = vperm.xlu0 %1697, %v931_v43   ;;  %1054 = vperm.xlu1 %1698, %v932_v44  }
  0x39   : > { %1059 = vperm.xlu0 %1697, %v933_v45   ;;  %1064 = vperm.xlu1 %1698, %v934_v46  }
  0x3d   : > { %1069 = vperm.xlu0 %1697, %v935_v47   ;;  %1074 = vperm.xlu1 %1698, %v936_v48  }
  0x41   : > { %1079 = vperm.xlu0 %1697, %v937_v49   ;;  %1084 = vperm.xlu1 %1698, %v938_v50  }
  0x45   : > { %1089 = vperm.xlu0 %1697, %v939_v51   ;;  %1094 = vperm.xlu1 %1698, %v940_v52  }
  0x49   : > { %1099 = vperm.xlu0 %1697, %v941_v53   ;;  %1104 = vperm.xlu1 %1698, %v942_v54  }
  0x4d   : > { %1109 = vperm.xlu0 %1697, %v943_v55   ;;  %1114 = vperm.xlu1 %1698, %v944_v56  }
  0x51   : > { %1119 = vperm.xlu0 %1697, %v945_v57   ;;  %1124 = vperm.xlu1 %1698, %v946_v58  }
  0x89   : > { %v950_v59 = vpop.permute.xlu0 %949  ;;  %v960_v60 = vpop.permute.xlu1 %959 }
  0x8d   : > { %v955_v61 = vpop.permute.xlu0 %954  ;;  %v965_v62 = vpop.permute.xlu1 %964 }
  0x94   : > { %v1940_v0 = vpop.permute.xlu0 %969  ;;  %v1942_v1 = vpop.permute.xlu1 %974 }
  0x98   : > { %v1959_v26 = vpop.permute.xlu0 %979  ;;  %v1961_v27 = vpop.permute.xlu1 %984 }
  0x9c   : > { %v1973_v51 = vpop.permute.xlu0 %989  ;;  %v1975_v52 = vpop.permute.xlu1 %994 }
  0xe6   : > { %v1645_v2 = vpop.f32.mrb[0].mxu0  ;;  %v1665_v3 = vpop.f32.mrb[0].mxu1 }
  0xe7   : > { %v525_v4 = vadd.f32 %v1645_v2, %v1938_v63  ;;  %v605_v5 = vadd.f32 %v1665_v3, %v1938_v63  ;;  %v516_v6 = vpop.f32.mrb[1].mxu0  ;;  %v596_v7 = vpop.f32.mrb[1].mxu1 }
  0xe8   : > { %v517_v8 = vadd.f32 %v1938_v63, %v516_v6  ;;  %v597_v9 = vadd.f32 %v1938_v63, %v596_v7  ;;  %v1646_v10 = vpop.f32.mrb[2].mxu0  ;;  %v1666_v11 = vpop.f32.mrb[2].mxu1 }
  0xe9   : > { %v681_v12 = vmax.f32 %v605_v5, 0.0  ;;  %v528_v13 = vadd.f32 %v1646_v10, %v1938_v63  ;;  %v608_v14 = vadd.f32 %v1666_v11, %v1938_v63  ;;  %v519_v15 = vpop.f32.mrb[3].mxu0  ;;  %v599_v16 = vpop.f32.mrb[3].mxu1  ;;  %v661_v20 = vmax.f32 %v525_v4, 0.0 }
  0xea   : > { %v679_v17 = vmax.f32 %v597_v9, 0.0  ;;  %v520_v18 = vadd.f32 %v1938_v63, %v519_v15  ;;  %v600_v19 = vadd.f32 %v1938_v63, %v599_v16  ;;  %v659_v23 = vmax.f32 %v517_v8, 0.0 }
  0xeb   : > { %v662_v21 = vmax.f32 %v528_v13, 0.0  ;;  %v682_v22 = vmax.f32 %v608_v14, 0.0 }
  0xec   : > { %v660_v24 = vmax.f32 %v520_v18, 0.0  ;;  %v680_v25 = vmax.f32 %v600_v19, 0.0 }
  0xed   : > { %v696_v28 = vpack.c.bf16 %v662_v21, %v661_v20  ;;  %v1963_v29 = vpack.c.bf16 %v682_v22, %v681_v12 }
  0xee   : > { %v695_v30 = vpack.c.bf16 %v660_v24, %v659_v23  ;;  %v1965_v31 = vpack.c.bf16 %v680_v25, %v679_v17  ;;  %v1649_v32 = vpop.f32.mrb[4].mxu0  ;;  %v1669_v33 = vpop.f32.mrb[4].mxu1 }
  0xef   : > { %1599 = vst [vmem:[%s1957_s25 + $0x8] sm:$0xff] %v696_v28   ;;  %v877_v34 = vunpack.c.l.bf16 %v696_v28  ;;  %v878_v35 = vunpack.c.h.bf16 %v696_v28  ;;  %1609 = vst [vmem:[%s1957_s25 + $0x58] sm:$0xff] %v1963_v29   ;;  %v532_v36 = vpop.f32.mrb[5].mxu0  ;;  %v612_v37 = vpop.f32.mrb[5].mxu1  ;;  %v541_v54 = vadd.f32 %v1649_v32, %v1938_v63  ;;  %v621_v55 = vadd.f32 %v1669_v33, %v1938_v63 }
  0xf0   : > { %1513 = vst [vmem:[%s1957_s25] sm:$0xff] %v695_v30   ;;  %v875_v38 = vunpack.c.l.bf16 %v695_v30  ;;  %v876_v39 = vunpack.c.h.bf16 %v695_v30  ;;  %1608 = vst [vmem:[%s1957_s25 + $0x50] sm:$0xff] %v1965_v31   ;;  %v1650_v40 = vpop.f32.mrb[6].mxu0  ;;  %v1670_v41 = vpop.f32.mrb[6].mxu1  ;;  %v533_v56 = vadd.f32 %v1938_v63, %v532_v36 }
  0xf1   : > { %v1129_v42 = vmul.f32 %v960_v60, %v877_v34  ;;  %v535_v43 = vpop.f32.mrb[7].mxu0  ;;  %v615_v44 = vpop.f32.mrb[7].mxu1  ;;  %v1130_v47 = vmul.f32 %v965_v62, %v878_v35  ;;  %v544_v60 = vadd.f32 %v1650_v40, %v1938_v63  ;;  %v685_v3 = vmax.f32 %v621_v55, 0.0 }
  0xf2   : > { %v1127_v45 = vmul.f32 %v950_v59, %v875_v38  ;;  %v1128_v46 = vmul.f32 %v955_v61, %v876_v39  ;;  %v613_v59 = vadd.f32 %v1938_v63, %v612_v37  ;;  %v624_v4 = vadd.f32 %v1670_v41, %v1938_v63  ;;  %v1987_v25 = vpop.permute.xlu0 %999  ;;  %v1990_v30 = vpop.permute.xlu1 %1004 }
  0xf3   : > { %v1207_v53 = vmul.f32 %v1129_v42, %v1129_v42  ;;  %v1208_v2 = vmul.f32 %v1130_v47, %v1130_v47  ;;  %v665_v8 = vmax.f32 %v541_v54, 0.0  ;;  %v666_v9 = vmax.f32 %v544_v60, 0.0 }
  0xf4   : > { %v1163_v48 = vadd.f32 %v1128_v46, %v1127_v45  ;;  %v1205_v49 = vmul.f32 %v1127_v45, %v1127_v45  ;;  %v1206_v50 = vmul.f32 %v1128_v46, %v1128_v46  ;;  %v536_v10 = vadd.f32 %v1938_v63, %v535_v43 }
  0xf5   : > { %v683_v13 = vmax.f32 %v613_v59, 0.0  ;;  %v686_v14 = vmax.f32 %v624_v4, 0.0  ;;  %v616_v16 = vadd.f32 %v1938_v63, %v615_v44  ;;  %v663_v19 = vmax.f32 %v533_v56, 0.0 }
  0xf6   : > { %v1164_v57 = vadd.f32 %v1163_v48, %v1129_v42  ;;  %v1241_v58 = vadd.f32 %v1206_v50, %v1205_v49  ;;  %v1653_v61 = vpop.f32.mrb[8].mxu0  ;;  %v1673_v62 = vpop.f32.mrb[8].mxu1  ;;  %v698_v20 = vpack.c.bf16 %v666_v9, %v665_v8  ;;  %v664_v21 = vmax.f32 %v536_v10, 0.0 }
  0xf7   : > { %v548_v5 = vpop.f32.mrb[9].mxu0  ;;  %v628_v6 = vpop.f32.mrb[9].mxu1  ;;  %v1985_v23 = vpack.c.bf16 %v686_v14, %v685_v3  ;;  %v684_v24 = vmax.f32 %v616_v16, 0.0  ;;  %v557_v34 = vadd.f32 %v1653_v61, %v1938_v63  ;;  %v637_v37 = vadd.f32 %v1673_v62, %v1938_v63 }
  0xf8   : > { %v1242_v7 = vadd.f32 %v1241_v58, %v1207_v53  ;;  %v1654_v11 = vpop.f32.mrb[10].mxu0  ;;  %v1674_v12 = vpop.f32.mrb[10].mxu1  ;;  %v1165_v15 = vadd.f32 %v1164_v57, %v1130_v47  ;;  %1601 = vst [vmem:[%s1957_s25 + $0x18] sm:$0xff] %v698_v20   ;;  %v697_v28 = vpack.c.bf16 %v664_v21, %v663_v19  ;;  %v881_v32 = vunpack.c.l.bf16 %v698_v20 }
  0xf9   : > { %v551_v17 = vpop.f32.mrb[11].mxu0  ;;  %v631_v18 = vpop.f32.mrb[11].mxu1  ;;  %1611 = vst [vmem:[%s1957_s25 + $0x68] sm:$0xff] %v1985_v23   ;;  %v1994_v33 = vpack.c.bf16 %v684_v24, %v683_v13  ;;  %v882_v40 = vunpack.c.h.bf16 %v698_v20  ;;  %v549_v41 = vadd.f32 %v1938_v63, %v548_v5  ;;  %v669_v49 = vmax.f32 %v557_v34, 0.0 }
  0xfa   : > { %v1243_v22 = vadd.f32 %v1242_v7, %v1208_v2  ;;  %1600 = vst [vmem:[%s1957_s25 + $0x10] sm:$0xff] %v697_v28   ;;  %v879_v35 = vunpack.c.l.bf16 %v697_v28  ;;  %v880_v36 = vunpack.c.h.bf16 %v697_v28  ;;  %v1133_v48 = vmul.f32 %v1959_v26, %v881_v32  ;;  %v2019_v54 = vpop.permute.xlu0 %1009  ;;  %v2025_v26 = vpop.permute.xlu1 %1014 }
  0xfb   : > { %1610 = vst [vmem:[%s1957_s25 + $0x60] sm:$0xff] %v1994_v33   ;;  %v689_v57 = vmax.f32 %v637_v37, 0.0  ;;  %v667_v58 = vmax.f32 %v549_v41, 0.0  ;;  %v560_v59 = vadd.f32 %v1654_v11, %v1938_v63  ;;  %v640_v60 = vadd.f32 %v1674_v12, %v1938_v63 }
  0xfc   : > { %v1131_v44 = vmul.f32 %v1940_v0, %v879_v35  ;;  %v1132_v45 = vmul.f32 %v1942_v1, %v880_v36  ;;  %v629_v0 = vadd.f32 %v1938_v63, %v628_v6  ;;  %v1134_v1 = vmul.f32 %v1961_v27, %v882_v40 }
  0xfd   : > { %v552_v3 = vadd.f32 %v1938_v63, %v551_v17  ;;  %v1211_v4 = vmul.f32 %v1133_v48, %v1133_v48  ;;  %v670_v5 = vmax.f32 %v560_v59, 0.0  ;;  %v690_v7 = vmax.f32 %v640_v60, 0.0 }
  0xfe   : > { %v1999_v38 = vpop.f32.mrb[12].mxu0  ;;  %v1677_v39 = vpop.f32.mrb[12].mxu1  ;;  %v1166_v55 = vadd.f32 %v1165_v15, %v1131_v44  ;;  %v1209_v56 = vmul.f32 %v1131_v44, %v1131_v44  ;;  %v1210_v62 = vmul.f32 %v1132_v45, %v1132_v45  ;;  %v632_v8 = vadd.f32 %v1938_v63, %v631_v18 }
  0xff   : > { %v2004_v42 = vpop.f32.mrb[13].mxu0  ;;  %v2006_v43 = vpop.f32.mrb[13].mxu1  ;;  %v687_v9 = vmax.f32 %v629_v0, 0.0  ;;  %v668_v10 = vmax.f32 %v552_v3, 0.0  ;;  %v700_v12 = vpack.c.bf16 %v670_v5, %v669_v49  ;;  %v2031_v13 = vpack.c.bf16 %v690_v7, %v689_v57 }
 0x100   : > { %v2010_v46 = vpop.f32.mrb[14].mxu0  ;;  %v2012_v47 = vpop.f32.mrb[14].mxu1  ;;  %v1167_v61 = vadd.f32 %v1166_v55, %v1132_v45  ;;  %v1244_v2 = vadd.f32 %v1243_v22, %v1209_v56  ;;  %v688_v14 = vmax.f32 %v632_v8, 0.0  ;;  %v1212_v17 = vmul.f32 %v1134_v1, %v1134_v1 }
 0x101   : > { %v2015_v50 = vpop.f32.mrb[15].mxu0  ;;  %v2017_v53 = vpop.f32.mrb[15].mxu1  ;;  %v699_v18 = vpack.c.bf16 %v668_v10, %v667_v58  ;;  %1603 = vst [vmem:[%s1957_s25 + $0x28] sm:$0xff] %v700_v12   ;;  %v885_v22 = vunpack.c.l.bf16 %v700_v12  ;;  %v886_v24 = vunpack.c.h.bf16 %v700_v12  ;;  %1613 = vst [vmem:[%s1957_s25 + $0x78] sm:$0xff] %v2031_v13   ;;  %v653_v40 = vadd.f32 %v1677_v39, %v1938_v63 }
 0x102   : > { %v1168_v6 = vadd.f32 %v1167_v61, %v1133_v48  ;;  %v1245_v27 = vadd.f32 %v1244_v2, %v1210_v62  ;;  %v2035_v16 = vpop.permute.xlu0 %1019  ;;  %v2042_v32 = vpop.permute.xlu1 %1024  ;;  %v2045_v37 = vpack.c.bf16 %v688_v14, %v687_v9  ;;  %v573_v49 = vadd.f32 %v1999_v38, %v1938_v63 }
 0x103   : > { %1602 = vst [vmem:[%s1957_s25 + $0x20] sm:$0xff] %v699_v18   ;;  %v883_v34 = vunpack.c.l.bf16 %v699_v18  ;;  %v884_v35 = vunpack.c.h.bf16 %v699_v18  ;;  %v1137_v45 = vmul.f32 %v1987_v25, %v885_v22  ;;  %v1138_v48 = vmul.f32 %v1990_v30, %v886_v24 }
 0x104   : > { %v1246_v19 = vadd.f32 %v1245_v27, %v1211_v4  ;;  %v1169_v20 = vadd.f32 %v1168_v6, %v1134_v1  ;;  %1612 = vst [vmem:[%s1957_s25 + $0x70] sm:$0xff] %v2045_v37   ;;  %v693_v0 = vmax.f32 %v653_v40, 0.0  ;;  %v565_v39 = vadd.f32 %v1938_v63, %v2004_v42 }
 0x105   : > { %v1135_v41 = vmul.f32 %v1973_v51, %v883_v34  ;;  %v1136_v44 = vmul.f32 %v1975_v52, %v884_v35  ;;  %v645_v51 = vadd.f32 %v1938_v63, %v2006_v43  ;;  %v576_v52 = vadd.f32 %v2010_v46, %v1938_v63 }
 0x106   : > { %v2029_v11 = vpop.f32.mrb[16].mxu0  ;;  %v1247_v36 = vadd.f32 %v1246_v19, %v1212_v17  ;;  %v2056_v55 = vpop.permute.xlu0 %1029  ;;  %v656_v38 = vadd.f32 %v2012_v47, %v1938_v63  ;;  %v1215_v59 = vmul.f32 %v1137_v45, %v1137_v45  ;;  %v1216_v60 = vmul.f32 %v1138_v48, %v1138_v48 }
 0x107   : > { %v2033_v15 = vpop.f32.mrb[17].mxu0  ;;  %v1170_v56 = vadd.f32 %v1169_v20, %v1135_v41  ;;  %v1213_v57 = vmul.f32 %v1135_v41, %v1135_v41  ;;  %v2064_v25 = vpop.permute.xlu1 %1034  ;;  %v1214_v1 = vmul.f32 %v1136_v44, %v1136_v44  ;;  %v673_v61 = vmax.f32 %v573_v49, 0.0 }
 0x108   : > { %v2037_v21 = vpop.f32.mrb[18].mxu0  ;;  %v674_v62 = vmax.f32 %v576_v52, 0.0  ;;  %v694_v43 = vmax.f32 %v656_v38, 0.0  ;;  %v568_v46 = vadd.f32 %v1938_v63, %v2015_v50  ;;  %v671_v3 = vmax.f32 %v565_v39, 0.0 }
 0x109   : > { %v583_v28 = vpop.f32.mrb[19].mxu0  ;;  %v1171_v30 = vadd.f32 %v1170_v56, %v1136_v44  ;;  %v1248_v58 = vadd.f32 %v1247_v36, %v1213_v57  ;;  %v691_v4 = vmax.f32 %v645_v51, 0.0  ;;  %v648_v7 = vadd.f32 %v1938_v63, %v2017_v53 }
 0x10a   : > { %v702_v5 = vpack.c.bf16 %v674_v62, %v673_v61  ;;  %v1040_v47 = vpop.permute.xlu0 %1039  ;;  %v2072_v6 = vpack.c.bf16 %v694_v43, %v693_v0  ;;  %v672_v27 = vmax.f32 %v568_v46, 0.0  ;;  %v589_v20 = vadd.f32 %v2029_v11, %v1938_v63 }
 0x10b   : > { %v1172_v42 = vadd.f32 %v1171_v30, %v1137_v45  ;;  %v1249_v2 = vadd.f32 %v1248_v58, %v1214_v1  ;;  %v692_v10 = vmax.f32 %v648_v7, 0.0  ;;  %v1045_v12 = vpop.permute.xlu1 %1044  ;;  %v581_v22 = vadd.f32 %v1938_v63, %v2033_v15 }
 0x10c   : > { %1605 = vst [vmem:[%s1957_s25 + $0x38] sm:$0xff] %v702_v5   ;;  %1615 = vst [vmem:[%s1957_s25 + $0x88] sm:$0xff] %v2072_v6   ;;  %v701_v50 = vpack.c.bf16 %v672_v27, %v671_v3  ;;  %v889_v19 = vunpack.c.l.bf16 %v702_v5  ;;  %v890_v34 = vunpack.c.h.bf16 %v702_v5  ;;  %v592_v40 = vadd.f32 %v2037_v21, %v1938_v63 }
 0x10d   : > { %v1250_v8 = vadd.f32 %v1249_v2, %v1215_v59  ;;  %v1173_v9 = vadd.f32 %v1172_v42, %v1138_v48  ;;  %v2077_v17 = vpack.c.bf16 %v692_v10, %v691_v4  ;;  %v584_v41 = vadd.f32 %v1938_v63, %v583_v28 }
 0x10e   : > { %1604 = vst [vmem:[%s1957_s25 + $0x30] sm:$0xff] %v701_v50   ;;  %v887_v18 = vunpack.c.l.bf16 %v701_v50  ;;  %v888_v53 = vunpack.c.h.bf16 %v701_v50  ;;  %v1050_v24 = vpop.permute.xlu0 %1049  ;;  %v1141_v45 = vmul.f32 %v2035_v16, %v889_v19  ;;  %v677_v49 = vmax.f32 %v589_v20, 0.0 }
 0x10f   : > { %v1251_v14 = vadd.f32 %v1250_v8, %v1216_v60  ;;  %1614 = vst [vmem:[%s1957_s25 + $0x80] sm:$0xff] %v2077_v17   ;;  %v1055_v44 = vpop.permute.xlu1 %1054  ;;  %v675_v15 = vmax.f32 %v581_v22, 0.0  ;;  %v678_v56 = vmax.f32 %v592_v40, 0.0  ;;  %v676_v57 = vmax.f32 %v584_v41, 0.0 }
 0x110   : > { %v1139_v35 = vmul.f32 %v2019_v54, %v887_v18  ;;  %v1140_v36 = vmul.f32 %v2025_v26, %v888_v53  ;;  %v1142_v54 = vmul.f32 %v2042_v32, %v890_v34  ;;  %v1219_v63 = vmul.f32 %v1141_v45, %v1141_v45 }
 0x111   : > { %v704_v51 = vpack.c.bf16 %v678_v56, %v677_v49  ;;  %v703_v21 = vpack.c.bf16 %v676_v57, %v675_v15  ;;  %v895_v43 = vunpack.c.l.bf16 %v1965_v31  ;;  %v896_v7 = vunpack.c.h.bf16 %v1965_v31 }
 0x112   : > { %v1174_v48 = vadd.f32 %v1173_v9, %v1139_v35  ;;  %v1217_v11 = vmul.f32 %v1139_v35, %v1139_v35  ;;  %v1218_v26 = vmul.f32 %v1140_v36, %v1140_v36  ;;  %v1060_v52 = vpop.permute.xlu0 %1059  ;;  %v1220_v59 = vmul.f32 %v1142_v54, %v1142_v54 }
 0x113   : > { %1607 = vst [vmem:[%s1957_s25 + $0x48] sm:$0xff] %v704_v51   ;;  %v893_v16 = vunpack.c.l.bf16 %v704_v51  ;;  %1606 = vst [vmem:[%s1957_s25 + $0x40] sm:$0xff] %v703_v21   ;;  %v891_v1 = vunpack.c.l.bf16 %v703_v21  ;;  %v892_v58 = vunpack.c.h.bf16 %v703_v21  ;;  %v1065_v38 = vpop.permute.xlu1 %1064  ;;  %v894_v62 = vunpack.c.h.bf16 %v704_v51 }
 0x114   : > { %v1175_v0 = vadd.f32 %v1174_v48, %v1140_v36  ;;  %v1252_v39 = vadd.f32 %v1251_v14, %v1217_v11  ;;  %v897_v14 = vunpack.c.l.bf16 %v1963_v29  ;;  %v1147_v19 = vmul.f32 %v1050_v24, %v895_v43 }
 0x115   : > { %v1143_v32 = vmul.f32 %v2056_v55, %v891_v1  ;;  %v1144_v42 = vmul.f32 %v2064_v25, %v892_v58  ;;  %v1145_v46 = vmul.f32 %v1040_v47, %v893_v16  ;;  %v1146_v8 = vmul.f32 %v1045_v12, %v894_v62 }
 0x116   : > { %v1176_v28 = vadd.f32 %v1175_v0, %v1141_v45  ;;  %v1253_v30 = vadd.f32 %v1252_v39, %v1218_v26  ;;  %v1070_v5 = vpop.permute.xlu0 %1069  ;;  %v898_v53 = vunpack.c.h.bf16 %v1963_v29  ;;  %v1148_v20 = vmul.f32 %v1055_v44, %v896_v7 }
 0x117   : > { %v1221_v4 = vmul.f32 %v1143_v32, %v1143_v32  ;;  %v1222_v9 = vmul.f32 %v1144_v42, %v1144_v42  ;;  %v1075_v50 = vpop.permute.xlu1 %1074  ;;  %v1223_v55 = vmul.f32 %v1145_v46, %v1145_v46  ;;  %v1224_v47 = vmul.f32 %v1146_v8, %v1146_v8 }
 0x118   : > { %v1254_v60 = vadd.f32 %v1253_v30, %v1219_v63  ;;  %v1177_v61 = vadd.f32 %v1176_v28, %v1142_v54  ;;  %v1149_v36 = vmul.f32 %v1060_v52, %v897_v14  ;;  %v1225_v31 = vmul.f32 %v1147_v19, %v1147_v19 }
 0x119   : > { %v899_v12 = vunpack.c.l.bf16 %v1994_v33  ;;  %v1150_v48 = vmul.f32 %v1065_v38, %v898_v53  ;;  %v1226_v11 = vmul.f32 %v1148_v20, %v1148_v20  ;;  %v900_v24 = vunpack.c.h.bf16 %v1994_v33 }
 0x11a   : > { %v1255_v2 = vadd.f32 %v1254_v60, %v1220_v59  ;;  %v1178_v3 = vadd.f32 %v1177_v61, %v1143_v32  ;;  %v1080_v35 = vpop.permute.xlu0 %1079  ;;  %v901_v29 = vunpack.c.l.bf16 %v1985_v23  ;;  %v1227_v44 = vmul.f32 %v1149_v36, %v1149_v36 }
 0x11b   : > { %v1085_v45 = vpop.permute.xlu1 %1084  ;;  %v1151_v56 = vmul.f32 %v1070_v5, %v899_v12  ;;  %v902_v26 = vunpack.c.h.bf16 %v1985_v23  ;;  %v1228_v39 = vmul.f32 %v1150_v48, %v1150_v48  ;;  %v1152_v51 = vmul.f32 %v1075_v50, %v900_v24 }
 0x11c   : > { %v1179_v27 = vadd.f32 %v1178_v3, %v1144_v42  ;;  %v1256_v10 = vadd.f32 %v1255_v2, %v1221_v4  ;;  %v1153_v28 = vmul.f32 %v1080_v35, %v901_v29  ;;  %v903_v33 = vunpack.c.l.bf16 %v2045_v37 }
 0x11d   : > { %v1229_v30 = vmul.f32 %v1151_v56, %v1151_v56  ;;  %v1154_v58 = vmul.f32 %v1085_v45, %v902_v26  ;;  %v1230_v38 = vmul.f32 %v1152_v51, %v1152_v51  ;;  %v904_v59 = vunpack.c.h.bf16 %v2045_v37 }
 0x11e   : > { %v1180_v18 = vadd.f32 %v1179_v27, %v1145_v46  ;;  %v1257_v25 = vadd.f32 %v1256_v10, %v1222_v9  ;;  %v1090_v0 = vpop.permute.xlu0 %1089  ;;  %v905_v23 = vunpack.c.l.bf16 %v2031_v13  ;;  %v1231_v32 = vmul.f32 %v1153_v28, %v1153_v28 }
 0x11f   : > { %v1095_v63 = vpop.permute.xlu1 %1094  ;;  %v1155_v42 = vmul.f32 %v1090_v0, %v903_v33  ;;  %v906_v3 = vunpack.c.h.bf16 %v2031_v13  ;;  %v1232_v4 = vmul.f32 %v1154_v58, %v1154_v58  ;;  %v907_v37 = vunpack.c.l.bf16 %v2077_v17 }
 0x120   : > { %v1181_v22 = vadd.f32 %v1180_v18, %v1146_v8  ;;  %v1258_v34 = vadd.f32 %v1257_v25, %v1223_v55  ;;  %v1156_v5 = vmul.f32 %v1095_v63, %v904_v59  ;;  %v908_v18 = vunpack.c.h.bf16 %v2077_v17 }
 0x121   : > { %v1233_v9 = vmul.f32 %v1155_v42, %v1155_v42  ;;  %v909_v13 = vunpack.c.l.bf16 %v2072_v6 }
 0x122   : > { %v1182_v40 = vadd.f32 %v1181_v22, %v1147_v19  ;;  %v1259_v41 = vadd.f32 %v1258_v34, %v1224_v47  ;;  %v1100_v62 = vpop.permute.xlu0 %1099  ;;  %v1234_v55 = vmul.f32 %v1156_v5, %v1156_v5 }
 0x123   : > { %v1105_v46 = vpop.permute.xlu1 %1104  ;;  %v1157_v27 = vmul.f32 %v1100_v62, %v905_v23 }
 0x124   : > { %v1183_v49 = vadd.f32 %v1182_v40, %v1148_v20  ;;  %v1260_v15 = vadd.f32 %v1259_v41, %v1225_v31  ;;  %v1158_v19 = vmul.f32 %v1105_v46, %v906_v3  ;;  %v910_v31 = vunpack.c.h.bf16 %v2072_v6 }
 0x125   : > { %v1235_v47 = vmul.f32 %v1157_v27, %v1157_v27 }
 0x126   : > { %v1184_v57 = vadd.f32 %v1183_v49, %v1149_v36  ;;  %v1261_v54 = vadd.f32 %v1260_v15, %v1226_v11  ;;  %v1110_v14 = vpop.permute.xlu0 %1109  ;;  %v1236_v36 = vmul.f32 %v1158_v19, %v1158_v19 }
 0x127   : > { %v1115_v20 = vpop.permute.xlu1 %1114  ;;  %v1159_v22 = vmul.f32 %v1110_v14, %v907_v37 }
 0x128   : > { %v1185_v21 = vadd.f32 %v1184_v57, %v1150_v48  ;;  %v1262_v52 = vadd.f32 %v1261_v54, %v1227_v44  ;;  %v1160_v12 = vmul.f32 %v1115_v20, %v908_v18 }
 0x129   : > { %v1237_v11 = vmul.f32 %v1159_v22, %v1159_v22 }
 0x12a   : > { %v1186_v16 = vadd.f32 %v1185_v21, %v1151_v56  ;;  %v1263_v1 = vadd.f32 %v1262_v52, %v1228_v39  ;;  %v1120_v45 = vpop.permute.xlu0 %1119  ;;  %v1238_v29 = vmul.f32 %v1160_v12, %v1160_v12 }
 0x12b   : > { %v1161_v48 = vmul.f32 %v1120_v45, %v909_v13  ;;  %v1125_v49 = vpop.permute.xlu1 %1124 }
 0x12c   : > { %v1187_v60 = vadd.f32 %v1186_v16, %v1152_v51  ;;  %v1264_v61 = vadd.f32 %v1263_v1, %v1229_v30  ;;  %v1162_v15 = vmul.f32 %v1125_v49, %v910_v31 }
 0x12d   : > { %v1239_v57 = vmul.f32 %v1161_v48, %v1161_v48 }
 0x12e   : > { %v1188_v2 = vadd.f32 %v1187_v60, %v1153_v28  ;;  %v1265_v43 = vadd.f32 %v1264_v61, %v1230_v38  ;;  %v1240_v26 = vmul.f32 %v1162_v15, %v1162_v15 }
 0x130   : > { %v1189_v7 = vadd.f32 %v1188_v2, %v1154_v58  ;;  %v1266_v8 = vadd.f32 %v1265_v43, %v1231_v32 }
 0x132   : > { %v1190_v10 = vadd.f32 %v1189_v7, %v1155_v42  ;;  %v1267_v50 = vadd.f32 %v1266_v8, %v1232_v4 }
 0x134   : > { %v1191_v25 = vadd.f32 %v1190_v10, %v1156_v5  ;;  %v1268_v53 = vadd.f32 %v1267_v50, %v1233_v9 }
 0x136   : > { %v1192_v34 = vadd.f32 %v1191_v25, %v1157_v27  ;;  %v1269_v35 = vadd.f32 %v1268_v53, %v1234_v55 }
 0x138   : > { %v1193_v40 = vadd.f32 %v1192_v34, %v1158_v19  ;;  %v1270_v41 = vadd.f32 %v1269_v35, %v1235_v47 }
 0x13a   : > { %v1194_v24 = vadd.f32 %v1193_v40, %v1159_v22  ;;  %v1271_v17 = vadd.f32 %v1270_v41, %v1236_v36 }
 0x13c   : > { %v1195_v44 = vadd.f32 %v1194_v24, %v1160_v12  ;;  %v1272_v56 = vadd.f32 %v1271_v17, %v1237_v11 }
 0x13e   : > { %v1196_v54 = vadd.f32 %v1195_v44, %v1161_v48  ;;  %v1273_v0 = vadd.f32 %v1272_v56, %v1238_v29 }
 0x140   : > { %v1197_v6 = vadd.f32 %v1196_v54, %v1162_v15  ;;  %v1274_v39 = vadd.f32 %v1273_v0, %v1239_v57 }
 0x142   : > { %v1198_v51 = vrot.slane %v1197_v6, 4  ;;  %v1275_v21 = vadd.f32 %v1274_v39, %v1240_v26 }
 0x144   : > { %v1199_v52 = vadd.f32 %v1198_v51, %v1197_v6  ;;  %v1276_v63 = vrot.slane %v1275_v21, 4 }
 0x146   : > { %v1200_v28 = vrot.slane %v1199_v52, 2  ;;  %v1277_v30 = vadd.f32 %v1276_v63, %v1275_v21 }
 0x148   : > { %v1201_v33 = vadd.f32 %v1200_v28, %v1199_v52  ;;  %v1278_v16 = vrot.slane %v1277_v30, 2 }
 0x14a   : > { %v1202_v1 = vrot.slane %v1201_v33, 1  ;;  %v1279_v58 = vadd.f32 %v1278_v16, %v1277_v30 }
 0x14c   : > { %v1203_v38 = vadd.f32 %v1202_v1, %v1201_v33  ;;  %v1280_v59 = vrot.slane %v1279_v58, 1 }
 0x14e   : > { %1204 = vst [vmem:[%s265_s27] sm:$0x1] %v1203_v38  ;;  %v1281_v60 = vadd.f32 %v1280_v59, %v1279_v58 }
 0x150   : > { %1282 = vst [vmem:[%s268_s30] sm:$0x1] %v1281_v60 }
 0x151 PF: > { %s17_s21 = sadd.s32 1, %s1726_s21  }
 0x152   : > { %p14_p4 = scmp.ge.s32.totalorder %s17_s21, 4  }
 0x154   :  { %16 = sbr.rel (!%p14_p4) target bundleno = 1 (0x1), region = 90 }

// kernel: conv_block_forward.5
= control target key start
LH: loop header
LB: loop body
LE: loop exit
PB: predicated region body
PF: predicated region fallthrough
CT: control target
= control target key end

     0   :  { %s523_s12 = smov 0   ;;  %s636_s0 = inlined_call_operand.vmem [shape: bf16[2,16,18,128], index: 0, kind: input, shape index: {}]   ;;  %s637_s1 = inlined_call_operand.vmem [shape: f32[1,128], index: 1, kind: input, shape index: {}]   ;;  %s638_s2 = inlined_call_operand.vmem [shape: f32[1,128], index: 2, kind: input, shape index: {}]   ;;  %s639_s3 = inlined_call_operand.vmem [shape: f32[2,8,256], index: 3, kind: output, shape index: {}]  }
   0x1 LB: > { %s434_s13 = sadd.s32 4294967295, %s501_s12   ;;  %p438_p0 = scmp.ge.s32.totalorder %s501_s12, 1  ;;  %s501_s12 = sphi %s523_s12, %s13_s12  }
   0x2   : > { %p137_p1 = scmp.lt.s32.totalorder %s501_s12, 3 }
   0x4   : > { %p138_p2 = pnand %p438_p0, %p137_p1 }
   0x5   : > { %p161_p3 = scmp.lt.s32.totalorder (!%p138_p2), %s434_s13, 1  ;;  %v542_v0 = vld [vmem:[%s637_s1] ss:$0 sm:$0xff] (!%p138_p2) }
   0x6   : > { %141 = sbr.rel (%p138_p2) target bundleno = 155 (0x9b), region = 32  ;;  %v551_v9 = vld [vmem:[%s638_s2] ss:$0 sm:$0xff] (!%p138_p2) }
   0xd   : > { %s641_s13 = smov (!%p161_p3, %s434_s13), 1 }
   0xe   : > { %s486_s14 = smul.u32 192, %s641_s13  ;;  %s446_s22 = sshll.u32 %s641_s13, 4 }
   0xf   : > { %s170_s25 = scalar_lea.vmem %s639_s3, %s446_s22 }
  0x10   : > { %s537_s17 = scalar_lea.vmem %s636_s0, %s486_s14 }
  0x11   : > { %v482_v1 = vld [vmem:[%s537_s17 + $0x60] sm:$0xff]   ;;  %v189_v3 = vld [vmem:[%s537_s17 + $0x6c] sm:$0xff]   ;;  %v483_v24 = vld [vmem:[%s537_s17 + $0x78] sm:$0xff]  }
  0x12   : > { %v448_v2 = vld [vmem:[%s537_s17] sm:$0xff]   ;;  %v465_v4 = vunpack.c.l.bf16 %v482_v1  ;;  %v466_v6 = vunpack.c.h.bf16 %v482_v1  ;;  %v173_v8 = vld [vmem:[%s537_s17 + $0xc] sm:$0xff]   ;;  %v221_v10 = vunpack.c.l.bf16 %v189_v3  ;;  %v222_v19 = vunpack.c.h.bf16 %v189_v3  ;;  %v479_v25 = vld [vmem:[%s537_s17 + $0x18] sm:$0xff]  }
  0x13   : > { %v449_v5 = vunpack.c.l.bf16 %v448_v2  ;;  %v450_v7 = vunpack.c.h.bf16 %v448_v2  ;;  %v205_v11 = vunpack.c.l.bf16 %v173_v8  ;;  %v206_v20 = vunpack.c.h.bf16 %v173_v8  ;;  %v193_v38 = vld [vmem:[%s537_s17 + $0x84] sm:$0xff]   ;;  %v484_v52 = vld [vmem:[%s537_s17 + $0x90] sm:$0xff]   ;;  %v197_v3 = vld [vmem:[%s537_s17 + $0x9c] sm:$0xff]  }
  0x14   : > { %v258_v12 = vmul.f32 %v465_v4, %v542_v0  ;;  %v259_v14 = vmul.f32 %v466_v6, %v542_v0  ;;  %v260_v18 = vmul.f32 %v542_v0, %v221_v10  ;;  %v261_v26 = vmul.f32 %v542_v0, %v222_v19  ;;  %v177_v39 = vld [vmem:[%s537_s17 + $0x24] sm:$0xff]   ;;  %v480_v53 = vld [vmem:[%s537_s17 + $0x30] sm:$0xff]   ;;  %v181_v4 = vld [vmem:[%s537_s17 + $0x3c] sm:$0xff]  }
  0x15   : > { %v242_v13 = vmul.f32 %v449_v5, %v542_v0  ;;  %v243_v15 = vmul.f32 %v450_v7, %v542_v0  ;;  %v244_v23 = vmul.f32 %v542_v0, %v205_v11  ;;  %v245_v27 = vmul.f32 %v542_v0, %v206_v20  ;;  %v481_v19 = vld [vmem:[%s537_s17 + $0x48] sm:$0xff]  }
  0x16   : > { %v297_v16 = vadd.f32 %v551_v9, %v258_v12  ;;  %v298_v21 = vadd.f32 %v551_v9, %v259_v14  ;;  %v299_v28 = vadd.f32 %v551_v9, %v260_v18  ;;  %v469_v30 = vunpack.c.l.bf16 %v483_v24  ;;  %v485_v18 = vld [vmem:[%s537_s17 + $0xa8] sm:$0xff]  }
  0x17   : > { %v281_v17 = vadd.f32 %v551_v9, %v242_v13  ;;  %v282_v22 = vadd.f32 %v551_v9, %v243_v15  ;;  %v283_v29 = vadd.f32 %v551_v9, %v244_v23  ;;  %v453_v31 = vunpack.c.l.bf16 %v479_v25 }
  0x18   : > { %345 = vxpose.xlu1.b32.start [1/16] (narrow) %v297_v16, 8  ;;  %v300_v32 = vadd.f32 %v551_v9, %v261_v26  ;;  %v470_v33 = vunpack.c.h.bf16 %v483_v24  ;;  %v284_v34 = vadd.f32 %v551_v9, %v245_v27  ;;  %v262_v35 = vmul.f32 %v469_v30, %v542_v0 }
  0x19   : > { %313 = vxpose.xlu0.b32.start [1/16] (narrow) %v281_v17, 8  ;;  %v246_v36 = vmul.f32 %v453_v31, %v542_v0  ;;  %v454_v37 = vunpack.c.h.bf16 %v479_v25  ;;  %v225_v41 = vunpack.c.l.bf16 %v193_v38  ;;  %v209_v45 = vunpack.c.l.bf16 %v177_v39 }
  0x1a   : > { %v263_v40 = vmul.f32 %v470_v33, %v542_v0  ;;  %v301_v42 = vadd.f32 %v551_v9, %v262_v35  ;;  %v226_v47 = vunpack.c.h.bf16 %v193_v38  ;;  %v210_v51 = vunpack.c.h.bf16 %v177_v39  ;;  %v185_v33 = vld [vmem:[%s537_s17 + $0x54] sm:$0xff]  }
  0x1b   : > { %v285_v43 = vadd.f32 %v551_v9, %v246_v36  ;;  %v247_v44 = vmul.f32 %v454_v37, %v542_v0  ;;  %v264_v46 = vmul.f32 %v542_v0, %v225_v41  ;;  %v248_v50 = vmul.f32 %v542_v0, %v209_v45 }
  0x1c   : > { %346 = vxpose.xlu1.b32.cont [2/16] (narrow) %v298_v21, 8  ;;  %v302_v48 = vadd.f32 %v551_v9, %v263_v40  ;;  %v265_v54 = vmul.f32 %v542_v0, %v226_v47  ;;  %v473_v55 = vunpack.c.l.bf16 %v484_v52  ;;  %v249_v58 = vmul.f32 %v542_v0, %v210_v51 }
  0x1d   : > { %314 = vxpose.xlu0.b32.cont [2/16] (narrow) %v282_v22, 8  ;;  %v286_v49 = vadd.f32 %v551_v9, %v247_v44  ;;  %v303_v56 = vadd.f32 %v551_v9, %v264_v46  ;;  %v287_v57 = vadd.f32 %v551_v9, %v248_v50  ;;  %v457_v59 = vunpack.c.l.bf16 %v480_v53 }
  0x1e   : > { %v304_v60 = vadd.f32 %v551_v9, %v265_v54  ;;  %v266_v61 = vmul.f32 %v473_v55, %v542_v0  ;;  %v288_v62 = vadd.f32 %v551_v9, %v249_v58  ;;  %v474_v1 = vunpack.c.h.bf16 %v484_v52 }
  0x1f   : > { %v250_v63 = vmul.f32 %v457_v59, %v542_v0  ;;  %v458_v2 = vunpack.c.h.bf16 %v480_v53  ;;  %v229_v6 = vunpack.c.l.bf16 %v197_v3  ;;  %v213_v11 = vunpack.c.l.bf16 %v181_v4 }
  0x20   : > { %347 = vxpose.xlu1.b32.cont [3/16] (narrow) %v299_v28, 8  ;;  %v305_v5 = vadd.f32 %v551_v9, %v266_v61  ;;  %v267_v8 = vmul.f32 %v474_v1, %v542_v0  ;;  %v230_v13 = vunpack.c.h.bf16 %v197_v3  ;;  %v214_v17 = vunpack.c.h.bf16 %v181_v4 }
  0x21   : > { %315 = vxpose.xlu0.b32.cont [3/16] (narrow) %v283_v29, 8  ;;  %v289_v7 = vadd.f32 %v551_v9, %v250_v63  ;;  %v251_v10 = vmul.f32 %v458_v2, %v542_v0  ;;  %v268_v12 = vmul.f32 %v542_v0, %v229_v6  ;;  %v252_v16 = vmul.f32 %v542_v0, %v213_v11 }
  0x22   : > { %v306_v14 = vadd.f32 %v551_v9, %v267_v8  ;;  %v269_v20 = vmul.f32 %v542_v0, %v230_v13  ;;  %v477_v21 = vunpack.c.l.bf16 %v485_v18  ;;  %v253_v24 = vmul.f32 %v542_v0, %v214_v17 }
  0x23   : > { %v290_v15 = vadd.f32 %v551_v9, %v251_v10  ;;  %v307_v22 = vadd.f32 %v551_v9, %v268_v12  ;;  %v291_v23 = vadd.f32 %v551_v9, %v252_v16  ;;  %v461_v25 = vunpack.c.l.bf16 %v481_v19 }
  0x24   : > { %348 = vxpose.xlu1.b32.cont [4/16] (narrow) %v300_v32, 8  ;;  %v308_v26 = vadd.f32 %v551_v9, %v269_v20  ;;  %v270_v27 = vmul.f32 %v477_v21, %v542_v0  ;;  %v292_v28 = vadd.f32 %v551_v9, %v253_v24  ;;  %v478_v30 = vunpack.c.h.bf16 %v485_v18  ;;  %v201_v32 = vld [vmem:[%s537_s17 + $0xb4] sm:$0xff]  }
  0x25   : > { %316 = vxpose.xlu0.b32.cont [4/16] (narrow) %v284_v34, 8  ;;  %v254_v29 = vmul.f32 %v461_v25, %v542_v0  ;;  %v462_v31 = vunpack.c.h.bf16 %v481_v19  ;;  %v233_v35 = vunpack.c.l.bf16 %v201_v32  ;;  %v217_v39 = vunpack.c.l.bf16 %v185_v33 }
  0x26   : > { %v309_v34 = vadd.f32 %v551_v9, %v270_v27  ;;  %v271_v37 = vmul.f32 %v478_v30, %v542_v0  ;;  %v234_v41 = vunpack.c.h.bf16 %v201_v32  ;;  %v218_v45 = vunpack.c.h.bf16 %v185_v33 }
  0x27   : > { %v293_v36 = vadd.f32 %v551_v9, %v254_v29  ;;  %v255_v38 = vmul.f32 %v462_v31, %v542_v0  ;;  %v272_v40 = vmul.f32 %v542_v0, %v233_v35  ;;  %v256_v44 = vmul.f32 %v542_v0, %v217_v39 }
  0x28   : > { %349 = vxpose.xlu1.b32.cont [5/16] (narrow) %v301_v42, 8  ;;  %v310_v42 = vadd.f32 %v551_v9, %v271_v37  ;;  %v273_v46 = vmul.f32 %v542_v0, %v234_v41 }
  0x29   : > { %317 = vxpose.xlu0.b32.cont [5/16] (narrow) %v285_v43, 8  ;;  %v294_v43 = vadd.f32 %v551_v9, %v255_v38  ;;  %v311_v47 = vadd.f32 %v551_v9, %v272_v40 }
  0x2a   : > { %v312_v50 = vadd.f32 %v551_v9, %v273_v46 }
  0x2c   : > { %350 = vxpose.xlu1.b32.cont [6/16] (narrow) %v302_v48, 8  ;;  %v295_v48 = vadd.f32 %v551_v9, %v256_v44 }
  0x2d   : > { %318 = vxpose.xlu0.b32.cont [6/16] (narrow) %v286_v49, 8  ;;  %v257_v49 = vmul.f32 %v542_v0, %v218_v45 }
  0x2f   : > { %v296_v51 = vadd.f32 %v551_v9, %v257_v49 }
  0x30   : > { %351 = vxpose.xlu1.b32.cont [7/16] (narrow) %v303_v56, 8 }
  0x31   : > { %319 = vxpose.xlu0.b32.cont [7/16] (narrow) %v287_v57, 8 }
  0x34   : > { %352 = vxpose.xlu1.b32.cont [8/16] (narrow) %v304_v60, 8 }
  0x35   : > { %320 = vxpose.xlu0.b32.cont [8/16] (narrow) %v288_v62, 8 }
  0x38   : > { %353 = vxpose.xlu1.b32.cont [9/16] (narrow) %v305_v5, 8 }
  0x39   : > { %321 = vxpose.xlu0.b32.cont [9/16] (narrow) %v289_v7, 8 }
  0x3c   : > { %354 = vxpose.xlu1.b32.cont [10/16] (narrow) %v306_v14, 8 }
  0x3d   : > { %322 = vxpose.xlu0.b32.cont [10/16] (narrow) %v290_v15, 8 }
  0x40   : > { %355 = vxpose.xlu1.b32.cont [11/16] (narrow) %v307_v22, 8 }
  0x41   : > { %323 = vxpose.xlu0.b32.cont [11/16] (narrow) %v291_v23, 8 }
  0x44   : > { %356 = vxpose.xlu1.b32.cont [12/16] (narrow) %v308_v26, 8 }
  0x45   : > { %324 = vxpose.xlu0.b32.cont [12/16] (narrow) %v292_v28, 8 }
  0x48   : > { %357 = vxpose.xlu1.b32.cont [13/16] (narrow) %v309_v34, 8 }
  0x49   : > { %325 = vxpose.xlu0.b32.cont [13/16] (narrow) %v293_v36, 8 }
  0x4c   : > { %358 = vxpose.xlu1.b32.cont [14/16] (narrow) %v310_v42, 8 }
  0x4d   : > { %326 = vxpose.xlu0.b32.cont [14/16] (narrow) %v294_v43, 8 }
  0x50   : > { %359 = vxpose.xlu1.b32.cont [15/16] (narrow) %v311_v47, 8 }
  0x51   : > { %327 = vxpose.xlu0.b32.cont [15/16] (narrow) %v295_v48, 8 }
  0x54   : > { %360 = vxpose.xlu1.b32.end [16/16] (narrow) %v312_v50, 8 }
  0x55   : > { %328 = vxpose.xlu0.b32.end [16/16] (narrow) %v296_v51, 8 }
  0x98   : > { %v361_v52 = vpop.trf.xlu1 }
  0x99   : > { %v329_v53 = vpop.trf.xlu0  ;;  %378 = vst [vmem:[%s170_s25 + $0x8] sm:$0xff] %v361_v52 }
  0x9a   : > { %377 = vst [vmem:[%s170_s25] sm:$0xff] %v329_v53 }
  0x9b PF: > { %s13_s12 = sadd.s32 1, %s501_s12  }
  0x9c   : > { %p10_p4 = scmp.ge.s32.totalorder %s13_s12, 4  }
  0x9e   :  { %12 = sbr.rel (!%p10_p4) target bundleno = 1 (0x1), region = 62 }

// kernel: conv_block_forward.4
= control target key start
LH: loop header
LB: loop body
LE: loop exit
PB: predicated region body
PF: predicated region fallthrough
CT: control target
= control target key end

     0   :  { %s7698_s27 = smov 0   ;;  %s9375_s0 = inlined_call_operand.vmem [shape: bf16[2,288,128], index: 0, kind: input, shape index: {}]   ;;  %s9376_s1 = inlined_call_operand.vmem [shape: f32[1,128], index: 1, kind: input, shape index: {}]   ;;  %s9377_s2 = inlined_call_operand.vmem [shape: f32[2,1,128], index: 2, kind: input, shape index: {}]   ;;  %s9378_s3 = inlined_call_operand.vmem [shape: f32[288,1], index: 3, kind: input, shape index: {}]   ;;  %s9379_s4 = inlined_call_operand.vmem [shape: bf16[9,128,128], index: 4, kind: input, shape index: {}]   ;;  %s9380_s5 = inlined_call_operand.vmem [shape: f32[1,128], index: 5, kind: input, shape index: {}]   ;;  %s9381_s6 = inlined_call_operand.vmem [shape: bf16[2,288,128], index: 6, kind: output, shape index: {0}]   ;;  %s9382_s7 = inlined_call_operand.vmem [shape: f32[2,1,128], index: 7, kind: output, shape index: {1}]   ;;  %s9383_s8 = inlined_call_operand.vmem [shape: f32[2,1,128], index: 8, kind: output, shape index: {2}]  }
   0x1 LB: > { %s6064_s28 = sadd.s32 4294967295, %s7650_s27   ;;  %p6068_p0 = scmp.ge.s32.totalorder %s7650_s27, 1  ;;  %s7650_s27 = sphi %s7698_s27, %s19_s27  }
   0x2   : > { %p275_p1 = scmp.lt.s32.totalorder %s7650_s27, 3 }
   0x4   : > { %p276_p2 = pnand %p6068_p0, %p275_p1 }
   0x5   : > { %v7709_v0 = vld [vmem:[%s9378_s3 + $0x10] sm:$0xff] (!%p276_p2)  ;;  %v7714_v1 = vld [vmem:[%s9378_s3] sm:$0xff] (!%p276_p2)  ;;  %v7652_v2 = vmov (!%p276_p2), 0   ;;  %v7727_v3 = vld [vmem:[%s9378_s3 + $0x18] sm:$0xff] (!%p276_p2)  ;;  %vm841_vm0 = vsmask.f32 (!%p276_p2), 1280 }
   0x6   : > { %279 = sbr.rel (%p276_p2) target bundleno = 727 (0x2d7), region = 44  ;;  %7561 = vset.pattern.permute.xlu1 (!%p276_p2), %v7652_v2  ;;  %748 = vst [vmem:[#allocation2] sm:$0xff] (!%p276_p2), %v7652_v2  ;;  %749 = vst [vmem:[#allocation2 + $0x8] sm:$0xff] (!%p276_p2), %v7652_v2  ;;  %7560 = vset.pattern.permute.xlu0 (!%p276_p2), %v7652_v2  ;;  %v7732_v4 = vld [vmem:[%s9378_s3 + $0x8] sm:$0xff] (!%p276_p2)  ;;  %v7744_v6 = vld [vmem:[%s9378_s3 + $0x20] sm:$0xff] (!%p276_p2)  ;;  %v853_v31 = vrot.slane (!%p276_p2), %v7652_v2, 6 }
   0x7   : > { %768 = vst [vmem:[#allocation2 + $0xa0] sm:$0xff] (!%p276_p2), %v7652_v2  ;;  %769 = vst [vmem:[#allocation2 + $0xa8] sm:$0xff] (!%p276_p2), %v7652_v2  ;;  %544 = vperm.xlu1 (!%p276_p2), %7561, %v7709_v0   ;;  %534 = vperm.xlu0 (!%p276_p2), %7560, %v7714_v1   ;;  %v7739_v5 = vld [vmem:[%s9378_s3 + $0x28] sm:$0xff] (!%p276_p2)  ;;  %v7751_v7 = vld [vmem:[%s9378_s3 + $0x38] sm:$0xff] (!%p276_p2)  ;;  %v856_v32 = vrot.slane (!%p276_p2), %v7652_v2, 7  ;;  %p318_p3 = scmp.lt.s32.totalorder (!%p276_p2), %s6064_s28, 1 }
   0x8   : > { %v7756_v8 = vld [vmem:[%s9378_s3 + $0x30] sm:$0xff] (!%p276_p2)  ;;  %v7562_v9 = vld [vmem:[%s9379_s4 + $0x100] sm:$0xff] (!%p276_p2)   ;;  %v7764_v10 = vld [vmem:[%s9378_s3 + $0x48] sm:$0xff] (!%p276_p2)  ;;  %vm3246_vm1 = vsmask.f32 (!%p276_p2), 7424  ;;  %vm1382_vm2 = vcmask (!%p276_p2), 1040384  }
   0x9   : > { %v7563_v11 = vld [vmem:[%s9379_s4 + $0x108] sm:$0xff] (!%p276_p2)   ;;  %v7564_v12 = vld [vmem:[%s9379_s4] sm:$0xff] (!%p276_p2)   ;;  %6986 = vmatprep.subr.bf16.mxu0 (!%p276_p2), %v7562_v9  ;;  %v7565_v15 = vld [vmem:[%s9379_s4 + $0x110] sm:$0xff] (!%p276_p2)   ;;  %v7874_v42 = vor.u32 (!%p276_p2), %v856_v32, %v853_v31  ;;  %vm4336_vm3 = vcmask (!%p276_p2), 1046528   ;;  %vm1807_vm4 = vsmask.f32 (!%p276_p2), 256 }
   0xa   : > { %v7777_v13 = vld [vmem:[%s9378_s3 + $0x40] sm:$0xff] (!%p276_p2)  ;;  %6987 = vmatpush3.bf16.msra.mxu0 (!%p276_p2), %v7562_v9  ;;  %6778 = vmatprep.subr.bf16.mxu1 (!%p276_p2), %v7564_v12  ;;  %v7566_v14 = vld [vmem:[%s9379_s4 + $0x8] sm:$0xff] (!%p276_p2)   ;;  %v7790_v16 = vld [vmem:[%s9378_s3 + $0x58] sm:$0xff] (!%p276_p2)  ;;  %vm4761_vm5 = vsmask.f32 (!%p276_p2), 6400 }
   0xb   : > { %549 = vperm.xlu1 (!%p276_p2), %7561, %v7727_v3   ;;  %539 = vperm.xlu0 (!%p276_p2), %7560, %v7732_v4   ;;  %v7795_v17 = vld [vmem:[%s9378_s3 + $0x50] sm:$0xff] (!%p276_p2)  ;;  %v7803_v19 = vld [vmem:[%s9378_s3 + $0x68] sm:$0xff] (!%p276_p2)  ;;  %v7567_v20 = vld [vmem:[%s9379_s4 + $0x118] sm:$0xff] (!%p276_p2)  }
   0xc   : > { %6988 = vmatprep.subr.bf16.mxu0 (!%p276_p2), %v7563_v11  ;;  %6779 = vmatpush3.bf16.msra.mxu1 (!%p276_p2), %v7564_v12  ;;  %v7568_v18 = vld [vmem:[%s9379_s4 + $0x10] sm:$0xff] (!%p276_p2)   ;;  %v7813_v21 = vld [vmem:[%s9378_s3 + $0x60] sm:$0xff] (!%p276_p2)  ;;  %v7570_v22 = vld [vmem:[%s9379_s4 + $0x18] sm:$0xff] (!%p276_p2)  }
   0xd   : > { %6780 = vmatprep.subr.bf16.mxu1 %v7566_v14  ;;  %v7569_v23 = vld [vmem:[%s9379_s4 + $0x120] sm:$0xff]   ;;  %v7826_v24 = vld [vmem:[%s9378_s3 + $0x78] sm:$0xff]  ;;  %v7831_v25 = vld [vmem:[%s9378_s3 + $0x70] sm:$0xff]  ;;  %s9449_s28 = smov (!%p318_p3, %s6064_s28), 1 }
   0xe   : > { %6989 = vmatpush3.bf16.msra.mxu0 %v7563_v11  ;;  %v7572_v26 = vld [vmem:[%s9379_s4 + $0x20] sm:$0xff]   ;;  %v7571_v27 = vld [vmem:[%s9379_s4 + $0x128] sm:$0xff]   ;;  %v7573_v33 = vld [vmem:[%s9379_s4 + $0x130] sm:$0xff]   ;;  %s7550_s23 = smul.u32 144, %s9449_s28  ;;  %s325_s17 = scalar_lea.vmem %s9377_s2, %s9449_s28 }
   0xf   : > { %559 = vperm.xlu1 %7561, %v7739_v5   ;;  %554 = vperm.xlu0 %7560, %v7744_v6   ;;  %v7844_v28 = vld [vmem:[%s9378_s3 + $0x88] sm:$0xff]  ;;  %v7849_v29 = vld [vmem:[%s9378_s3 + $0x80] sm:$0xff]  ;;  %v7864_v37 = vld [vmem:[%s9378_s3 + $0x98] sm:$0xff]  ;;  %s333_s24 = scalar_lea.vmem %s9382_s7, %s9449_s28  ;;  %s336_s26 = scalar_lea.vmem %s9383_s8, %s9449_s28 }
  0x10   : > { %6990 = vmatprep.subr.bf16.mxu0 %v7565_v15  ;;  %6781 = vmatpush3.bf16.msra.mxu1 %v7566_v14  ;;  %v7574_v30 = vld [vmem:[%s9379_s4 + $0x28] sm:$0xff]   ;;  %v806_v34 = vld [vmem:[#allocation2] sm:$0xc0]  ;;  %v7869_v38 = vld [vmem:[%s9378_s3 + $0x90] sm:$0xff]  ;;  %s7992_s14 = scalar_lea.vmem %s9375_s0, %s7550_s23  ;;  %s9258_s21 = scalar_lea.vmem %s9381_s6, %s7550_s23 }
  0x11   : > { %6782 = vmatprep.subr.bf16.mxu1 %v7568_v18  ;;  %v843_v35 = vshrl.u32 %v806_v34, 16  ;;  %v846_v36 = vshll.u32 %v806_v34, 16  ;;  %v7576_v39 = vld [vmem:[%s9379_s4 + $0x30] sm:$0xff]   ;;  %v7575_v43 = vld [vmem:[%s9379_s4 + $0x138] sm:$0xff]   ;;  %v7884_v45 = vld [vmem:[%s9378_s3 + $0xa8] sm:$0xff] }
  0x12   : > { %6991 = vmatpush3.bf16.msra.mxu0 %v7565_v15  ;;  %v7889_v46 = vld [vmem:[%s9378_s3 + $0xa0] sm:$0xff]  ;;  %v7578_v47 = vld [vmem:[%s9379_s4 + $0x38] sm:$0xff]   ;;  %v7911_v51 = vld [vmem:[%s9378_s3 + $0xb0] sm:$0xff] }
  0x13   : > { %569 = vperm.xlu1 %7561, %v7751_v7   ;;  %564 = vperm.xlu0 %7560, %v7756_v8   ;;  %v845_v40 = vrot.slane %v843_v35, 6  ;;  %v848_v41 = vrot.slane %v846_v36, 7  ;;  %v7899_v49 = vld [vmem:[%s9379_s4 + $0x140] sm:$0xff]   ;;  %v7906_v50 = vld [vmem:[%s9378_s3 + $0xb8] sm:$0xff]  ;;  %v7921_v53 = vld [vmem:[%s9378_s3 + $0xc8] sm:$0xff] }
  0x14   : > { %6992 = vmatprep.subr.bf16.mxu0 %v7567_v20  ;;  %6783 = vmatpush3.bf16.msra.mxu1 %v7568_v18  ;;  %v7916_v52 = vld [vmem:[%s9379_s4 + $0x40] sm:$0xff]   ;;  %v7937_v55 = vld [vmem:[%s9378_s3 + $0xd8] sm:$0xff]  ;;  %v7942_v56 = vld [vmem:[%s9378_s3 + $0xd0] sm:$0xff] }
  0x15   : > { %6784 = vmatprep.subr.bf16.mxu1 %v7570_v22  ;;  %v849_v44 = vor.u32 %v848_v41, %v845_v40  ;;  %v7929_v54 = vld [vmem:[%s9378_s3 + $0xc0] sm:$0xff]  ;;  %v7953_v57 = vld [vmem:[%s9378_s3 + $0xe8] sm:$0xff]  ;;  %v7966_v59 = vld [vmem:[%s9378_s3 + $0xf8] sm:$0xff] }
  0x16   : > { %6993 = vmatpush3.bf16.msra.mxu0 %v7567_v20  ;;  %v7960_v58 = vld [vmem:[%s9378_s3 + $0xe0] sm:$0xff]  ;;  %v7971_v60 = vld [vmem:[%s9378_s3 + $0xf0] sm:$0xff]  ;;  %v7980_v61 = vld [vmem:[%s9378_s3 + $0x108] sm:$0xff] }
  0x17   : > { %579 = vperm.xlu1 %7561, %v7764_v10   ;;  %574 = vperm.xlu0 %7560, %v7777_v13   ;;  %v858_v48 = vsel %vm841_vm0, %v849_v44, %v7874_v42  ;;  %v7985_v62 = vld [vmem:[%s9378_s3 + $0x100] sm:$0xff]  ;;  %v6526_v2 = vld [vmem:[%s7992_s14 + $0x88] sm:$0xff]   ;;  %v8007_v9 = vld [vmem:[%s9378_s3 + $0x118] sm:$0xff] }
  0x18   : > { %6994 = vmatprep.subr.bf16.mxu0 %v7569_v23  ;;  %6785 = vmatpush3.bf16.msra.mxu1 %v7570_v22  ;;  %v8001_v63 = vld [vmem:[%s9376_s1] ss:$0 sm:$0xff]  ;;  %v8012_v11 = vld [vmem:[%s9378_s3 + $0x110] sm:$0xff]  ;;  %v6419_v12 = vunpack.c.h.bf16 %v6526_v2  ;;  %v6418_v14 = vunpack.c.l.bf16 %v6526_v2 }
  0x19   : > { %6786 = vmatprep.subr.bf16.mxu1 %v7572_v26  ;;  %6794 = vmatprep.mubr.bf16.mxu1 %v858_v48  ;;  %v8016_v15 = vld [vmem:[%s325_s17] ss:$0 sm:$0xff] }
  0x1a   : > { %6995 = vmatpush3.bf16.msra.mxu0 %v7569_v23  ;;  %v452_v18 = vmul.f32 %v6419_v12, %v8001_v63  ;;  %v451_v20 = vmul.f32 %v6418_v14, %v8001_v63 }
  0x1b   : > { %589 = vperm.xlu1 %7561, %v7790_v16   ;;  %584 = vperm.xlu0 %7560, %v7795_v17  }
  0x1c   : > { %6996 = vmatprep.subr.bf16.mxu0 %v7571_v27  ;;  %6787 = vmatpush3.bf16.msra.mxu1 %v7572_v26  ;;  %v8021_v22 = vadd.f32 %v8016_v15, %v452_v18  ;;  %v8024_v23 = vadd.f32 %v8016_v15, %v451_v20 }
  0x1d   : > { %6788 = vmatprep.subr.bf16.mxu1 %v7574_v30 }
  0x1e   : > { %6997 = vmatpush3.bf16.msra.mxu0 %v7571_v27 }
  0x1f   : > { %599 = vperm.xlu1 %7561, %v7803_v19   ;;  %594 = vperm.xlu0 %7560, %v7813_v21  }
  0x20   : > { %6998 = vmatprep.subr.bf16.mxu0 %v7573_v33  ;;  %6789 = vmatpush3.bf16.msra.mxu1 %v7574_v30 }
  0x21   : > { %6790 = vmatprep.subr.bf16.mxu1 %v7576_v39 }
  0x22   : > { %6999 = vmatpush3.bf16.msra.mxu0 %v7573_v33 }
  0x23   : > { %609 = vperm.xlu1 %7561, %v7826_v24   ;;  %604 = vperm.xlu0 %7560, %v7831_v25  }
  0x24   : > { %7000 = vmatprep.subr.bf16.mxu0 %v7575_v43  ;;  %6791 = vmatpush3.bf16.msra.mxu1 %v7576_v39 }
  0x25   : > { %6792 = vmatprep.subr.bf16.mxu1 %v7578_v47 }
  0x26   : > { %7001 = vmatpush3.bf16.msra.mxu0 %v7575_v43 }
  0x27   : > { %619 = vperm.xlu1 %7561, %v7844_v28   ;;  %614 = vperm.xlu0 %7560, %v7849_v29  }
  0x28   : > { %7038 = vmatprep.subr.bf16.mxu0 %v7899_v49  ;;  %6793 = vmatpush3.bf16.msra.mxu1 %v7578_v47 }
  0x29   : > { %6830 = vmatprep.subr.bf16.mxu1 %v7916_v52 }
  0x2b   : > { %629 = vperm.xlu1 %7561, %v7864_v37   ;;  %624 = vperm.xlu0 %7560, %v7869_v38  }
  0x2f   : > { %639 = vperm.xlu1 %7561, %v7884_v45   ;;  %634 = vperm.xlu0 %7560, %v7889_v46  }
  0x33   : > { %649 = vperm.xlu1 %7561, %v7906_v50   ;;  %644 = vperm.xlu0 %7560, %v7911_v51  }
  0x37   : > { %659 = vperm.xlu1 %7561, %v7921_v53   ;;  %654 = vperm.xlu0 %7560, %v7929_v54  }
  0x3b   : > { %669 = vperm.xlu1 %7561, %v7937_v55   ;;  %664 = vperm.xlu0 %7560, %v7942_v56  }
  0x3f   : > { %679 = vperm.xlu1 %7561, %v7953_v57   ;;  %674 = vperm.xlu0 %7560, %v7960_v58  }
  0x43   : > { %689 = vperm.xlu1 %7561, %v7966_v59   ;;  %684 = vperm.xlu0 %7560, %v7971_v60  }
  0x47   : > { %699 = vperm.xlu1 %7561, %v7980_v61   ;;  %694 = vperm.xlu0 %7560, %v7985_v62  }
  0x4b   : > { %709 = vperm.xlu1 %7561, %v8007_v9   ;;  %704 = vperm.xlu0 %7560, %v8012_v11  }
  0x4f   : > { %5621 = vperm.xlu1 %7561, %v7732_v4   ;;  %5616 = vperm.xlu0 %7560, %v7714_v1   ;;  %v6349_v1 = vld [vmem:[%s7992_s14] sm:$0xff]   ;;  %v6511_v4 = vld [vmem:[%s7992_s14 + $0x10] sm:$0xff]  }
  0x53   : > { %5631 = vperm.xlu1 %7561, %v7727_v3   ;;  %5626 = vperm.xlu0 %7560, %v7709_v0   ;;  %v6510_v0 = vld [vmem:[%s7992_s14 + $0x8] sm:$0xff]  }
  0x54   : > { %v6354_v3 = vunpack.c.l.bf16 %v6510_v0 }
  0x57   : > { %5641 = vperm.xlu1 %7561, %v7739_v5   ;;  %5636 = vperm.xlu0 %7560, %v7744_v6   ;;  %v6350_v5 = vunpack.c.l.bf16 %v6349_v1  ;;  %v6355_v6 = vunpack.c.h.bf16 %v6510_v0 }
  0x5b   : > { %5651 = vperm.xlu1 %7561, %v7751_v7   ;;  %5646 = vperm.xlu0 %7560, %v7756_v8   ;;  %v6351_v7 = vunpack.c.h.bf16 %v6349_v1  ;;  %v6359_v8 = vunpack.c.h.bf16 %v6511_v4 }
  0x5f   : > { %5661 = vperm.xlu1 %7561, %v7764_v10   ;;  %5656 = vperm.xlu0 %7560, %v7777_v13   ;;  %v6358_v10 = vunpack.c.l.bf16 %v6511_v4  ;;  %v6512_v13 = vld [vmem:[%s7992_s14 + $0x18] sm:$0xff]  }
  0x60   : > { %v6363_v26 = vunpack.c.h.bf16 %v6512_v13  ;;  %v6362_v27 = vunpack.c.l.bf16 %v6512_v13 }
  0x62   : > { %v424_v40 = vmul.f32 %v6363_v26, %v8001_v63  ;;  %v423_v41 = vmul.f32 %v6362_v27, %v8001_v63 }
  0x63   : > { %5671 = vperm.xlu1 %7561, %v7790_v16   ;;  %5666 = vperm.xlu0 %7560, %v7795_v17   ;;  %v419_v16 = vmul.f32 %v6354_v3, %v8001_v63  ;;  %v6513_v17 = vld [vmem:[%s7992_s14 + $0x20] sm:$0xff]  }
  0x64   : > { %v6367_v30 = vunpack.c.h.bf16 %v6513_v17  ;;  %v6366_v34 = vunpack.c.l.bf16 %v6513_v17  ;;  %v467_v2 = vadd.f32 %v8016_v15, %v424_v40  ;;  %v466_v12 = vadd.f32 %v8016_v15, %v423_v41  ;;  %v6517_v17 = vld [vmem:[%s7992_s14 + $0x40] sm:$0xff]   ;;  %v7581_v41 = vld [vmem:[%s9379_s4 + $0x150] sm:$0xff]  }
  0x65   : > { %v462_v32 = vadd.f32 %v8016_v15, %v419_v16 }
  0x67   : > { %5681 = vperm.xlu1 %7561, %v7803_v19   ;;  %5676 = vperm.xlu0 %7560, %v7813_v21   ;;  %v417_v19 = vmul.f32 %v6350_v5, %v8001_v63  ;;  %v420_v21 = vmul.f32 %v6355_v6, %v8001_v63 }
  0x6b   : > { %5691 = vperm.xlu1 %7561, %v7826_v24   ;;  %5686 = vperm.xlu0 %7560, %v7831_v25   ;;  %v418_v24 = vmul.f32 %v6351_v7, %v8001_v63  ;;  %v6514_v25 = vld [vmem:[%s7992_s14 + $0x28] sm:$0xff]  }
  0x6c   : > { %v6371_v35 = vunpack.c.h.bf16 %v6514_v25  ;;  %v6370_v36 = vunpack.c.l.bf16 %v6514_v25 }
  0x6d   : > { %v461_v39 = vadd.f32 %v8016_v15, %v418_v24 }
  0x6f   : > { %5701 = vperm.xlu1 %7561, %v7844_v28   ;;  %5696 = vperm.xlu0 %7560, %v7849_v29   ;;  %v422_v28 = vmul.f32 %v6359_v8, %v8001_v63  ;;  %v421_v29 = vmul.f32 %v6358_v10, %v8001_v63 }
  0x71   : > { %v465_v43 = vadd.f32 %v8016_v15, %v422_v28  ;;  %v464_v44 = vadd.f32 %v8016_v15, %v421_v29 }
  0x73   : > { %5711 = vperm.xlu1 %7561, %v7864_v37   ;;  %5706 = vperm.xlu0 %7560, %v7869_v38   ;;  %v460_v37 = vadd.f32 %v8016_v15, %v417_v19  ;;  %v463_v38 = vadd.f32 %v8016_v15, %v420_v21  ;;  %v7579_v19 = vld [vmem:[%s9379_s4 + $0x148] sm:$0xff]  }
  0x77   : > { %5721 = vperm.xlu1 %7561, %v7884_v45   ;;  %5716 = vperm.xlu0 %7560, %v7889_v46   ;;  %v426_v45 = vmul.f32 %v6367_v30, %v8001_v63  ;;  %v6515_v46 = vld [vmem:[%s7992_s14 + $0x30] sm:$0xff]  }
  0x78   : > { %v6375_v14 = vunpack.c.h.bf16 %v6515_v46  ;;  %v6374_v18 = vunpack.c.l.bf16 %v6515_v46 }
  0x79   : > { %v8093_v1 = vadd.f32 %v8016_v15, %v426_v45 }
  0x7a   : > { %v430_v21 = vmul.f32 %v6375_v14, %v8001_v63  ;;  %v429_v24 = vmul.f32 %v6374_v18, %v8001_v63 }
  0x7b   : > { %5731 = vperm.xlu1 %7561, %v7906_v50   ;;  %5726 = vperm.xlu0 %7560, %v7911_v51   ;;  %v425_v51 = vmul.f32 %v6366_v34, %v8001_v63  ;;  %v6383_v34 = vunpack.c.h.bf16 %v6517_v17 }
  0x7c   : > { %v8150_v45 = vadd.f32 %v8016_v15, %v429_v24 }
  0x7f   : > { %5741 = vperm.xlu1 %7561, %v7921_v53   ;;  %5736 = vperm.xlu0 %7560, %v7929_v54   ;;  %v428_v53 = vmul.f32 %v6371_v35, %v8001_v63  ;;  %v427_v54 = vmul.f32 %v6370_v36, %v8001_v63 }
  0x81   : > { %v8100_v6 = vadd.f32 %v8016_v15, %v427_v54  ;;  %v434_v54 = vmul.f32 %v6383_v34, %v8001_v63 }
  0x83   : > { %5751 = vperm.xlu1 %7561, %v7937_v55   ;;  %5746 = vperm.xlu0 %7560, %v7942_v56   ;;  %v6516_v55 = vld [vmem:[%s7992_s14 + $0x38] sm:$0xff]  }
  0x84   : > { %v6379_v3 = vunpack.c.h.bf16 %v6516_v55  ;;  %v6378_v7 = vunpack.c.l.bf16 %v6516_v55 }
  0x86   : > { %v545_v31 = vpop.permute.xlu1 %544  ;;  %v535_v33 = vpop.permute.xlu0 %534  ;;  %v432_v28 = vmul.f32 %v6379_v3, %v8001_v63 }
  0x87   : > { %5761 = vperm.xlu1 %7561, %v7953_v57   ;;  %5756 = vperm.xlu0 %7560, %v7960_v58   ;;  %v714_v47 = vmul.f32 %v545_v31, %v462_v32  ;;  %v712_v56 = vmul.f32 %v535_v33, %v460_v37  ;;  %v431_v33 = vmul.f32 %v6378_v7, %v8001_v63  ;;  %v7586_v7 = vld [vmem:[%s9379_s4 + $0x50] sm:$0xff]  }
  0x88   : > { %v8172_v14 = vadd.f32 %v8016_v15, %v432_v28 }
  0x8a   : > { %v550_v48 = vpop.permute.xlu1 %549  ;;  %v540_v50 = vpop.permute.xlu0 %539 }
  0x8b   : > { %v715_v57 = vmul.f32 %v550_v48, %v463_v38  ;;  %v713_v58 = vmul.f32 %v540_v50, %v461_v39  ;;  %5771 = vperm.xlu1 %7561, %v7966_v59   ;;  %5766 = vperm.xlu0 %7560, %v7971_v60   ;;  %v468_v59 = vadd.f32 %v8016_v15, %v425_v51  ;;  %v6518_v38 = vld [vmem:[%s7992_s14 + $0x48] sm:$0xff]   ;;  %v8157_v48 = vld [vmem:[%s7992_s14 + $0x50] sm:$0xff]  }
  0x8c   : > { %v8097_v60 = vadd.f32 %v8016_v15, %v428_v53  ;;  %v8138_v39 = vadd.f32 %v8016_v15, %v430_v21  ;;  %v6391_v3 = vunpack.c.h.bf16 %v8157_v48  ;;  %v6390_v24 = vunpack.c.l.bf16 %v8157_v48 }
  0x8d   : > { %v8088_v20 = vpack.c.bf16 %v715_v57, %v714_v47  ;;  %v8090_v0 = vpack.c.bf16 %v713_v58, %v712_v56  ;;  %v6387_v56 = vunpack.c.h.bf16 %v6518_v38  ;;  %v7582_v58 = vld [vmem:[%s9379_s4 + $0x158] sm:$0xff]  }
  0x8e   : > { %v560_v4 = vpop.permute.xlu1 %559  ;;  %v555_v5 = vpop.permute.xlu0 %554 }
  0x8f   : > { %789 = vst [vmem:[#allocation2 + $0x18] sm:$0xff] %v8088_v20  ;;  %788 = vst [vmem:[#allocation2 + $0x10] sm:$0xff] %v8090_v0  ;;  %v717_v8 = vmul.f32 %v560_v4, %v465_v43  ;;  %v716_v10 = vmul.f32 %v555_v5, %v464_v44  ;;  %5781 = vperm.xlu1 %7561, %v7980_v61   ;;  %5776 = vperm.xlu0 %7560, %v7985_v62   ;;  %v860_v13 = vshrl.u32 %v8090_v0, 16 }
  0x90   : > { %v863_v16 = vshll.u32 %v8090_v0, 16  ;;  %7002 = vmatprep.mubr.bf16.mxu0 %v8090_v0  ;;  %v869_v25 = vshrl.u32 %v8088_v20, 16  ;;  %v872_v61 = vshll.u32 %v8088_v20, 16  ;;  %v6382_v43 = vunpack.c.l.bf16 %v6517_v17  ;;  %v7592_v0 = vld [vmem:[%s9379_s4 + $0x68] sm:$0xff]  }
  0x91   : > { %v8117_v62 = vpack.c.bf16 %v717_v8, %v716_v10  ;;  %7003 = vmatmul.mubr.bf16.vlgmr.msra.gmra.mrb[0].mxu0 %v8088_v20  ;;  %v862_v26 = vrot.slane %v860_v13, 6  ;;  %v8187_v17 = vadd.f32 %v8016_v15, %v431_v33  ;;  %v436_v21 = vmul.f32 %v6387_v56, %v8001_v63 }
  0x92   : > { %v865_v27 = vrot.slane %v863_v16, 7  ;;  %v570_v29 = vpop.permute.xlu1 %569  ;;  %v565_v30 = vpop.permute.xlu0 %564  ;;  %7039 = vmatpush3.bf16.msra.mxu0 %v7899_v49  ;;  %v871_v31 = vrot.slane %v869_v25, 6  ;;  %v874_v32 = vrot.slane %v872_v61, 7  ;;  %v433_v18 = vmul.f32 %v6382_v43, %v8001_v63 }
  0x93   : > { %790 = vst [vmem:[#allocation2 + $0x20] sm:$0xff] %v8117_v62  ;;  %v719_v35 = vmul.f32 %v570_v29, %v467_v2  ;;  %v718_v36 = vmul.f32 %v565_v30, %v466_v12  ;;  %5791 = vperm.xlu1 %7561, %v8007_v9   ;;  %5786 = vperm.xlu0 %7560, %v8012_v11   ;;  %v878_v49 = vshrl.u32 %v8117_v62, 16  ;;  %v881_v9 = vshll.u32 %v8117_v62, 16  ;;  %v7583_v11 = vld [vmem:[%s9379_s4 + $0x48] sm:$0xff]   ;;  %v7584_v29 = vld [vmem:[%s9379_s4 + $0x160] sm:$0xff]  }
  0x94   : > { %v866_v37 = vor.u32 %v865_v27, %v862_v26  ;;  %7006 = vmatprep.mubr.bf16.mxu0 %v8117_v62  ;;  %7040 = vmatprep.subr.bf16.mxu0 %v7579_v19  ;;  %v875_v40 = vor.u32 %v874_v32, %v871_v31  ;;  %v6520_v31 = vld [vmem:[%s7992_s14 + $0x58] sm:$0xff]   ;;  %v8206_v32 = vadd.f32 %v8016_v15, %v433_v18  ;;  %v7593_v62 = vld [vmem:[%s9379_s4 + $0x188] sm:$0xff]  }
  0x95   : > { %v8147_v44 = vpack.c.bf16 %v719_v35, %v718_v36  ;;  %v880_v47 = vrot.slane %v878_v49, 6  ;;  %v883_v55 = vrot.slane %v881_v9, 7  ;;  %v6395_v48 = vunpack.c.h.bf16 %v6520_v31 }
  0x96   : > { %v867_v46 = vsel %vm841_vm0, %v7874_v42, %v866_v37  ;;  %v580_v50 = vpop.permute.xlu1 %579  ;;  %v575_v51 = vpop.permute.xlu0 %574  ;;  %7041 = vmatpush3.bf16.msra.mxu0 %v7579_v19  ;;  %v876_v53 = vsel %vm841_vm0, %v866_v37, %v875_v40  ;;  %v8190_v19 = vadd.f32 %v8016_v15, %v434_v54 }
  0x97   : > { %6795 = vmatmul.mubr.bf16.vlgmr.msra.gmra.mrb[0].mxu1 %v867_v46  ;;  %791 = vst [vmem:[#allocation2 + $0x28] sm:$0xff] %v8147_v44  ;;  %v721_v42 = vmul.f32 %v580_v50, %v8093_v1  ;;  %v720_v57 = vmul.f32 %v575_v51, %v468_v59  ;;  %v887_v2 = vshrl.u32 %v8147_v44, 16  ;;  %v890_v12 = vshll.u32 %v8147_v44, 16  ;;  %7042 = vmatprep.subr.bf16.mxu0 %v7581_v41 }
  0x98   : > { %6831 = vmatpush3.bf16.msra.mxu1 %v7916_v52  ;;  %6798 = vmatprep.mubr.bf16.mxu1 %v876_v53  ;;  %v6386_v1 = vunpack.c.l.bf16 %v6518_v38  ;;  %v884_v4 = vor.u32 %v883_v55, %v880_v47  ;;  %v8219_v38 = vld [vmem:[%s7992_s14 + $0x60] sm:$0xff]   ;;  %v437_v46 = vmul.f32 %v6390_v24, %v8001_v63  ;;  %v7585_v53 = vld [vmem:[%s9379_s4 + $0x168] sm:$0xff]  }
  0x99   : > { %6832 = vmatprep.subr.bf16.mxu1 %v7583_v11  ;;  %v8176_v52 = vpack.c.bf16 %v721_v42, %v720_v57  ;;  %7007 = vmatmul.mubr.bf16.gmra.mrb[4].mxu0 %v8147_v44  ;;  %v889_v5 = vrot.slane %v887_v2, 6  ;;  %v892_v59 = vrot.slane %v890_v12, 7  ;;  %v3252_v42 = vrot.slane %v863_v16, 1 }
  0x9a   : > { %v590_v8 = vpop.permute.xlu1 %589  ;;  %v585_v10 = vpop.permute.xlu0 %584  ;;  %7043 = vmatpush3.bf16.msra.mxu0 %v7581_v41  ;;  %v885_v35 = vsel %vm841_vm0, %v875_v40, %v884_v4  ;;  %v7589_v41 = vld [vmem:[%s9379_s4 + $0x58] sm:$0xff]   ;;  %v8225_v40 = vadd.f32 %v8016_v15, %v436_v21 }
  0x9b   : > { %792 = vst [vmem:[#allocation2 + $0x30] sm:$0xff] %v8176_v52  ;;  %v723_v26 = vmul.f32 %v590_v8, %v8097_v60  ;;  %v722_v27 = vmul.f32 %v585_v10, %v8100_v6  ;;  %7010 = vmatprep.mubr.bf16.mxu0 %v8176_v52  ;;  %7044 = vmatprep.subr.bf16.mxu0 %v7582_v58  ;;  %v896_v30 = vshrl.u32 %v8176_v52, 16  ;;  %v899_v33 = vshll.u32 %v8176_v52, 16  ;;  %v7597_v52 = vld [vmem:[%s9379_s4 + $0x198] sm:$0xff]  }
  0x9c   : > { %v8198_v28 = vor.u32 %v892_v59, %v889_v5  ;;  %6833 = vmatpush3.bf16.msra.mxu1 %v7583_v11  ;;  %v435_v60 = vmul.f32 %v6386_v1, %v8001_v63  ;;  %v438_v6 = vmul.f32 %v6391_v3, %v8001_v63  ;;  %v7590_v3 = vld [vmem:[%s9379_s4 + $0x60] sm:$0xff]   ;;  %v8258_v59 = vadd.f32 %v8016_v15, %v437_v46 }
  0x9d   : > { %v8211_v34 = vpack.c.bf16 %v723_v26, %v722_v27  ;;  %v898_v37 = vrot.slane %v896_v30, 6  ;;  %6834 = vmatprep.subr.bf16.mxu1 %v7586_v7  ;;  %v901_v47 = vrot.slane %v899_v33, 7  ;;  %v6398_v8 = vunpack.c.l.bf16 %v8219_v38  ;;  %v7587_v26 = vld [vmem:[%s9379_s4 + $0x170] sm:$0xff]  }
  0x9e   : > { %v894_v36 = vsel %vm841_vm0, %v884_v4, %v8198_v28  ;;  %v600_v43 = vpop.permute.xlu1 %599  ;;  %v595_v11 = vpop.permute.xlu0 %594  ;;  %7045 = vmatpush3.bf16.msra.mxu0 %v7582_v58  ;;  %v8239_v56 = vadd.f32 %v8016_v15, %v435_v60  ;;  %v8255_v5 = vadd.f32 %v8016_v15, %v438_v6 }
  0x9f   : > { %6799 = vmatmul.mubr.bf16.gmra.mrb[4].mxu1 %v885_v35  ;;  %793 = vst [vmem:[#allocation2 + $0x38] sm:$0xff] %v8211_v34  ;;  %v725_v50 = vmul.f32 %v600_v43, %v8138_v39  ;;  %v724_v51 = vmul.f32 %v595_v11, %v8150_v45  ;;  %7046 = vmatprep.subr.bf16.mxu0 %v7584_v29  ;;  %v905_v54 = vshrl.u32 %v8211_v34, 16  ;;  %v908_v55 = vshll.u32 %v8211_v34, 16 }
  0xa0   : > { %6802 = vmatprep.mubr.bf16.mxu1 %v894_v36  ;;  %6835 = vmatpush3.bf16.msra.mxu1 %v7586_v7  ;;  %v6394_v39 = vunpack.c.l.bf16 %v6520_v31  ;;  %v6399_v45 = vunpack.c.h.bf16 %v8219_v38  ;;  %v902_v58 = vor.u32 %v901_v47, %v898_v37  ;;  %v440_v7 = vmul.f32 %v6395_v48, %v8001_v63  ;;  %v7588_v48 = vld [vmem:[%s9379_s4 + $0x178] sm:$0xff]  }
  0xa1   : > { %v8244_v57 = vpack.c.bf16 %v725_v50, %v724_v51  ;;  %7011 = vmatmul.mubr.bf16.gmra.mrb[8].mxu0 %v8211_v34  ;;  %v907_v18 = vrot.slane %v905_v54, 6  ;;  %v910_v1 = vrot.slane %v908_v55, 7  ;;  %6836 = vmatprep.subr.bf16.mxu1 %v7589_v41  ;;  %v3253_v31 = vor.u32 %v3252_v42, %v860_v13  ;;  %v7601_v34 = vld [vmem:[%s9379_s4 + $0x1a8] sm:$0xff]  }
  0xa2   : > { %v610_v16 = vpop.permute.xlu1 %609  ;;  %v605_v4 = vpop.permute.xlu0 %604  ;;  %7047 = vmatpush3.bf16.msra.mxu0 %v7584_v29  ;;  %v6522_v29 = vld [vmem:[%s7992_s14 + $0x68] sm:$0xff]   ;;  %v439_v60 = vmul.f32 %v6394_v39, %v8001_v63  ;;  %v903_v35 = vsel %vm841_vm0, %v8198_v28, %v902_v58  ;;  %v441_v28 = vmul.f32 %v6398_v8, %v8001_v63  ;;  %v3265_v8 = vrot.slane %v881_v9, 1 }
  0xa3   : > { %794 = vst [vmem:[#allocation2 + $0x40] sm:$0xff] %v8244_v57  ;;  %v727_v10 = vmul.f32 %v610_v16, %v8172_v14  ;;  %v726_v21 = vmul.f32 %v605_v4, %v8187_v17  ;;  %7014 = vmatprep.mubr.bf16.mxu0 %v8244_v57  ;;  %7048 = vmatprep.subr.bf16.mxu0 %v7585_v53  ;;  %v914_v27 = vshrl.u32 %v8244_v57, 16  ;;  %v917_v17 = vshll.u32 %v8244_v57, 16 }
  0xa4   : > { %v8266_v24 = vor.u32 %v910_v1, %v907_v18  ;;  %v442_v14 = vmul.f32 %v6399_v45, %v8001_v63  ;;  %6837 = vmatpush3.bf16.msra.mxu1 %v7589_v41  ;;  %v3257_v41 = vrot.slane %v872_v61, 1  ;;  %v6403_v11 = vunpack.c.h.bf16 %v6522_v29  ;;  %v8317_v18 = vld [vmem:[%s7992_s14 + $0x70] sm:$0xff]  }
  0xa5   : > { %v8278_v6 = vpack.c.bf16 %v727_v10, %v726_v21  ;;  %v916_v37 = vrot.slane %v914_v27, 6  ;;  %6838 = vmatprep.subr.bf16.mxu1 %v7590_v3  ;;  %v919_v43 = vrot.slane %v917_v17, 7  ;;  %v7594_v1 = vld [vmem:[%s9379_s4 + $0x70] sm:$0xff]   ;;  %v8342_v9 = vrot.slane %v890_v12, 1  ;;  %v7596_v12 = vld [vmem:[%s9379_s4 + $0x78] sm:$0xff]  }
  0xa6   : > { %v912_v36 = vsel %vm841_vm0, %v902_v58, %v8266_v24  ;;  %v620_v13 = vpop.permute.xlu1 %619  ;;  %v615_v38 = vpop.permute.xlu0 %614  ;;  %7049 = vmatpush3.bf16.msra.mxu0 %v7585_v53  ;;  %v3258_v51 = vsel %vm3246_vm1, %v3253_v31, %v3257_v41  ;;  %v8304_v53 = vadd.f32 %v8016_v15, %v440_v7  ;;  %v8323_v4 = vadd.f32 %v8016_v15, %v442_v14 }
  0xa7   : > { %6803 = vmatmul.mubr.bf16.gmra.mrb[8].mxu1 %v903_v35  ;;  %795 = vst [vmem:[#allocation2 + $0x48] sm:$0xff] %v8278_v6  ;;  %v729_v46 = vmul.f32 %v620_v13, %v8190_v19  ;;  %v728_v47 = vmul.f32 %v615_v38, %v8206_v32  ;;  %7050 = vmatprep.subr.bf16.mxu0 %v7587_v26  ;;  %v923_v61 = vshrl.u32 %v8278_v6, 16  ;;  %v926_v50 = vshll.u32 %v8278_v6, 16 }
  0xa8   : > { %6806 = vmatprep.mubr.bf16.mxu1 %v912_v36  ;;  %v8307_v19 = vadd.f32 %v8016_v15, %v439_v60  ;;  %v6402_v32 = vunpack.c.l.bf16 %v6522_v29  ;;  %6839 = vmatpush3.bf16.msra.mxu1 %v7590_v3  ;;  %v920_v39 = vor.u32 %v919_v43, %v916_v37  ;;  %v8326_v7 = vadd.f32 %v8016_v15, %v441_v28  ;;  %v7591_v60 = vld [vmem:[%s9379_s4 + $0x180] sm:$0xff]  }
  0xa9   : > { %v8309_v42 = vpack.c.bf16 %v729_v46, %v728_v47  ;;  %7015 = vmatmul.mubr.bf16.gmra.mrb[12].mxu0 %v8278_v6  ;;  %v925_v45 = vrot.slane %v923_v61, 6  ;;  %v928_v58 = vrot.slane %v926_v50, 7  ;;  %6840 = vmatprep.subr.bf16.mxu1 %v7592_v0  ;;  %v444_v10 = vmul.f32 %v6403_v11, %v8001_v63  ;;  %v7604_v6 = vld [vmem:[%s9379_s4 + $0x1b8] sm:$0xff]  }
  0xaa   : > { %v630_v16 = vpop.permute.xlu1 %629  ;;  %v625_v3 = vpop.permute.xlu0 %624  ;;  %7051 = vmatpush3.bf16.msra.mxu0 %v7587_v26  ;;  %7054 = vmatprep.mubr.bf16.mxu0 %v3258_v51  ;;  %v443_v14 = vmul.f32 %v6402_v32, %v8001_v63  ;;  %v6407_v35 = vunpack.c.h.bf16 %v8317_v18  ;;  %v921_v36 = vsel %vm841_vm0, %v8266_v24, %v920_v39  ;;  %v3269_v24 = vor.u32 %v3265_v8, %v878_v49 }
  0xab   : > { %796 = vst [vmem:[#allocation2 + $0x50] sm:$0xff] %v8309_v42  ;;  %v731_v21 = vmul.f32 %v630_v16, %v8225_v40  ;;  %v730_v29 = vmul.f32 %v625_v3, %v8239_v56  ;;  %7052 = vmatprep.subr.bf16.mxu0 %v7588_v48  ;;  %v8334_v26 = vor.u32 %v928_v58, %v925_v45  ;;  %v932_v31 = vshrl.u32 %v8309_v42, 16  ;;  %v8390_v58 = vld [vmem:[%s9379_s4 + $0x80] sm:$0xff]  }
  0xac   : > { %v935_v40 = vshll.u32 %v8309_v42, 16  ;;  %6841 = vmatpush3.bf16.msra.mxu1 %v7592_v0  ;;  %v3261_v0 = vor.u32 %v3257_v41, %v869_v25  ;;  %v6406_v43 = vunpack.c.l.bf16 %v8317_v18  ;;  %v6524_v41 = vld [vmem:[%s7992_s14 + $0x78] sm:$0xff]  }
  0xad   : > { %v8347_v56 = vpack.c.bf16 %v731_v21, %v730_v29  ;;  %v930_v37 = vsel %vm841_vm0, %v920_v39, %v8334_v26  ;;  %v934_v13 = vrot.slane %v932_v31, 6  ;;  %6842 = vmatprep.subr.bf16.mxu1 %v7594_v1 }
  0xae   : > { %v640_v38 = vpop.permute.xlu1 %639  ;;  %v635_v28 = vpop.permute.xlu0 %634  ;;  %7053 = vmatpush3.bf16.msra.mxu0 %v7588_v48  ;;  %v937_v11 = vrot.slane %v935_v40, 7  ;;  %v3266_v49 = vsel %vm3246_vm1, %v3261_v0, %v3265_v8  ;;  %v3274_v48 = vsel %vm3246_vm1, %v3269_v24, %v8342_v9  ;;  %v445_v3 = vmul.f32 %v6406_v43, %v8001_v63 }
  0xaf   : > { %6807 = vmatmul.mubr.bf16.gmra.mrb[12].mxu1 %v921_v36  ;;  %797 = vst [vmem:[#allocation2 + $0x58] sm:$0xff] %v8347_v56  ;;  %v733_v46 = vmul.f32 %v640_v38, %v8255_v5  ;;  %v732_v47 = vmul.f32 %v635_v28, %v8258_v59  ;;  %v941_v20 = vshrl.u32 %v8347_v56, 16  ;;  %v944_v25 = vshll.u32 %v8347_v56, 16  ;;  %7090 = vmatprep.subr.bf16.mxu0 %v7591_v60  ;;  %v6525_v28 = vld [vmem:[%s7992_s14 + $0x80] sm:$0xff]  }
  0xb0   : > { %6810 = vmatprep.mubr.bf16.mxu1 %v930_v37  ;;  %v8378_v5 = vadd.f32 %v8016_v15, %v444_v10  ;;  %v446_v59 = vmul.f32 %v6407_v35, %v8001_v63  ;;  %6843 = vmatpush3.bf16.msra.mxu1 %v7594_v1  ;;  %v938_v32 = vor.u32 %v937_v11, %v934_v13  ;;  %v3281_v8 = vrot.slane %v899_v33, 1 }
  0xb1   : > { %v8381_v51 = vpack.c.bf16 %v733_v46, %v732_v47  ;;  %7055 = vmatmul.mubr.bf16.vlgmr.msra.gmra.mrb[0].mxu0 %v3266_v49  ;;  %v943_v39 = vrot.slane %v941_v20, 6  ;;  %v946_v45 = vrot.slane %v944_v25, 7  ;;  %6844 = vmatprep.subr.bf16.mxu1 %v7596_v12  ;;  %v486_v1 = vadd.f32 %v8016_v15, %v443_v14  ;;  %v7595_v14 = vld [vmem:[%s9379_s4 + $0x190] sm:$0xff]  }
  0xb2   : > { %v650_v18 = vpop.permute.xlu1 %649  ;;  %v645_v16 = vpop.permute.xlu0 %644  ;;  %7058 = vmatprep.mubr.bf16.mxu0 %v3274_v48  ;;  %v6411_v10 = vunpack.c.h.bf16 %v6524_v41  ;;  %7091 = vmatpush3.bf16.msra.mxu0 %v7591_v60  ;;  %v8404_v37 = vadd.f32 %v8016_v15, %v446_v59  ;;  %v3289_v33 = vrot.slane %v908_v55, 1  ;;  %v6410_v60 = vunpack.c.l.bf16 %v6524_v41 }
  0xb3   : > { %798 = vst [vmem:[#allocation2 + $0x60] sm:$0xff] %v8381_v51  ;;  %v735_v21 = vmul.f32 %v650_v18, %v8304_v53  ;;  %v734_v29 = vmul.f32 %v645_v16, %v8307_v19  ;;  %v947_v35 = vor.u32 %v946_v45, %v943_v39  ;;  %v950_v36 = vshrl.u32 %v8381_v51, 16  ;;  %7092 = vmatprep.subr.bf16.mxu0 %v7593_v62 }
  0xb4   : > { %v953_v13 = vshll.u32 %v8381_v51, 16  ;;  %6845 = vmatpush3.bf16.msra.mxu1 %v7596_v12  ;;  %v939_v19 = vsel %vm841_vm0, %v8334_v26, %v938_v32  ;;  %v3277_v55 = vor.u32 %v8342_v9, %v887_v2  ;;  %v3285_v12 = vor.u32 %v3281_v8, %v896_v30 }
  0xb5   : > { %v8409_v53 = vpack.c.bf16 %v735_v21, %v734_v29  ;;  %v948_v38 = vsel %vm841_vm0, %v938_v32, %v947_v35  ;;  %v952_v0 = vrot.slane %v950_v36, 6  ;;  %6882 = vmatprep.subr.bf16.mxu1 %v8390_v58  ;;  %v448_v26 = vmul.f32 %v6411_v10, %v8001_v63 }
  0xb6   : > { %v660_v24 = vpop.permute.xlu1 %659  ;;  %v655_v43 = vpop.permute.xlu0 %654  ;;  %v955_v11 = vrot.slane %v953_v13, 7  ;;  %7093 = vmatpush3.bf16.msra.mxu0 %v7593_v62  ;;  %v3282_v30 = vsel %vm3246_vm1, %v3277_v55, %v3281_v8  ;;  %v3290_v9 = vsel %vm3246_vm1, %v3285_v12, %v3289_v33  ;;  %v447_v41 = vmul.f32 %v6410_v60, %v8001_v63 }
  0xb7   : > { %6811 = vmatmul.mubr.bf16.gmra.mrb[16].mxu1 %v939_v19  ;;  %799 = vst [vmem:[#allocation2 + $0x68] sm:$0xff] %v8409_v53  ;;  %v737_v46 = vmul.f32 %v660_v24, %v8323_v4  ;;  %v736_v47 = vmul.f32 %v655_v43, %v8326_v7  ;;  %v959_v44 = vshrl.u32 %v8409_v53, 16  ;;  %v962_v2 = vshll.u32 %v8409_v53, 16  ;;  %7094 = vmatprep.subr.bf16.mxu0 %v7595_v14 }
  0xb8   : > { %6814 = vmatprep.mubr.bf16.mxu1 %v948_v38  ;;  %v6415_v62 = vunpack.c.h.bf16 %v6525_v28  ;;  %v956_v7 = vor.u32 %v955_v11, %v952_v0  ;;  %v488_v39 = vadd.f32 %v8016_v15, %v445_v3  ;;  %v491_v45 = vadd.f32 %v8016_v15, %v448_v26  ;;  %v7599_v3 = vld [vmem:[%s9379_s4 + $0x1a0] sm:$0xff]  }
  0xb9   : > { %v8437_v4 = vpack.c.bf16 %v737_v46, %v736_v47  ;;  %7059 = vmatmul.mubr.bf16.gmra.mrb[4].mxu0 %v3282_v30  ;;  %v961_v49 = vrot.slane %v959_v44, 6  ;;  %v964_v48 = vrot.slane %v962_v2, 7  ;;  %v6414_v18 = vunpack.c.l.bf16 %v6525_v28 }
  0xba   : > { %v670_v59 = vpop.permute.xlu1 %669  ;;  %v665_v32 = vpop.permute.xlu0 %664  ;;  %7062 = vmatprep.mubr.bf16.mxu0 %v3290_v9  ;;  %v3297_v16 = vrot.slane %v917_v17, 1  ;;  %7095 = vmatpush3.bf16.msra.mxu0 %v7595_v14  ;;  %v490_v60 = vadd.f32 %v8016_v15, %v447_v41  ;;  %v450_v19 = vmul.f32 %v6415_v62, %v8001_v63  ;;  %v3305_v17 = vrot.slane %v926_v50, 1 }
  0xbb   : > { %800 = vst [vmem:[#allocation2 + $0x70] sm:$0xff] %v8437_v4  ;;  %v739_v8 = vmul.f32 %v670_v59, %v8378_v5  ;;  %v738_v10 = vmul.f32 %v665_v32, %v486_v1  ;;  %v965_v21 = vor.u32 %v964_v48, %v961_v49  ;;  %v968_v29 = vshrl.u32 %v8437_v4, 16  ;;  %7096 = vmatprep.subr.bf16.mxu0 %v7597_v52  ;;  %v7603_v59 = vld [vmem:[%s9379_s4 + $0x1b0] sm:$0xff]  }
  0xbc   : > { %v971_v14 = vshll.u32 %v8437_v4, 16  ;;  %v957_v5 = vsel %vm841_vm0, %v947_v35, %v956_v7  ;;  %v449_v43 = vmul.f32 %v6414_v18, %v8001_v63  ;;  %v3293_v55 = vor.u32 %v3289_v33, %v905_v54  ;;  %v8578_v4 = vld [vmem:[#allocation2 + $0x18] sm:$0xff] }
  0xbd   : > { %v8458_v38 = vpack.c.bf16 %v739_v8, %v738_v10  ;;  %v966_v1 = vsel %vm841_vm0, %v956_v7, %v965_v21  ;;  %v970_v28 = vrot.slane %v968_v29, 6  ;;  %v3301_v50 = vor.u32 %v3297_v16, %v914_v27 }
  0xbe   : > { %v680_v0 = vpop.permute.xlu1 %679  ;;  %v675_v24 = vpop.permute.xlu0 %674  ;;  %v973_v12 = vrot.slane %v971_v14, 7  ;;  %7097 = vmatpush3.bf16.msra.mxu0 %v7597_v52  ;;  %v3298_v54 = vsel %vm3246_vm1, %v3293_v55, %v3297_v16  ;;  %v493_v30 = vadd.f32 %v8016_v15, %v450_v19  ;;  %v492_v9 = vadd.f32 %v8016_v15, %v449_v43 }
  0xbf   : > { %6815 = vmatmul.mubr.bf16.gmra.mrb[20].mxu1 %v957_v5  ;;  %801 = vst [vmem:[#allocation2 + $0x78] sm:$0xff] %v8458_v38  ;;  %v741_v35 = vmul.f32 %v680_v0, %v8404_v37  ;;  %v740_v26 = vmul.f32 %v675_v24, %v488_v39  ;;  %v977_v11 = vshrl.u32 %v8458_v38, 16  ;;  %v980_v63 = vshll.u32 %v8458_v38, 16  ;;  %7098 = vmatprep.subr.bf16.mxu0 %v7599_v3 }
  0xc0   : > { %6818 = vmatprep.mubr.bf16.mxu1 %v966_v1  ;;  %v3306_v57 = vsel %vm3246_vm1, %v3301_v50, %v3305_v17  ;;  %v974_v33 = vor.u32 %v973_v12, %v970_v28  ;;  %v3313_v41 = vrot.slane %v935_v40, 1  ;;  %v3321_v15 = vrot.slane %v944_v25, 1 }
  0xc1   : > { %v8480_v27 = vpack.c.bf16 %v741_v35, %v740_v26  ;;  %7063 = vmatmul.mubr.bf16.gmra.mrb[8].mxu0 %v3298_v54  ;;  %v979_v37 = vrot.slane %v977_v11, 6  ;;  %v982_v46 = vrot.slane %v980_v63, 7  ;;  %v3309_v10 = vor.u32 %v3305_v17, %v923_v61  ;;  %v8532_v35 = vld [vmem:[%s9379_s4 + $0x1c0] sm:$0xff]  }
  0xc2   : > { %v690_v47 = vpop.permute.xlu1 %689  ;;  %v685_v52 = vpop.permute.xlu0 %684  ;;  %7066 = vmatprep.mubr.bf16.mxu0 %v3306_v57  ;;  %7099 = vmatpush3.bf16.msra.mxu0 %v7599_v3  ;;  %v975_v40 = vsel %vm841_vm0, %v965_v21, %v974_v33  ;;  %v3317_v25 = vor.u32 %v3313_v41, %v932_v31  ;;  %v3329_v12 = vrot.slane %v953_v13, 1  ;;  %v1412_v51 = vrot.slane %v8458_v38, 7 }
  0xc3   : > { %802 = vst [vmem:[#allocation2 + $0x80] sm:$0xff] %v8480_v27  ;;  %v743_v62 = vmul.f32 %v690_v47, %v491_v45  ;;  %v742_v7 = vmul.f32 %v685_v52, %v490_v60  ;;  %v983_v49 = vor.u32 %v982_v46, %v979_v37  ;;  %v986_v48 = vshrl.u32 %v8480_v27, 16  ;;  %7100 = vmatprep.subr.bf16.mxu0 %v7601_v34  ;;  %v1327_v37 = vld [vmem:[#allocation2] sm:$0x80] }
  0xc4   : > { %v989_v32 = vshll.u32 %v8480_v27, 16  ;;  %v3314_v61 = vsel %vm3246_vm1, %v3309_v10, %v3313_v41  ;;  %v3322_v42 = vsel %vm3246_vm1, %v3317_v25, %v3321_v15  ;;  %v3333_v13 = vor.u32 %v3329_v12, %v950_v36 }
  0xc5   : > { %v8498_v39 = vpack.c.bf16 %v743_v62, %v742_v7  ;;  %v984_v45 = vsel %vm841_vm0, %v974_v33, %v983_v49  ;;  %v988_v18 = vrot.slane %v986_v48, 6  ;;  %v1383_v47 = vrot.slane %v1327_v37, 7  ;;  %v8557_v7 = vld [vmem:[#allocation2] sm:$0xff]  ;;  %v8627_v37 = vld [vmem:[#allocation2 + $0x38] sm:$0xff] }
  0xc6   : > { %v700_v16 = vpop.permute.xlu1 %699  ;;  %v695_v8 = vpop.permute.xlu0 %694  ;;  %v991_v3 = vrot.slane %v989_v32, 7  ;;  %7101 = vmatpush3.bf16.msra.mxu0 %v7601_v34  ;;  %v1414_v36 = vrot.slane %v8480_v27, 7  ;;  %v1388_v25 = vrot.slane %v8578_v4, 7  ;;  %v8599_v27 = vld [vmem:[#allocation2 + $0x20] sm:$0xff] }
  0xc7   : > { %6819 = vmatmul.mubr.bf16.gmra.mrb[24].mxu1 %v975_v40  ;;  %803 = vst [vmem:[#allocation2 + $0x88] sm:$0xff] %v8498_v39  ;;  %v745_v21 = vmul.f32 %v700_v16, %v493_v30  ;;  %v744_v60 = vmul.f32 %v695_v8, %v492_v9  ;;  %v995_v19 = vshrl.u32 %v8498_v39, 16  ;;  %v998_v5 = vshll.u32 %v8498_v39, 16  ;;  %7102 = vmatprep.subr.bf16.mxu0 %v7603_v59  ;;  %v8576_v16 = vld [vmem:[#allocation2 + $0x10] sm:$0xff] }
  0xc8   : > { %6822 = vmatprep.mubr.bf16.mxu1 %v984_v45  ;;  %v992_v17 = vor.u32 %v991_v3, %v988_v18  ;;  %v3353_v9 = vrot.slane %v980_v63, 1  ;;  %v1416_v41 = vrot.slane %v8498_v39, 7  ;;  %v1386_v8 = vrot.slane %v8576_v16, 7 }
  0xc9   : > { %v8518_v31 = vpack.c.bf16 %v745_v21, %v744_v60  ;;  %7067 = vmatmul.mubr.bf16.gmra.mrb[12].mxu0 %v3314_v61  ;;  %v997_v1 = vrot.slane %v995_v19, 6  ;;  %v1000_v28 = vrot.slane %v998_v5, 7  ;;  %v3369_v10 = vrot.slane %v998_v5, 1 }
  0xca   : > { %v710_v0 = vpop.permute.xlu1 %709  ;;  %v705_v24 = vpop.permute.xlu0 %704  ;;  %7070 = vmatprep.mubr.bf16.mxu0 %v3322_v42  ;;  %7103 = vmatpush3.bf16.msra.mxu0 %v7603_v59  ;;  %v993_v34 = vsel %vm841_vm0, %v983_v49, %v992_v17  ;;  %v8563_v49 = vsel %vm1382_vm2, %v1412_v51, %v1414_v36  ;;  %v8570_v63 = vsel %vm1382_vm2, %v1414_v36, %v1416_v41 }
  0xcb   : > { %804 = vst [vmem:[#allocation2 + $0x90] sm:$0xff] %v8518_v31  ;;  %v747_v43 = vmul.f32 %v710_v0, %v8021_v22  ;;  %v746_v55 = vmul.f32 %v705_v24, %v8024_v23  ;;  %v1001_v50 = vor.u32 %v1000_v28, %v997_v1  ;;  %7104 = vmatprep.subr.bf16.mxu0 %v7604_v6  ;;  %v3337_v22 = vrot.slane %v962_v2, 1  ;;  %v7602_v1 = vld [vmem:[%s9379_s4 + $0x90] sm:$0xff]   ;;  %v3228_v28 = vld [vmem:[#allocation2 + $0xa0] sm:$0x1] }
  0xcc   : > { %v3325_v23 = vor.u32 %v3321_v15, %v941_v20  ;;  %v3345_v20 = vrot.slane %v971_v14, 1  ;;  %v1384_v14 = vrot.slane %v8557_v7, 7  ;;  %v3357_v3 = vor.u32 %v3353_v9, %v977_v11 }
  0xcd   : > { %v8534_v26 = vpack.c.bf16 %v747_v43, %v746_v55  ;;  %v1002_v54 = vsel %vm841_vm0, %v992_v17, %v1001_v50  ;;  %v3338_v33 = vsel %vm3246_vm1, %v3333_v13, %v3337_v22  ;;  %v3341_v62 = vor.u32 %v3337_v22, %v959_v44  ;;  %v8623_v13 = vld [vmem:[#allocation2 + $0x30] sm:$0xff] }
  0xce   : > { %7105 = vmatpush3.bf16.msra.mxu0 %v7604_v6  ;;  %v3330_v57 = vsel %vm3246_vm1, %v3325_v23, %v3329_v12  ;;  %v3349_v15 = vor.u32 %v3345_v20, %v968_v29  ;;  %v1385_v40 = vsel %vm1382_vm2, %v1383_v47, %v1384_v14  ;;  %v3361_v29 = vrot.slane %v989_v32, 1  ;;  %v7600_v32 = vld [vmem:[%s9379_s4 + $0x88] sm:$0xff]  }
  0xcf   : > { %6823 = vmatmul.mubr.bf16.gmra.mrb[28].mxu1 %v993_v34  ;;  %805 = vst [vmem:[#allocation2 + $0x98] sm:$0xff] %v8534_v26  ;;  %7142 = vmatprep.subr.bf16.mxu0 %v8532_v35  ;;  %v3346_v44 = vsel %vm3246_vm1, %v3341_v62, %v3345_v20  ;;  %v3375_v60 = vshll.u32 %v8518_v31, 16  ;;  %v1387_v61 = vsel %vm1382_vm2, %v1384_v14, %v1386_v8  ;;  %v3383_v42 = vshll.u32 %v8534_v26, 16  ;;  %v8648_v14 = vld [vmem:[#allocation2 + $0x58] sm:$0xff] }
  0xd0   : > { %6826 = vmatprep.mubr.bf16.mxu1 %v1002_v54  ;;  %v3354_v18 = vsel %vm3246_vm1, %v3349_v15, %v3353_v9  ;;  %v3365_v21 = vor.u32 %v3361_v29, %v986_v48  ;;  %v3362_v6 = vsel %vm3246_vm1, %v3357_v3, %v3361_v29  ;;  %v1389_v11 = vsel %vm1382_vm2, %v1386_v8, %v1388_v25  ;;  %v8602_v48 = vld [vmem:[#allocation2 + $0x28] sm:$0xff]  ;;  %v7606_v9 = vld [vmem:[%s9379_s4 + $0xa0] sm:$0xff]  }
  0xd1   : > { %7071 = vmatmul.mubr.bf16.gmra.mrb[16].mxu0 %v3330_v57  ;;  %v3377_v17 = vrot.slane %v3375_v60, 1  ;;  %v1390_v0 = vrot.slane %v8599_v27, 7  ;;  %v3379_v24 = vshrl.u32 %v8518_v31, 16  ;;  %v8609_v43 = vrot.slane %v3383_v42, 1  ;;  %v7605_v31 = vld [vmem:[%s9379_s4 + $0x98] sm:$0xff]   ;;  %v8665_v3 = vld [vmem:[#allocation2 + $0x88] sm:$0xff] }
  0xd2   : > { %7074 = vmatprep.mubr.bf16.mxu0 %v3338_v33  ;;  %v824_v2 = vld [vmem:[#allocation2 + $0x90] sm:$0x7f]  ;;  %v3370_v5 = vsel %vm3246_vm1, %v3365_v21, %v3369_v10  ;;  %v1392_v55 = vrot.slane %v8602_v48, 7  ;;  %v3391_v34 = vshll.u32 %v3228_v28, 16  ;;  %v9389_v22 = vshll.u32 %v8599_v27, 16  ;;  %v7608_v60 = vld [vmem:[%s9379_s4 + $0xa8] sm:$0xff]  }
  0xd3   : > { %v1004_v46 = vshrl.u32 %v824_v2, 16  ;;  %v1007_v56 = vshll.u32 %v824_v2, 16  ;;  %v3381_v12 = vor.u32 %v3379_v24, %v3377_v17  ;;  %v1391_v23 = vsel %vm1382_vm2, %v1388_v25, %v1390_v0  ;;  %v8652_v15 = vld [vmem:[#allocation2 + $0x90] sm:$0xff]  ;;  %v8663_v25 = vld [vmem:[#allocation2 + $0x68] sm:$0xff] }
  0xd4   : > { %v3387_v57 = vshrl.u32 %v8534_v26, 16  ;;  %v1393_v33 = vsel %vm1382_vm2, %v1390_v0, %v1392_v55  ;;  %v3393_v47 = vrot.slane %v3391_v34, 1  ;;  %v8638_v26 = vld [vmem:[#allocation2 + $0x50] sm:$0xff]  ;;  %v1394_v36 = vrot.slane %v8623_v13, 7  ;;  %v8687_v0 = vld [vmem:[#allocation2 + $0x78] sm:$0xff] }
  0xd5   : > { %v1006_v52 = vrot.slane %v1004_v46, 6  ;;  %v1009_v30 = vrot.slane %v1007_v56, 7  ;;  %v8631_v46 = vld [vmem:[#allocation2 + $0x40] sm:$0xff]  ;;  %v8633_v56 = vld [vmem:[#allocation2 + $0x48] sm:$0xff]  ;;  %v1396_v62 = vrot.slane %v8627_v37, 7  ;;  %v9408_v8 = vshrl.u32 %v8599_v27, 16 }
  0xd6   : > { %v8636_v20 = vor.u32 %v3387_v57, %v8609_v43  ;;  %v9385_v28 = vshll.u32 %v8623_v13, 16  ;;  %v9412_v24 = vshrl.u32 %v8665_v3, 16  ;;  %v7610_v57 = vld [vmem:[%s9379_s4 + $0xb0] sm:$0xff]   ;;  %v9406_v38 = vshrl.u32 %v8663_v25, 16 }
  0xd7   : > { %v1010_v59 = vor.u32 %v1009_v30, %v1006_v52  ;;  %v3783_v52 = vshrl.u32 %v8578_v4, 16  ;;  %v3792_v30 = vrot.slane %v9389_v22, 1 }
  0xd8   : > { %v3394_v29 = vsel %vm3246_vm1, %v8636_v20, %v3393_v47 }
  0xd9   : > { %v1011_v45 = vsel %vm841_vm0, %v1001_v50, %v1010_v59  ;;  %7075 = vmatmul.mubr.bf16.gmra.mrb[20].mxu0 %v3346_v44  ;;  %v9413_v50 = vshll.u32 %v8578_v4, 16  ;;  %v8650_v59 = vld [vmem:[#allocation2 + $0x60] sm:$0xff]  ;;  %v9384_v44 = vrot.slane %v8631_v46, 1  ;;  %v3796_v34 = vor.u32 %v9408_v8, %v3792_v30 }
  0xda   : > { %6827 = vmatmul.mubr.bf16.gmra.mrb[32].mxu1 %v1011_v45  ;;  %7078 = vmatprep.mubr.bf16.mxu0 %v3354_v18  ;;  %v4350_v18 = vrot.slane %v8638_v26, 1  ;;  %v4354_v42 = vrot.slane %v8650_v59, 1  ;;  %v3882_v8 = vshrl.u32 %v8687_v0, 16 }
  0xdb   : > { %6846 = vmatprep.mubr.bf16.mxu1 %v1385_v40  ;;  %v3787_v2 = vrot.slane %v9413_v50, 1  ;;  %v4348_v40 = vrot.slane %v8633_v56, 1 }
  0xdd   : > { %v3788_v45 = vor.u32 %v3787_v2, %v3783_v52  ;;  %v8670_v21 = vsel %vm4336_vm3, %v9384_v44, %v4348_v40  ;;  %v7609_v44 = vld [vmem:[%s9379_s4 + $0x1c8] sm:$0xff]  }
  0xe1   : > { %7079 = vmatmul.mubr.bf16.gmra.mrb[24].mxu0 %v3362_v6  ;;  %v8675_v6 = vld [vmem:[#allocation2 + $0x70] sm:$0xff] }
  0xe2   : > { %6847 = vmatmul.mubr.bf16.vlgmr.msra.gmra.mrb[0].mxu1 %v1387_v61  ;;  %7082 = vmatprep.mubr.bf16.mxu0 %v3370_v5  ;;  %v8679_v61 = vsel %vm4336_vm3, %v4348_v40, %v4350_v18  ;;  %v4352_v5 = vrot.slane %v8648_v14, 1  ;;  %v4360_v40 = vrot.slane %v8687_v0, 1 }
  0xe3   : > { %6883 = vmatpush3.bf16.msra.mxu1 %v8390_v58  ;;  %6850 = vmatprep.mubr.bf16.mxu1 %v1389_v11  ;;  %v3373_v58 = vor.u32 %v3369_v10, %v995_v19  ;;  %v3386_v19 = vsel %vm3246_vm1, %v3381_v12, %v8609_v43  ;;  %v9386_v10 = vshll.u32 %v8602_v48, 16  ;;  %v1395_v11 = vsel %vm1382_vm2, %v1392_v55, %v1394_v36 }
  0xe4   : > { %6884 = vmatprep.subr.bf16.mxu1 %v7600_v32  ;;  %v8694_v12 = vsel %vm4336_vm3, %v4352_v5, %v4354_v42  ;;  %v4356_v55 = vrot.slane %v8663_v25, 1 }
  0xe5   : > { %v3378_v54 = vsel %vm3246_vm1, %v3373_v58, %v3377_v17  ;;  %v1397_v17 = vsel %vm1382_vm2, %v1394_v36, %v1396_v62  ;;  %v8691_v58 = vsel %vm4336_vm3, %v4350_v18, %v4352_v5  ;;  %v9392_v36 = vshrl.u32 %v8602_v48, 16 }
  0xe6   : > { %v8710_v2 = vsel %vm4336_vm3, %v4354_v42, %v4356_v55  ;;  %v8726_v18 = vrot.slane %v9412_v24, 7 }
  0xe7   : > { %6885 = vmatpush3.bf16.msra.mxu1 %v7600_v32  ;;  %v9391_v32 = vshrl.u32 %v8652_v15, 16 }
  0xe8   : > { %6886 = vmatprep.subr.bf16.mxu1 %v7602_v1 }
  0xe9   : > { %7083 = vmatmul.mubr.bf16.gmra.mrb[28].mxu0 %v3378_v54  ;;  %v3800_v54 = vrot.slane %v9386_v10, 1  ;;  %v8714_v47 = vrot.slane %v9391_v32, 7 }
  0xea   : > { %6851 = vmatmul.mubr.bf16.gmra.mrb[4].mxu1 %v1391_v23  ;;  %7086 = vmatprep.mubr.bf16.mxu0 %v3386_v19  ;;  %v4358_v23 = vrot.slane %v8675_v6, 1  ;;  %v1398_v19 = vrot.slane %v8631_v46, 7 }
  0xeb   : > { %6854 = vmatprep.mubr.bf16.mxu1 %v1393_v33  ;;  %6887 = vmatpush3.bf16.msra.mxu1 %v7602_v1  ;;  %v3793_v1 = vsel %vm3246_vm1, %v3788_v45, %v3792_v30  ;;  %v3902_v33 = vshll.u32 %v8652_v15, 16  ;;  %v3808_v30 = vrot.slane %v9385_v28, 1  ;;  %v1400_v45 = vrot.slane %v8633_v56, 7 }
  0xec   : > { %6888 = vmatprep.subr.bf16.mxu1 %v7605_v31  ;;  %v3804_v42 = vor.u32 %v9392_v36, %v3800_v54 }
  0xed   : > { %v3904_v39 = vrot.slane %v3902_v33, 1 }
  0xef   : > { %6889 = vmatpush3.bf16.msra.mxu1 %v7605_v31  ;;  %v8701_v31 = vld [vmem:[#allocation2 + $0x80] sm:$0xff] }
  0xf0   : > { %6890 = vmatprep.subr.bf16.mxu1 %v7606_v9  ;;  %v4362_v5 = vrot.slane %v8701_v31, 1 }
  0xf1   : > { %7087 = vmatmul.mubr.bf16.gmra.mrb[32].mxu0 %v3394_v29  ;;  %v1954_v29 = vor.u32 %v3902_v33, %v8714_v47 }
  0xf2   : > { %6855 = vmatmul.mubr.bf16.gmra.mrb[8].mxu1 %v1395_v11  ;;  %7106 = vmatprep.mubr.bf16.mxu0 %v3793_v1  ;;  %v9387_v11 = vshll.u32 %v8627_v37, 16  ;;  %v1399_v1 = vsel %vm1382_vm2, %v1396_v62, %v1398_v19  ;;  %v8748_v10 = vsel %vm4336_vm3, %v4360_v40, %v4362_v5  ;;  %v7612_v62 = vld [vmem:[%s9379_s4 + $0xb8] sm:$0xff]  }
  0xf3   : > { %6858 = vmatprep.mubr.bf16.mxu1 %v1397_v17  ;;  %6891 = vmatpush3.bf16.msra.mxu1 %v7606_v9  ;;  %v8720_v9 = vsel %vm4336_vm3, %v4356_v55, %v4358_v23  ;;  %v8736_v17 = vsel %vm4336_vm3, %v4358_v23, %v4360_v40  ;;  %v3801_v55 = vsel %vm3246_vm1, %v3796_v34, %v3800_v54  ;;  %v9390_v23 = vshll.u32 %v8631_v46, 16 }
  0xf4   : > { %6892 = vmatprep.subr.bf16.mxu1 %v7608_v60  ;;  %v8745_v28 = vsel %vm1807_vm4, %v8726_v18, %v1954_v29  ;;  %v4364_v34 = vrot.slane %v8665_v3, 1  ;;  %v9388_v54 = vrot.slane %v8652_v15, 1  ;;  %v1401_v29 = vsel %vm1382_vm2, %v1398_v19, %v1400_v45 }
  0xf5   : > { %v3816_v40 = vrot.slane %v9387_v11, 1 }
  0xf6   : > { %v8771_v19 = vsel %vm4336_vm3, %v4364_v34, %v9388_v54  ;;  %v9393_v54 = vshll.u32 %v8633_v56, 16 }
  0xf7   : > { %6893 = vmatpush3.bf16.msra.mxu1 %v7608_v60  ;;  %v3809_v60 = vsel %vm3246_vm1, %v3804_v42, %v3808_v30  ;;  %v8762_v42 = vsel %vm4336_vm3, %v4362_v5, %v4364_v34  ;;  %v3824_v5 = vrot.slane %v9390_v23, 1  ;;  %v7613_v23 = vld [vmem:[%s9379_s4 + $0x1d8] sm:$0xff]  }
  0xf8   : > { %6894 = vmatprep.subr.bf16.mxu1 %v7610_v57 }
  0xf9   : > { %7107 = vmatmul.mubr.bf16.vlgmr.msra.gmra.mrb[0].mxu0 %v3801_v55  ;;  %v9407_v55 = vshrl.u32 %v8623_v13, 16 }
  0xfa   : > { %6859 = vmatmul.mubr.bf16.gmra.mrb[12].mxu1 %v1399_v1  ;;  %7110 = vmatprep.mubr.bf16.mxu0 %v3809_v60  ;;  %v7611_v1 = vld [vmem:[%s9379_s4 + $0x1d0] sm:$0xff]   ;;  %v1402_v60 = vrot.slane %v8638_v26, 7 }
  0xfb   : > { %6862 = vmatprep.mubr.bf16.mxu1 %v1401_v29  ;;  %7143 = vmatpush3.bf16.msra.mxu0 %v8532_v35  ;;  %v9405_v35 = vshrl.u32 %v8627_v37, 16  ;;  %v1404_v29 = vrot.slane %v8648_v14, 7  ;;  %v3812_v11 = vor.u32 %v9407_v55, %v3808_v30  ;;  %v9394_v30 = vshll.u32 %v8638_v26, 16 }
  0xfc   : > { %7144 = vmatprep.subr.bf16.mxu0 %v7609_v44  ;;  %6895 = vmatpush3.bf16.msra.mxu1 %v7610_v57  ;;  %v8780_v57 = vld [vmem:[%s9379_s4 + $0xc0] sm:$0xff]   ;;  %v1403_v32 = vsel %vm1382_vm2, %v1400_v45, %v1402_v60  ;;  %v1406_v45 = vrot.slane %v8650_v59, 7  ;;  %v3874_v55 = vshrl.u32 %v8675_v6, 16 }
  0xfd   : > { %6896 = vmatprep.subr.bf16.mxu1 %v7612_v62  ;;  %v3820_v34 = vor.u32 %v9405_v35, %v3816_v40  ;;  %v3817_v22 = vsel %vm3246_vm1, %v3812_v11, %v3816_v40  ;;  %v3832_v11 = vrot.slane %v9393_v54, 1  ;;  %v9396_v40 = vshrl.u32 %v8633_v56, 16  ;;  %v7617_v54 = vld [vmem:[%s9379_s4 + $0x1e8] sm:$0xff]  }
  0xfe   : > { %v9414_v35 = vshll.u32 %v8701_v31, 16 }
  0xff   : > { %7145 = vmatpush3.bf16.msra.mxu0 %v7609_v44  ;;  %v3825_v36 = vsel %vm3246_vm1, %v3820_v34, %v3824_v5  ;;  %v1405_v44 = vsel %vm1382_vm2, %v1402_v60, %v1404_v29  ;;  %v9398_v60 = vshll.u32 %v8648_v14, 16  ;;  %v1408_v34 = vrot.slane %v8409_v53, 7 }
 0x100   : > { %7146 = vmatprep.subr.bf16.mxu0 %v7611_v1  ;;  %6897 = vmatpush3.bf16.msra.mxu1 %v7612_v62  ;;  %v9395_v62 = vshrl.u32 %v8631_v46, 16 }
 0x101   : > { %7111 = vmatmul.mubr.bf16.gmra.mrb[4].mxu0 %v3817_v22  ;;  %6934 = vmatprep.subr.bf16.mxu1 %v8780_v57  ;;  %v7615_v22 = vld [vmem:[%s9379_s4 + $0x1e0] sm:$0xff]   ;;  %v3848_v53 = vrot.slane %v9398_v60, 1  ;;  %v9401_v60 = vshll.u32 %v8675_v6, 16 }
 0x102   : > { %6863 = vmatmul.mubr.bf16.gmra.mrb[16].mxu1 %v1403_v32  ;;  %7114 = vmatprep.mubr.bf16.mxu0 %v3825_v36  ;;  %v3840_v32 = vrot.slane %v9394_v30, 1  ;;  %v3828_v36 = vor.u32 %v9395_v62, %v3824_v5  ;;  %v1407_v30 = vsel %vm1382_vm2, %v1404_v29, %v1406_v45  ;;  %v9397_v62 = vshll.u32 %v8650_v59, 16  ;;  %v7619_v29 = vld [vmem:[%s9379_s4 + $0x1f0] sm:$0xff]  }
 0x103   : > { %6866 = vmatprep.mubr.bf16.mxu1 %v1405_v44  ;;  %7147 = vmatpush3.bf16.msra.mxu0 %v7611_v1  ;;  %v3836_v1 = vor.u32 %v9396_v40, %v3832_v11  ;;  %v1409_v40 = vsel %vm1382_vm2, %v1406_v45, %v1408_v34 }
 0x104   : > { %7148 = vmatprep.subr.bf16.mxu0 %v7613_v23  ;;  %v3833_v44 = vsel %vm3246_vm1, %v3828_v36, %v3832_v11  ;;  %v1410_v11 = vrot.slane %v8675_v6, 7  ;;  %v9400_v36 = vshrl.u32 %v8648_v14, 16 }
 0x105   : > { %v3841_v5 = vsel %vm3246_vm1, %v3836_v1, %v3840_v32  ;;  %v8836_v1 = vld [vmem:[#allocation2 + $0x80] sm:$0xff] }
 0x107   : > { %7149 = vmatpush3.bf16.msra.mxu0 %v7613_v23  ;;  %v9402_v23 = vshrl.u32 %v8638_v26, 16 }
 0x108   : > { %7150 = vmatprep.subr.bf16.mxu0 %v7615_v22 }
 0x109   : > { %7115 = vmatmul.mubr.bf16.gmra.mrb[8].mxu0 %v3833_v44  ;;  %v3844_v45 = vor.u32 %v9402_v23, %v3840_v32 }
 0x10a   : > { %6867 = vmatmul.mubr.bf16.gmra.mrb[20].mxu1 %v1407_v30  ;;  %7118 = vmatprep.mubr.bf16.mxu0 %v3841_v5  ;;  %v3856_v30 = vrot.slane %v9397_v62, 1  ;;  %v7620_v5 = vld [vmem:[%s9379_s4 + $0x1f8] sm:$0xff]   ;;  %v1411_v62 = vsel %vm1382_vm2, %v1408_v34, %v1410_v11  ;;  %v9403_v34 = vshrl.u32 %v8650_v59, 16 }
 0x10b   : > { %6870 = vmatprep.mubr.bf16.mxu1 %v1409_v40  ;;  %7151 = vmatpush3.bf16.msra.mxu0 %v7615_v22  ;;  %v3852_v22 = vor.u32 %v9400_v36, %v3848_v53  ;;  %v9399_v40 = vshll.u32 %v8663_v25, 16  ;;  %v3849_v44 = vsel %vm3246_vm1, %v3844_v45, %v3848_v53  ;;  %v9404_v53 = vshrl.u32 %v8836_v1, 16 }
 0x10c   : > { %7152 = vmatprep.subr.bf16.mxu0 %v7617_v54 }
 0x10d   : > { %v3857_v32 = vsel %vm3246_vm1, %v3852_v22, %v3856_v30  ;;  %v3864_v45 = vrot.slane %v9399_v40, 1  ;;  %v3860_v22 = vor.u32 %v9403_v34, %v3856_v30 }
 0x10f   : > { %7153 = vmatpush3.bf16.msra.mxu0 %v7617_v54  ;;  %v1413_v54 = vsel %vm1382_vm2, %v1410_v11, %v1412_v51  ;;  %v3872_v51 = vrot.slane %v9401_v60, 1  ;;  %v1771_v11 = vld [vmem:[#allocation2] sm:$0x80]  ;;  %v3868_v36 = vor.u32 %v9406_v38, %v3864_v45  ;;  %v9410_v60 = vshll.u32 %v8687_v0, 16 }
 0x110   : > { %7154 = vmatprep.subr.bf16.mxu0 %v7619_v29  ;;  %v3865_v23 = vsel %vm3246_vm1, %v3860_v22, %v3864_v45  ;;  %v1809_v30 = vshrl.u32 %v1771_v11, 16  ;;  %v1816_v45 = vshll.u32 %v8557_v7, 16 }
 0x111   : > { %7119 = vmatmul.mubr.bf16.gmra.mrb[12].mxu0 %v3849_v44  ;;  %v3894_v44 = vshll.u32 %v8665_v3, 16 }
 0x112   : > { %6871 = vmatmul.mubr.bf16.gmra.mrb[24].mxu1 %v1411_v62  ;;  %7122 = vmatprep.mubr.bf16.mxu0 %v3857_v32  ;;  %v8856_v62 = vld [vmem:[%s9379_s4 + $0x200] sm:$0xff]   ;;  %v8864_v32 = vld [vmem:[#allocation2 + $0x98] sm:$0xff] }
 0x113   : > { %6874 = vmatprep.mubr.bf16.mxu1 %v1413_v54  ;;  %7155 = vmatpush3.bf16.msra.mxu0 %v7619_v29  ;;  %v9409_v29 = vshrl.u32 %v8557_v7, 16  ;;  %v8868_v54 = vrot.slane %v9404_v53, 7  ;;  %v8871_v40 = vor.u32 %v3894_v44, %v8726_v18  ;;  %v3873_v18 = vsel %vm3246_vm1, %v3868_v36, %v3872_v51  ;;  %v1345_v53 = vld [vmem:[#allocation2 + $0x90] sm:$0x7f] }
 0x114   : > { %7156 = vmatprep.subr.bf16.mxu0 %v7620_v5  ;;  %v9411_v38 = vshrl.u32 %v8864_v32, 16  ;;  %v9415_v11 = vshll.u32 %v8864_v32, 16  ;;  %v1418_v22 = vrot.slane %v1345_v53, 7 }
 0x115   : > { %v8881_v34 = vsel %vm1807_vm4, %v8868_v54, %v8871_v40 }
 0x116   : > { %v2486_v36 = vrot.slane %v9411_v38, 7  ;;  %v3876_v38 = vor.u32 %v3874_v55, %v3872_v51  ;;  %v1831_v51 = vrot.slane %v3783_v52, 7 }
 0x117   : > { %7157 = vmatpush3.bf16.msra.mxu0 %v7620_v5  ;;  %v1815_v5 = vrot.slane %v9409_v29, 7  ;;  %v3888_v29 = vrot.slane %v9414_v35, 1  ;;  %v1419_v35 = vsel %vm1382_vm2, %v1416_v41, %v1418_v22  ;;  %v9416_v41 = vshll.u32 %v8578_v4, 16 }
 0x118   : > { %7194 = vmatprep.subr.bf16.mxu0 %v8856_v62  ;;  %v9417_v22 = vshrl.u32 %v8665_v3, 16  ;;  %v9418_v4 = vshrl.u32 %v8599_v27, 16  ;;  %v9419_v3 = vshrl.u32 %v8602_v48, 16 }
 0x119   : > { %7123 = vmatmul.mubr.bf16.gmra.mrb[16].mxu0 %v3865_v23  ;;  %v3880_v23 = vrot.slane %v9410_v60, 1  ;;  %v2489_v60 = vor.u32 %v9415_v11, %v2486_v36 }
 0x11a   : > { %6875 = vmatmul.mubr.bf16.gmra.mrb[28].mxu1 %v8563_v49  ;;  %7126 = vmatprep.mubr.bf16.mxu0 %v3873_v18  ;;  %v1811_v49 = vrot.slane %v1809_v30, 7  ;;  %v1818_v18 = vor.u32 %v1816_v45, %v1815_v5 }
 0x11b   : > { %6878 = vmatprep.mubr.bf16.mxu1 %v8570_v63  ;;  %v1821_v63 = vshrl.u32 %v8576_v16, 16  ;;  %v3884_v53 = vor.u32 %v3882_v8, %v3880_v23  ;;  %v8909_v30 = vsel %vm1807_vm4, %v8714_v47, %v2489_v60  ;;  %v3881_v24 = vsel %vm3246_vm1, %v3876_v38, %v3880_v23 }
 0x11c   : > { %v1819_v50 = vsel %vm1807_vm4, %v1811_v49, %v1818_v18  ;;  %v1824_v47 = vshll.u32 %v8576_v16, 16  ;;  %v3896_v60 = vrot.slane %v3894_v44, 1  ;;  %v3890_v38 = vshrl.u32 %v8701_v31, 16  ;;  %v7616_v16 = vld [vmem:[%s9379_s4 + $0xc8] sm:$0xff]  }
 0x11d   : > { %v3889_v36 = vsel %vm3246_vm1, %v3884_v53, %v3888_v29  ;;  %v1823_v11 = vrot.slane %v1821_v63, 7  ;;  %v1839_v44 = vrot.slane %v9418_v4, 7  ;;  %v1847_v18 = vrot.slane %v9419_v3, 7  ;;  %v3764_v63 = vld [vmem:[#allocation2 + $0xa8] sm:$0x1] }
 0x11e   : > { %v3900_v49 = vor.u32 %v9417_v22, %v3896_v60 }
 0x11f   : > { %v1826_v23 = vor.u32 %v1824_v47, %v1823_v11  ;;  %v9421_v47 = vshll.u32 %v8599_v27, 16 }
 0x120   : > { %v3905_v33 = vsel %vm3246_vm1, %v3900_v49, %v3904_v39 }
 0x121   : > { %7127 = vmatmul.mubr.bf16.gmra.mrb[20].mxu0 %v3881_v24  ;;  %v1834_v24 = vor.u32 %v9416_v41, %v1831_v51  ;;  %v1827_v52 = vsel %vm1807_vm4, %v1815_v5, %v1826_v23  ;;  %v9420_v5 = vshrl.u32 %v8652_v15, 16  ;;  %v9422_v23 = vshll.u32 %v8602_v48, 16 }
 0x122   : > { %6879 = vmatmul.mubr.bf16.gmra.mrb[32].mxu1 %v1419_v35  ;;  %7130 = vmatprep.mubr.bf16.mxu0 %v3889_v36  ;;  %v3892_v35 = vor.u32 %v3890_v38, %v3888_v29  ;;  %v7618_v36 = vld [vmem:[%s9379_s4 + $0xd0] sm:$0xff]  }
 0x123   : > { %6898 = vmatprep.mubr.bf16.mxu1 %v1819_v50  ;;  %v1835_v29 = vsel %vm1807_vm4, %v1823_v11, %v1834_v24  ;;  %v3908_v53 = vor.u32 %v9420_v5, %v3904_v39  ;;  %v3920_v11 = vrot.slane %v1816_v45, 1  ;;  %v1850_v41 = vor.u32 %v9422_v23, %v1847_v18  ;;  %v7621_v39 = vld [vmem:[%s9379_s4 + $0xd8] sm:$0xff]  }
 0x124   : > { %v3897_v50 = vsel %vm3246_vm1, %v3892_v35, %v3896_v60  ;;  %v1842_v60 = vor.u32 %v9421_v47, %v1839_v44  ;;  %v3926_v24 = vshll.u32 %v3764_v63, 16  ;;  %v9423_v45 = vshrl.u32 %v8623_v13, 16 }
 0x125   : > { %v3921_v22 = vsel %vm3246_vm1, %v8636_v20, %v3920_v11  ;;  %v7622_v20 = vld [vmem:[%s9379_s4 + $0xe0] sm:$0xff]   ;;  %v9427_v63 = vshll.u32 %v8627_v37, 16  ;;  %v9428_v23 = vshrl.u32 %v8631_v46, 16 }
 0x126   : > { %v1843_v35 = vsel %vm1807_vm4, %v1831_v51, %v1842_v60  ;;  %v1855_v49 = vrot.slane %v9423_v45, 7  ;;  %v3928_v4 = vrot.slane %v3926_v24, 1  ;;  %v4281_v51 = vld [vmem:[#allocation2 + $0x18] sm:$0xfe]  ;;  %v9429_v24 = vshrl.u32 %v8633_v56, 16 }
 0x127   : > { %v4337_v47 = vrot.slane %v4281_v51, 1  ;;  %v4342_v45 = vrot.slane %v8623_v13, 1 }
 0x129   : > { %7131 = vmatmul.mubr.bf16.gmra.mrb[24].mxu0 %v3897_v50  ;;  %v1851_v50 = vsel %vm1807_vm4, %v1839_v44, %v1850_v41  ;;  %v4338_v44 = vrot.slane %v8599_v27, 1  ;;  %v1871_v27 = vrot.slane %v9428_v23, 7 }
 0x12a   : > { %6899 = vmatmul.mubr.bf16.vlgmr.msra.gmra.mrb[0].mxu1 %v1827_v52  ;;  %7134 = vmatprep.mubr.bf16.mxu0 %v3905_v33  ;;  %v9425_v52 = vshrl.u32 %v8557_v7, 16 }
 0x12b   : > { %6935 = vmatpush3.bf16.msra.mxu1 %v8780_v57  ;;  %6902 = vmatprep.mubr.bf16.mxu1 %v1835_v29  ;;  %v3913_v57 = vsel %vm3246_vm1, %v3908_v53, %v8609_v43  ;;  %v9424_v43 = vshrl.u32 %v8627_v37, 16  ;;  %v9426_v29 = vshll.u32 %v8623_v13, 16  ;;  %v7628_v13 = vld [vmem:[%s9379_s4 + $0xf8] sm:$0xff]  }
 0x12c   : > { %6936 = vmatprep.subr.bf16.mxu1 %v7616_v16  ;;  %v3924_v33 = vor.u32 %v3920_v11, %v9425_v52  ;;  %v4339_v11 = vsel %vm4336_vm3, %v4337_v47, %v4338_v44 }
 0x12d   : > { %v1858_v3 = vor.u32 %v9426_v29, %v1855_v49 }
 0x12e   : > { %v3929_v53 = vsel %vm3246_vm1, %v3924_v33, %v3928_v4  ;;  %v9432_v4 = vshrl.u32 %v8638_v26, 16 }
 0x12f   : > { %6937 = vmatpush3.bf16.msra.mxu1 %v7616_v16  ;;  %v1863_v16 = vrot.slane %v9424_v43, 7  ;;  %v1859_v60 = vsel %vm1807_vm4, %v1847_v18, %v1858_v3  ;;  %v7626_v18 = vld [vmem:[%s9379_s4 + $0xf0] sm:$0xff]  }
 0x130   : > { %6938 = vmatprep.subr.bf16.mxu1 %v7618_v36  ;;  %v1887_v51 = vrot.slane %v9432_v4, 7  ;;  %v7627_v3 = vld [vmem:[%s9379_s4 + $0x210] sm:$0xff]  }
 0x131   : > { %7135 = vmatmul.mubr.bf16.gmra.mrb[28].mxu0 %v3913_v57  ;;  %v1866_v5 = vor.u32 %v9427_v63, %v1863_v16  ;;  %v1879_v57 = vrot.slane %v9429_v24, 7  ;;  %v9439_v24 = vshll.u32 %v8650_v59, 16 }
 0x132   : > { %6903 = vmatmul.mubr.bf16.gmra.mrb[4].mxu1 %v1843_v35  ;;  %7138 = vmatprep.mubr.bf16.mxu0 %v3921_v22  ;;  %v9430_v35 = vshll.u32 %v8631_v46, 16 }
 0x133   : > { %6906 = vmatprep.mubr.bf16.mxu1 %v1851_v50  ;;  %6939 = vmatpush3.bf16.msra.mxu1 %v7618_v36  ;;  %v7624_v36 = vld [vmem:[%s9379_s4 + $0xe8] sm:$0xff]   ;;  %v1867_v41 = vsel %vm1807_vm4, %v1855_v49, %v1866_v5  ;;  %v9431_v49 = vshll.u32 %v8633_v56, 16  ;;  %v9435_v5 = vshll.u32 %v8648_v14, 16 }
 0x134   : > { %6940 = vmatprep.subr.bf16.mxu1 %v7621_v39  ;;  %v1874_v22 = vor.u32 %v9430_v35, %v1871_v27  ;;  %v7631_v35 = vld [vmem:[%s9379_s4 + $0x228] sm:$0xff]  }
 0x135   : > { %v1882_v50 = vor.u32 %v9431_v49, %v1879_v57  ;;  %v7632_v49 = vld [vmem:[%s9379_s4 + $0x230] sm:$0xff]  }
 0x136   : > { %v1875_v52 = vsel %vm1807_vm4, %v1863_v16, %v1874_v22  ;;  %v4344_v16 = vrot.slane %v8627_v37, 1  ;;  %v7629_v37 = vld [vmem:[%s9379_s4 + $0x218] sm:$0xff]  }
 0x137   : > { %6941 = vmatpush3.bf16.msra.mxu1 %v7621_v39  ;;  %v4340_v39 = vrot.slane %v8602_v48, 1  ;;  %v7625_v48 = vld [vmem:[%s9379_s4 + $0x208] sm:$0xff]   ;;  %v1883_v56 = vsel %vm1807_vm4, %v1871_v27, %v1882_v50  ;;  %v9438_v27 = vshrl.u32 %v8663_v25, 16 }
 0x138   : > { %6942 = vmatprep.subr.bf16.mxu1 %v7622_v20  ;;  %v4345_v47 = vsel %vm4336_vm3, %v4342_v45, %v4344_v16 }
 0x139   : > { %7139 = vmatmul.mubr.bf16.gmra.mrb[32].mxu0 %v3929_v53  ;;  %v4341_v43 = vsel %vm4336_vm3, %v4338_v44, %v4340_v39  ;;  %v4343_v33 = vsel %vm4336_vm3, %v4340_v39, %v4342_v45  ;;  %v9434_v44 = vshll.u32 %v8638_v26, 16  ;;  %v9440_v39 = vshll.u32 %v8663_v25, 16 }
 0x13a   : > { %6907 = vmatmul.mubr.bf16.gmra.mrb[8].mxu1 %v1859_v60  ;;  %7158 = vmatprep.mubr.bf16.mxu0 %v4339_v11  ;;  %v9437_v60 = vshrl.u32 %v8650_v59, 16  ;;  %v9029_v11 = vld [vmem:[%s9379_s4 + $0x100] sm:$0xff]   ;;  %v1919_v45 = vrot.slane %v3874_v55, 7  ;;  %v1927_v25 = vrot.slane %v3882_v8, 7  ;;  %v9442_v55 = vshll.u32 %v8687_v0, 16  ;;  %v2308_v0 = vld [vmem:[#allocation2 + $0x10] sm:$0xff] }
 0x13b   : > { %6910 = vmatprep.mubr.bf16.mxu1 %v1867_v41  ;;  %6943 = vmatpush3.bf16.msra.mxu1 %v7622_v20  ;;  %v9433_v20 = vshrl.u32 %v8648_v14, 16  ;;  %v1890_v63 = vor.u32 %v9434_v44, %v1887_v51  ;;  %v1911_v41 = vrot.slane %v9438_v27, 7  ;;  %v2348_v4 = vshrl.u32 %v2308_v0, 16 }
 0x13c   : > { %6944 = vmatprep.subr.bf16.mxu1 %v7624_v36  ;;  %v1903_v14 = vrot.slane %v9437_v60, 7 }
 0x13d   : > { %v1895_v29 = vrot.slane %v9433_v20, 7  ;;  %v2310_v20 = vld [vmem:[#allocation2 + $0x20] sm:$0xff] }
 0x13e   : > { %v2364_v44 = vshrl.u32 %v2310_v20, 16 }
 0x13f   : > { %6945 = vmatpush3.bf16.msra.mxu1 %v7624_v36  ;;  %v1898_v53 = vor.u32 %v9435_v5, %v1895_v29  ;;  %v9436_v36 = vrot.slane %v8631_v46, 1  ;;  %v7630_v46 = vld [vmem:[%s9379_s4 + $0x220] sm:$0xff]  }
 0x140   : > { %6946 = vmatprep.subr.bf16.mxu1 %v7626_v18 }
 0x141   : > { %7159 = vmatmul.mubr.bf16.vlgmr.msra.gmra.mrb[0].mxu0 %v4341_v43  ;;  %v4347_v26 = vsel %vm4336_vm3, %v4344_v16, %v9436_v36  ;;  %v1899_v23 = vsel %vm1807_vm4, %v1887_v51, %v1898_v53  ;;  %v1930_v43 = vor.u32 %v9442_v55, %v1927_v25  ;;  %v2307_v51 = vld [vmem:[#allocation2 + $0x8] sm:$0x80]  ;;  %v9082_v53 = vld [vmem:[#allocation2 + $0x30] sm:$0xff] }
 0x142   : > { %6911 = vmatmul.mubr.bf16.gmra.mrb[12].mxu1 %v1875_v52  ;;  %7162 = vmatprep.mubr.bf16.mxu0 %v4343_v33  ;;  %v9443_v52 = vshll.u32 %v8701_v31, 16  ;;  %v2351_v31 = vshll.u32 %v2308_v0, 16 }
 0x143   : > { %6914 = vmatprep.mubr.bf16.mxu1 %v1883_v56  ;;  %7195 = vmatpush3.bf16.msra.mxu0 %v8856_v62  ;;  %v1891_v62 = vsel %vm1807_vm4, %v1879_v57, %v1890_v63  ;;  %v1906_v57 = vor.u32 %v9439_v24, %v1903_v14  ;;  %v2309_v56 = vld [vmem:[#allocation2 + $0x18] sm:$0xff]  ;;  %v4370_v24 = vrot.slane %v8557_v7, 1  ;;  %v7637_v7 = vld [vmem:[%s9379_s4 + $0x110] sm:$0xff]  }
 0x144   : > { %7196 = vmatprep.subr.bf16.mxu0 %v7625_v48  ;;  %6947 = vmatpush3.bf16.msra.mxu1 %v7626_v18  ;;  %v1914_v18 = vor.u32 %v9440_v39, %v1911_v41  ;;  %v2359_v5 = vshll.u32 %v2309_v56, 16 }
 0x145   : > { %6948 = vmatprep.subr.bf16.mxu1 %v7628_v13  ;;  %v1907_v22 = vsel %vm1807_vm4, %v1895_v29, %v1906_v57  ;;  %v2356_v29 = vshrl.u32 %v2309_v56, 16  ;;  %v4725_v57 = vld [vmem:[#allocation2 + $0x18] sm:$0xfe] }
 0x146   : > { %v1915_v59 = vsel %vm1807_vm4, %v1903_v14, %v1914_v18 }
 0x147   : > { %7197 = vmatpush3.bf16.msra.mxu0 %v7625_v48  ;;  %v1935_v48 = vrot.slane %v3890_v38, 7  ;;  %v2358_v63 = vrot.slane %v2356_v29, 7 }
 0x148   : > { %7198 = vmatprep.subr.bf16.mxu0 %v7627_v3  ;;  %6949 = vmatpush3.bf16.msra.mxu1 %v7628_v13  ;;  %v2350_v13 = vrot.slane %v2348_v4, 7  ;;  %v9122_v4 = vld [vmem:[#allocation2 + $0x50] sm:$0xff] }
 0x149   : > { %7163 = vmatmul.mubr.bf16.gmra.mrb[4].mxu0 %v4345_v47  ;;  %7246 = vmatprep.subr.bf16.mxu1 %v9029_v11  ;;  %v1938_v33 = vor.u32 %v9443_v52, %v1935_v48  ;;  %v1947_v38 = vsel %vm1807_vm4, %v1935_v48, %v8871_v40  ;;  %v9080_v40 = vld [vmem:[#allocation2 + $0x28] sm:$0xff]  ;;  %v2367_v47 = vshll.u32 %v2310_v20, 16 }
 0x14a   : > { %6915 = vmatmul.mubr.bf16.gmra.mrb[16].mxu1 %v1891_v62  ;;  %7166 = vmatprep.mubr.bf16.mxu0 %v4347_v26  ;;  %v2372_v62 = vshrl.u32 %v9080_v40, 16  ;;  %v2375_v27 = vshll.u32 %v9080_v40, 16 }
 0x14b   : > { %6918 = vmatprep.mubr.bf16.mxu1 %v1899_v23  ;;  %7199 = vmatpush3.bf16.msra.mxu0 %v7627_v3  ;;  %v2353_v3 = vor.u32 %v2351_v31, %v2350_v13  ;;  %v9092_v23 = vld [vmem:[#allocation2 + $0x38] sm:$0xff]  ;;  %v2412_v31 = vshrl.u32 %v9122_v4, 16 }
 0x14c   : > { %7200 = vmatprep.subr.bf16.mxu0 %v7629_v37  ;;  %v2374_v60 = vrot.slane %v2372_v62, 7  ;;  %v2391_v0 = vshll.u32 %v9092_v23, 16 }
 0x14e   : > { %v2377_v39 = vor.u32 %v2375_v27, %v2374_v60 }
 0x14f   : > { %7201 = vmatpush3.bf16.msra.mxu0 %v7629_v37  ;;  %v2361_v37 = vor.u32 %v2359_v5, %v2358_v63 }
 0x150   : > { %7202 = vmatprep.subr.bf16.mxu0 %v7630_v46 }
 0x151   : > { %7167 = vmatmul.mubr.bf16.gmra.mrb[8].mxu0 %v8670_v21  ;;  %v9441_v21 = vshll.u32 %v8675_v6, 16  ;;  %v1931_v6 = vsel %vm1807_vm4, %v1919_v45, %v1930_v43  ;;  %v2362_v26 = vsel %vm1807_vm4, %v2350_v13, %v2361_v37  ;;  %v4773_v43 = vrot.slane %v2364_v44, 1 }
 0x152   : > { %6919 = vmatmul.mubr.bf16.gmra.mrb[20].mxu1 %v1907_v22  ;;  %7170 = vmatprep.mubr.bf16.mxu0 %v8679_v61  ;;  %v7633_v61 = vld [vmem:[%s9379_s4 + $0x238] sm:$0xff]   ;;  %v4299_v22 = vld [vmem:[#allocation2 + $0xa8] sm:$0x1] }
 0x153   : > { %6922 = vmatprep.mubr.bf16.mxu1 %v1915_v59  ;;  %7203 = vmatpush3.bf16.msra.mxu0 %v7630_v46  ;;  %v1922_v50 = vor.u32 %v9441_v21, %v1919_v45  ;;  %v2383_v46 = vshll.u32 %v9082_v53, 16  ;;  %v4763_v45 = vshrl.u32 %v4725_v57, 16  ;;  %v4766_v59 = vshll.u32 %v4725_v57, 16 }
 0x154   : > { %7204 = vmatprep.subr.bf16.mxu0 %v7631_v35 }
 0x155   : > { %v1923_v8 = vsel %vm1807_vm4, %v1911_v41, %v1922_v50  ;;  %v9096_v41 = vld [vmem:[#allocation2 + $0x40] sm:$0xff]  ;;  %v4765_v52 = vrot.slane %v4763_v45, 1  ;;  %v4794_v5 = vrot.slane %v2383_v46, 2 }
 0x157   : > { %7205 = vmatpush3.bf16.msra.mxu0 %v7631_v35  ;;  %v2396_v35 = vshrl.u32 %v9096_v41, 16 }
 0x158   : > { %7206 = vmatprep.subr.bf16.mxu0 %v7632_v49 }
 0x159   : > { %7171 = vmatmul.mubr.bf16.gmra.mrb[12].mxu0 %v8691_v58  ;;  %v1939_v58 = vsel %vm1807_vm4, %v1927_v25, %v1938_v33  ;;  %v9444_v25 = vrot.slane %v8652_v15, 1  ;;  %v2398_v48 = vrot.slane %v2396_v35, 7  ;;  %v4768_v33 = vrot.slane %v4766_v59, 2 }
 0x15a   : > { %6923 = vmatmul.mubr.bf16.gmra.mrb[24].mxu1 %v1923_v8  ;;  %7174 = vmatprep.mubr.bf16.mxu0 %v8694_v12  ;;  %v2344_v12 = vshrl.u32 %v2307_v51, 16  ;;  %v9116_v8 = vld [vmem:[#allocation2 + $0x48] sm:$0xff]  ;;  %v2399_v51 = vshll.u32 %v9096_v41, 16  ;;  %v4809_v59 = vrot.slane %v2396_v35, 1  ;;  %v7642_v35 = vld [vmem:[%s9379_s4 + $0x138] sm:$0xff]  }
 0x15b   : > { %6926 = vmatprep.mubr.bf16.mxu1 %v1931_v6  ;;  %7207 = vmatpush3.bf16.msra.mxu0 %v7632_v49  ;;  %v4372_v6 = vrot.slane %v4299_v22, 1  ;;  %v4769_v29 = vor.u32 %v4768_v33, %v4765_v52  ;;  %v2407_v37 = vshll.u32 %v9116_v8, 16 }
 0x15c   : > { %7208 = vmatprep.subr.bf16.mxu0 %v7633_v61  ;;  %v2346_v16 = vrot.slane %v2344_v12, 7  ;;  %v2401_v56 = vor.u32 %v2399_v51, %v2398_v48 }
 0x15d   : > { %v4373_v20 = vsel %vm4336_vm3, %v4370_v24, %v4372_v6  ;;  %v4821_v33 = vrot.slane %v2407_v37, 2 }
 0x15f   : > { %7209 = vmatpush3.bf16.msra.mxu0 %v7633_v61  ;;  %v4776_v61 = vrot.slane %v2367_v47, 2 }
 0x161   : > { %7175 = vmatmul.mubr.bf16.gmra.mrb[16].mxu0 %v8710_v2  ;;  %v2354_v2 = vsel %vm1807_vm4, %v2346_v16, %v2353_v3  ;;  %v4777_v13 = vor.u32 %v4776_v61, %v4773_v43  ;;  %v4782_v3 = vrot.slane %v2372_v62, 1  ;;  %v2414_v62 = vrot.slane %v2412_v31, 7 }
 0x162   : > { %6927 = vmatmul.mubr.bf16.gmra.mrb[28].mxu1 %v1939_v58  ;;  %7178 = vmatprep.mubr.bf16.mxu0 %v8720_v9  ;;  %v2366_v9 = vrot.slane %v2364_v44, 7  ;;  %v2404_v58 = vshrl.u32 %v9116_v8, 16  ;;  %v4785_v44 = vrot.slane %v2375_v27, 2 }
 0x163   : > { %6930 = vmatprep.mubr.bf16.mxu1 %v1947_v38  ;;  %v7638_v38 = vld [vmem:[%s9379_s4 + $0x118] sm:$0xff]  }
 0x164   : > { %v2369_v36 = vor.u32 %v2367_v47, %v2366_v9  ;;  %v2378_v50 = vsel %vm1807_vm4, %v2366_v9, %v2377_v39  ;;  %v2406_v16 = vrot.slane %v2404_v58, 7  ;;  %v4778_v9 = vsel %vm4761_vm5, %v4769_v29, %v4777_v13 }
 0x165   : > { %v4803_v39 = vrot.slane %v2391_v0, 2  ;;  %v4818_v52 = vrot.slane %v2404_v58, 1 }
 0x169   : > { %7179 = vmatmul.mubr.bf16.gmra.mrb[20].mxu0 %v8736_v17  ;;  %v2380_v17 = vshrl.u32 %v9082_v53, 16  ;;  %v2415_v53 = vshll.u32 %v9122_v4, 16 }
 0x16a   : > { %6931 = vmatmul.mubr.bf16.gmra.mrb[32].mxu1 %v8745_v28  ;;  %7182 = vmatprep.mubr.bf16.mxu0 %v8748_v10  ;;  %v2370_v10 = vsel %vm1807_vm4, %v2358_v63, %v2369_v36  ;;  %v7639_v63 = vld [vmem:[%s9379_s4 + $0x120] sm:$0xff]   ;;  %v9144_v36 = vld [vmem:[#allocation2 + $0x58] sm:$0xff] }
 0x16b   : > { %6950 = vmatprep.mubr.bf16.mxu1 %v2354_v2  ;;  %v2382_v14 = vrot.slane %v2380_v17, 7  ;;  %v4791_v40 = vrot.slane %v2380_v17, 1  ;;  %v4786_v17 = vor.u32 %v4785_v44, %v4782_v3  ;;  %v2420_v27 = vshrl.u32 %v9144_v36, 16 }
 0x16c   : > { %v4822_v3 = vor.u32 %v4821_v33, %v4818_v52 }
 0x16d   : > { %v2385_v18 = vor.u32 %v2383_v46, %v2382_v14  ;;  %v2422_v45 = vrot.slane %v2420_v27, 7 }
 0x16f   : > { %v2386_v15 = vsel %vm1807_vm4, %v2374_v60, %v2385_v18  ;;  %v2409_v60 = vor.u32 %v2407_v37, %v2406_v16  ;;  %v7641_v18 = vld [vmem:[%s9379_s4 + $0x130] sm:$0xff]  }
 0x171   : > { %7183 = vmatmul.mubr.bf16.gmra.mrb[24].mxu0 %v8762_v42  ;;  %v7636_v42 = vld [vmem:[%s9379_s4 + $0x108] sm:$0xff]  }
 0x172   : > { %6951 = vmatmul.mubr.bf16.vlgmr.msra.gmra.mrb[0].mxu1 %v2362_v26  ;;  %7186 = vmatprep.mubr.bf16.mxu0 %v8771_v19  ;;  %v4368_v19 = vrot.slane %v8864_v32, 1  ;;  %v9146_v26 = vld [vmem:[#allocation2 + $0x60] sm:$0xff] }
 0x173   : > { %7254 = vmatpush3.bf16.msra.mxu1 %v9029_v11  ;;  %6954 = vmatprep.mubr.bf16.mxu1 %v2370_v10  ;;  %v2388_v11 = vshrl.u32 %v9092_v23, 16  ;;  %v7640_v10 = vld [vmem:[%s9379_s4 + $0x128] sm:$0xff]   ;;  %v2428_v46 = vshrl.u32 %v9146_v26, 16 }
 0x174   : > { %7247 = vmatprep.subr.bf16.mxu1 %v7636_v42  ;;  %v4369_v49 = vsel %vm4336_vm3, %v9444_v25, %v4368_v19  ;;  %v4371_v21 = vsel %vm4336_vm3, %v4368_v19, %v4370_v24  ;;  %v2410_v19 = vsel %vm1807_vm4, %v2398_v48, %v2409_v60  ;;  %v4787_v24 = vsel %vm4761_vm5, %v4777_v13, %v4786_v17 }
 0x175   : > { %v2390_v55 = vrot.slane %v2388_v11, 7  ;;  %v4800_v57 = vrot.slane %v2388_v11, 1  ;;  %v4812_v25 = vrot.slane %v2399_v51, 2  ;;  %v2430_v11 = vrot.slane %v2428_v46, 7 }
 0x176   : > { %v4830_v13 = vrot.slane %v2415_v53, 2 }
 0x177   : > { %7255 = vmatpush3.bf16.msra.mxu1 %v7636_v42  ;;  %v2393_v12 = vor.u32 %v2391_v0, %v2390_v55  ;;  %v2402_v47 = vsel %vm1807_vm4, %v2390_v55, %v2401_v56  ;;  %v2417_v42 = vor.u32 %v2415_v53, %v2414_v62  ;;  %v4804_v55 = vor.u32 %v4803_v39, %v4800_v57 }
 0x178   : > { %7248 = vmatprep.subr.bf16.mxu1 %v7637_v7  ;;  %v4813_v61 = vor.u32 %v4812_v25, %v4809_v59 }
 0x179   : > { %7187 = vmatmul.mubr.bf16.gmra.mrb[28].mxu0 %v4369_v49  ;;  %v2394_v2 = vsel %vm1807_vm4, %v2382_v14, %v2393_v12  ;;  %v4795_v14 = vor.u32 %v4794_v5, %v4791_v40  ;;  %v9164_v49 = vld [vmem:[#allocation2 + $0x68] sm:$0xff]  ;;  %v2418_v23 = vsel %vm1807_vm4, %v2406_v16, %v2417_v42  ;;  %v4827_v12 = vrot.slane %v2412_v31, 1  ;;  %v9185_v16 = vld [vmem:[#allocation2 + $0x78] sm:$0xff] }
 0x17a   : > { %6955 = vmatmul.mubr.bf16.gmra.mrb[4].mxu1 %v2378_v50  ;;  %7190 = vmatprep.mubr.bf16.mxu0 %v4371_v21  ;;  %v2423_v21 = vshll.u32 %v9144_v36, 16  ;;  %v2431_v50 = vshll.u32 %v9146_v26, 16  ;;  %v2436_v41 = vshrl.u32 %v9164_v49, 16  ;;  %v4836_v40 = vrot.slane %v2420_v27, 1 }
 0x17b   : > { %6958 = vmatprep.mubr.bf16.mxu1 %v2386_v15  ;;  %7256 = vmatpush3.bf16.msra.mxu1 %v7637_v7  ;;  %v4796_v22 = vsel %vm4761_vm5, %v4786_v17, %v4795_v14  ;;  %v9168_v7 = vld [vmem:[#allocation2 + $0x70] sm:$0xff]  ;;  %v4805_v6 = vsel %vm4761_vm5, %v4795_v14, %v4804_v55  ;;  %v4831_v44 = vor.u32 %v4830_v13, %v4827_v12  ;;  %v2455_v17 = vshll.u32 %v9185_v16, 16 }
 0x17c   : > { %7249 = vmatprep.subr.bf16.mxu1 %v7638_v38  ;;  %v2425_v43 = vor.u32 %v2423_v21, %v2422_v45  ;;  %v2433_v15 = vor.u32 %v2431_v50, %v2430_v11  ;;  %v2444_v48 = vshrl.u32 %v9168_v7, 16  ;;  %v2438_v0 = vrot.slane %v2436_v41, 7 }
 0x17d   : > { %v2447_v58 = vshll.u32 %v9168_v7, 16  ;;  %v4839_v5 = vrot.slane %v2423_v21, 2  ;;  %v4848_v60 = vrot.slane %v2431_v50, 2  ;;  %v4854_v57 = vrot.slane %v2436_v41, 1 }
 0x17e   : > { %v2426_v51 = vsel %vm1807_vm4, %v2414_v62, %v2425_v43  ;;  %v2434_v56 = vsel %vm1807_vm4, %v2422_v45, %v2433_v15  ;;  %v2446_v29 = vrot.slane %v2444_v48, 7  ;;  %v4845_v62 = vrot.slane %v2428_v46, 1  ;;  %v4739_v43 = vld [vmem:[#allocation2 + $0x88] sm:$0xff] }
 0x17f   : > { %7257 = vmatpush3.bf16.msra.mxu1 %v7638_v38  ;;  %v4814_v38 = vsel %vm4761_vm5, %v4804_v55, %v4813_v61  ;;  %v4840_v14 = vor.u32 %v4839_v5, %v4836_v40  ;;  %v4866_v45 = vrot.slane %v2447_v58, 2  ;;  %v4875_v21 = vrot.slane %v2455_v17, 2 }
 0x180   : > { %7250 = vmatprep.subr.bf16.mxu1 %v7639_v63  ;;  %v9445_v55 = vshrl.u32 %v8836_v1, 16 }
 0x181   : > { %7191 = vmatmul.mubr.bf16.gmra.mrb[32].mxu0 %v4373_v20  ;;  %v2439_v20 = vshll.u32 %v9164_v49, 16 }
 0x182   : > { %6959 = vmatmul.mubr.bf16.gmra.mrb[8].mxu1 %v2394_v2  ;;  %7210 = vmatprep.mubr.bf16.mxu0 %v4778_v9  ;;  %v2449_v2 = vor.u32 %v2447_v58, %v2446_v29  ;;  %v4823_v9 = vsel %vm4761_vm5, %v4813_v61, %v4822_v3  ;;  %v4881_v41 = vrot.slane %v9445_v55, 1  ;;  %v4740_v61 = vld [vmem:[#allocation2 + $0x90] sm:$0xff] }
 0x183   : > { %6962 = vmatprep.mubr.bf16.mxu1 %v2402_v47  ;;  %7258 = vmatpush3.bf16.msra.mxu1 %v7639_v63  ;;  %v2441_v8 = vor.u32 %v2439_v20, %v2438_v0  ;;  %v2452_v63 = vshrl.u32 %v9185_v16, 16  ;;  %v4832_v47 = vsel %vm4761_vm5, %v4822_v3, %v4831_v44  ;;  %v4857_v39 = vrot.slane %v2439_v20, 2  ;;  %v4743_v3 = vld [vmem:[#allocation2 + $0xa8] sm:$0x3] }
 0x184   : > { %7251 = vmatprep.subr.bf16.mxu1 %v7640_v10  ;;  %v2450_v53 = vsel %vm1807_vm4, %v2438_v0, %v2449_v2  ;;  %v4897_v52 = vshrl.u32 %v4740_v61, 16  ;;  %v4900_v33 = vshll.u32 %v4740_v61, 16 }
 0x185   : > { %v2442_v31 = vsel %vm1807_vm4, %v2430_v11, %v2441_v8  ;;  %v2454_v37 = vrot.slane %v2452_v63, 7  ;;  %v4858_v25 = vor.u32 %v4857_v39, %v4854_v57  ;;  %v4872_v11 = vrot.slane %v2452_v63, 1 }
 0x186   : > { %v4902_v20 = vrot.slane %v4900_v33, 2  ;;  %v9446_v63 = vshrl.u32 %v8864_v32, 16 }
 0x187   : > { %7259 = vmatpush3.bf16.msra.mxu1 %v7640_v10  ;;  %v2463_v10 = vshll.u32 %v8836_v1, 16  ;;  %v2457_v42 = vor.u32 %v2455_v17, %v2454_v37  ;;  %v4876_v15 = vor.u32 %v4875_v21, %v4872_v11 }
 0x188   : > { %7252 = vmatprep.subr.bf16.mxu1 %v7641_v18  ;;  %v4908_v2 = vrot.slane %v9446_v63, 1 }
 0x189   : > { %7211 = vmatmul.mubr.bf16.vlgmr.msra.gmra.mrb[0].mxu0 %v4787_v24  ;;  %v2465_v27 = vor.u32 %v2463_v10, %v8868_v54  ;;  %v4841_v24 = vsel %vm4761_vm5, %v4831_v44, %v4840_v14  ;;  %v2458_v46 = vsel %vm1807_vm4, %v2446_v29, %v2457_v42  ;;  %v7643_v29 = vld [vmem:[#allocation2] sm:$0xff] }
 0x18a   : > { %6963 = vmatmul.mubr.bf16.gmra.mrb[12].mxu1 %v2410_v19  ;;  %7214 = vmatprep.mubr.bf16.mxu0 %v4796_v22  ;;  %v4849_v19 = vor.u32 %v4848_v60, %v4845_v62  ;;  %v4863_v22 = vrot.slane %v2444_v48, 1  ;;  %v4888_v48 = vshrl.u32 %v4739_v43, 16  ;;  %v4915_v8 = vshrl.u32 %v7643_v29, 16 }
 0x18b   : > { %6966 = vmatprep.mubr.bf16.mxu1 %v2418_v23  ;;  %7260 = vmatpush3.bf16.msra.mxu1 %v7641_v18  ;;  %v2466_v59 = vsel %vm1807_vm4, %v2454_v37, %v2465_v27  ;;  %v4918_v58 = vshll.u32 %v7643_v29, 16 }
 0x18c   : > { %7253 = vmatprep.subr.bf16.mxu1 %v7642_v35  ;;  %v4850_v18 = vsel %vm4761_vm5, %v4840_v14, %v4849_v19  ;;  %v4867_v23 = vor.u32 %v4866_v45, %v4863_v22  ;;  %v4859_v54 = vsel %vm4761_vm5, %v4849_v19, %v4858_v25  ;;  %v4917_v40 = vrot.slane %v4915_v8, 1  ;;  %v5622_v22 = vpop.permute.xlu1 %5621 }
 0x18d   : > { %v4920_v5 = vrot.slane %v4918_v58, 2 }
 0x18e   : > { %v4868_v50 = vsel %vm4761_vm5, %v4858_v25, %v4867_v23 }
 0x18f   : > { %7261 = vmatpush3.bf16.msra.mxu1 %v7642_v35  ;;  %v4884_v35 = vrot.slane %v2463_v10, 2  ;;  %v4921_v62 = vor.u32 %v4920_v5, %v4917_v40 }
 0x191   : > { %7215 = vmatmul.mubr.bf16.gmra.mrb[4].mxu0 %v4805_v6  ;;  %v4891_v6 = vshll.u32 %v4739_v43, 16  ;;  %v4885_v0 = vor.u32 %v4884_v35, %v4881_v41 }
 0x192   : > { %6967 = vmatmul.mubr.bf16.gmra.mrb[16].mxu1 %v2426_v51  ;;  %7218 = vmatprep.mubr.bf16.mxu0 %v4814_v38  ;;  %v4877_v51 = vsel %vm4761_vm5, %v4867_v23, %v4876_v15  ;;  %v4890_v38 = vrot.slane %v4888_v48, 1 }
 0x193   : > { %6970 = vmatprep.mubr.bf16.mxu1 %v2434_v56  ;;  %v4893_v12 = vrot.slane %v4891_v6, 2  ;;  %v4886_v13 = vsel %vm4761_vm5, %v4876_v15, %v4885_v0  ;;  %v4899_v56 = vrot.slane %v4897_v52, 1  ;;  %v5632_v6 = vpop.permute.xlu1 %5631 }
 0x199   : > { %7219 = vmatmul.mubr.bf16.gmra.mrb[8].mxu0 %v4823_v9 }
 0x19a   : > { %6971 = vmatmul.mubr.bf16.gmra.mrb[20].mxu1 %v2442_v31  ;;  %7222 = vmatprep.mubr.bf16.mxu0 %v4832_v47  ;;  %v9447_v31 = vshll.u32 %v8864_v32, 16  ;;  %v4927_v47 = vshll.u32 %v4743_v3, 16 }
 0x19b   : > { %6974 = vmatprep.mubr.bf16.mxu1 %v2450_v53 }
 0x19c   : > { %v4911_v9 = vrot.slane %v9447_v31, 2  ;;  %v4929_v53 = vrot.slane %v4927_v47, 2 }
 0x19e   : > { %v4912_v37 = vor.u32 %v4911_v9, %v4908_v2 }
 0x1a0   : > { %v4922_v10 = vsel %vm4761_vm5, %v4912_v37, %v4921_v62 }
 0x1a1   : > { %7223 = vmatmul.mubr.bf16.gmra.mrb[12].mxu0 %v4841_v24 }
 0x1a2   : > { %6975 = vmatmul.mubr.bf16.gmra.mrb[24].mxu1 %v2458_v46  ;;  %7226 = vmatprep.mubr.bf16.mxu0 %v4850_v18  ;;  %v5617_v46 = vpop.permute.xlu0 %5616 }
 0x1a3   : > { %6978 = vmatprep.mubr.bf16.mxu1 %v2466_v59  ;;  %v9237_v59 = vld [vmem:[%s9380_s5] ss:$0 sm:$0xff] }
 0x1a6   : > { %v5627_v45 = vpop.permute.xlu0 %5626 }
 0x1a9   : > { %7227 = vmatmul.mubr.bf16.gmra.mrb[16].mxu0 %v4859_v54 }
 0x1aa   : > { %6979 = vmatmul.mubr.bf16.gmra.mrb[28].mxu1 %v8881_v34  ;;  %7230 = vmatprep.mubr.bf16.mxu0 %v4868_v50  ;;  %v4903_v34 = vor.u32 %v4902_v20, %v4899_v56  ;;  %v9250_v52 = vpop.permute.xlu0 %5636 }
 0x1ab   : > { %6982 = vmatprep.mubr.bf16.mxu1 %v8745_v28  ;;  %v4894_v28 = vor.u32 %v4893_v12, %v4890_v38 }
 0x1ac   : > { %v4913_v17 = vsel %vm4761_vm5, %v4903_v34, %v4912_v37 }
 0x1ad   : > { %v4895_v44 = vsel %vm4761_vm5, %v4885_v0, %v4894_v28 }
 0x1b1   : > { %7231 = vmatmul.mubr.bf16.gmra.mrb[20].mxu0 %v4877_v51 }
 0x1b2   : > { %6983 = vmatmul.mubr.bf16.gmra.mrb[32].mxu1 %v8909_v30  ;;  %7234 = vmatprep.mubr.bf16.mxu0 %v4886_v13  ;;  %v4904_v30 = vsel %vm4761_vm5, %v4894_v28, %v4903_v34 }
 0x1b3   : > { %7018 = vmatprep.mubr.bf16.mxu1 %v9122_v4  ;;  %v4924_v4 = vshrl.u32 %v4743_v3, 16  ;;  %v5642_v3 = vpop.permute.xlu1 %5641 }
 0x1b5   : > { %v4926_v60 = vrot.slane %v4924_v4, 1 }
 0x1b7   : > { %v4930_v14 = vor.u32 %v4929_v53, %v4926_v60 }
 0x1b9   : > { %7235 = vmatmul.mubr.bf16.gmra.mrb[24].mxu0 %v4895_v44 }
 0x1ba   : > { %7019 = vmatmul.mubr.bf16.vlgmr.msra.gmra.mrb[16].mxu1 %v9144_v36  ;;  %7238 = vmatprep.mubr.bf16.mxu0 %v4904_v30  ;;  %v4931_v36 = vsel %vm4761_vm5, %v4921_v62, %v4930_v14  ;;  %v5647_v30 = vpop.permute.xlu0 %5646 }
 0x1bb   : > { %7022 = vmatprep.mubr.bf16.mxu1 %v9146_v26 }
 0x1c1   : > { %7239 = vmatmul.mubr.bf16.gmra.mrb[28].mxu0 %v4913_v17 }
 0x1c2   : > { %7023 = vmatmul.mubr.bf16.gmra.mrb[20].mxu1 %v9164_v49  ;;  %7242 = vmatprep.mubr.bf16.mxu0 %v4922_v10 }
 0x1c3   : > { %7026 = vmatprep.mubr.bf16.mxu1 %v9168_v7 }
 0x1c9   : > { %7243 = vmatmul.mubr.bf16.gmra.mrb[32].mxu0 %v4931_v36 }
 0x1ca   : > { %7027 = vmatmul.mubr.bf16.gmra.mrb[24].mxu1 %v9185_v16 }
 0x1cb   : > { %7030 = vmatprep.mubr.bf16.mxu1 %v8836_v1 }
 0x1d2   : > { %7031 = vmatmul.mubr.bf16.gmra.mrb[28].mxu1 %v4739_v43 }
 0x1d3   : > { %7034 = vmatprep.mubr.bf16.mxu1 %v4740_v61 }
 0x1da   : > { %7035 = vmatmul.mubr.bf16.gmra.mrb[32].mxu1 %v8864_v32 }
 0x245   : > { %v6952_v26 = vpop.f32.mrb[0].mxu1 }
 0x246   : > { %v2591_v42 = vpop.f32.mrb[1].mxu1 }
 0x247   : > { %v6953_v19 = vpop.f32.mrb[2].mxu1 }
 0x248   : > { %v2594_v27 = vpop.f32.mrb[3].mxu1 }
 0x24d   : > { %v6956_v49 = vpop.f32.mrb[4].mxu1 }
 0x24e   : > { %v2607_v24 = vpop.f32.mrb[5].mxu1 }
 0x24f   : > { %v6957_v57 = vpop.f32.mrb[6].mxu1 }
 0x250   : > { %v2610_v39 = vpop.f32.mrb[7].mxu1 }
 0x255   : > { %v9226_v7 = vpop.f32.mrb[8].mxu1 }
 0x256   : > { %v9228_v18 = vpop.f32.mrb[9].mxu1 }
 0x257   : > { %v9230_v16 = vpop.f32.mrb[10].mxu1 }
 0x258   : > { %v9232_v1 = vpop.f32.mrb[11].mxu1 }
 0x25c   : > { %v7212_v32 = vpop.f32.mrb[0].mxu0 }
 0x25d   : > { %v9239_v25 = vpop.f32.mrb[12].mxu1  ;;  %v7262_v23 = vadd.f32 %v7212_v32, %v6952_v26  ;;  %v5032_v54 = vpop.f32.mrb[1].mxu0 }
 0x25e   : > { %v9241_v11 = vpop.f32.mrb[13].mxu1  ;;  %v7263_v21 = vadd.f32 %v5032_v54, %v2591_v42  ;;  %v7213_v50 = vpop.f32.mrb[2].mxu0 }
 0x25f   : > { %v9243_v55 = vpop.f32.mrb[14].mxu1  ;;  %v5292_v41 = vadd.f32 %v7262_v23, %v9237_v59  ;;  %v7264_v35 = vadd.f32 %v7213_v50, %v6953_v19  ;;  %v5035_v43 = vpop.f32.mrb[3].mxu0 }
 0x260   : > { %v9246_v61 = vpop.f32.mrb[15].mxu1  ;;  %v5290_v15 = vadd.f32 %v7263_v21, %v9237_v59  ;;  %v7265_v48 = vadd.f32 %v5035_v43, %v2594_v27 }
 0x261   : > { %v5293_v0 = vadd.f32 %v7264_v35, %v9237_v59  ;;  %v5328_v51 = vmax.f32 %v5292_v41, 0.0 }
 0x262   : > { %v5291_v33 = vadd.f32 %v7265_v48, %v9237_v59  ;;  %v5326_v12 = vmax.f32 %v5290_v15, 0.0 }
 0x263   : > { %v5329_v38 = vmax.f32 %v5293_v0, 0.0 }
 0x264   : > { %v5327_v13 = vmax.f32 %v5291_v33, 0.0  ;;  %v7216_v56 = vpop.f32.mrb[4].mxu0 }
 0x265   : > { %v5363_v20 = vpack.c.bf16 %v5329_v38, %v5328_v51  ;;  %v7266_v28 = vadd.f32 %v7216_v56, %v6956_v49  ;;  %v5048_v34 = vpop.f32.mrb[5].mxu0 }
 0x266   : > { %v5362_v29 = vpack.c.bf16 %v5327_v13, %v5326_v12  ;;  %v7267_v8 = vadd.f32 %v5048_v34, %v2607_v24  ;;  %v7217_v58 = vpop.f32.mrb[6].mxu0 }
 0x267   : > { %6527 = vst [vmem:[%s9258_s21 + $0x8] sm:$0xff] %v5363_v20   ;;  %v5544_v44 = vunpack.c.l.bf16 %v5363_v20  ;;  %v5545_v63 = vunpack.c.h.bf16 %v5363_v20  ;;  %v5296_v2 = vadd.f32 %v7266_v28, %v9237_v59  ;;  %v7268_v31 = vadd.f32 %v7217_v58, %v6957_v57  ;;  %v5051_v9 = vpop.f32.mrb[7].mxu0  ;;  %v5652_v57 = vpop.permute.xlu1 %5651 }
 0x268   : > { %6424 = vst [vmem:[%s9258_s21] sm:$0xff] %v5362_v29   ;;  %v5542_v40 = vunpack.c.l.bf16 %v5362_v29  ;;  %v5543_v5 = vunpack.c.h.bf16 %v5362_v29  ;;  %v5294_v4 = vadd.f32 %v7267_v8, %v9237_v59  ;;  %v7269_v47 = vadd.f32 %v5051_v9, %v2610_v39 }
 0x269   : > { %v5796_v37 = vmul.f32 %v5627_v45, %v5544_v44  ;;  %v5297_v62 = vadd.f32 %v7268_v31, %v9237_v59  ;;  %v5797_v10 = vmul.f32 %v5632_v6, %v5545_v63  ;;  %v5332_v14 = vmax.f32 %v5296_v2, 0.0 }
 0x26a   : > { %v5794_v60 = vmul.f32 %v5617_v46, %v5542_v40  ;;  %v5795_v53 = vmul.f32 %v5622_v22, %v5543_v5  ;;  %v5295_v17 = vadd.f32 %v7269_v47, %v9237_v59  ;;  %v5330_v36 = vmax.f32 %v5294_v4, 0.0  ;;  %v9267_v22 = vpop.permute.xlu0 %5656 }
 0x26b   : > { %v5333_v26 = vmax.f32 %v5297_v62, 0.0  ;;  %v5874_v32 = vmul.f32 %v5796_v37, %v5796_v37  ;;  %v5875_v35 = vmul.f32 %v5797_v10, %v5797_v10  ;;  %v5662_v20 = vpop.permute.xlu1 %5661 }
 0x26c   : > { %v5830_v42 = vadd.f32 %v5795_v53, %v5794_v60  ;;  %v5872_v19 = vmul.f32 %v5794_v60, %v5794_v60  ;;  %v5873_v27 = vmul.f32 %v5795_v53, %v5795_v53  ;;  %v5331_v49 = vmax.f32 %v5295_v17, 0.0  ;;  %v7220_v24 = vpop.f32.mrb[8].mxu0 }
 0x26d   : > { %v5365_v39 = vpack.c.bf16 %v5333_v26, %v5332_v14  ;;  %v7270_v45 = vadd.f32 %v7220_v24, %v9226_v7  ;;  %v5064_v46 = vpop.f32.mrb[9].mxu0 }
 0x26e   : > { %v5831_v23 = vadd.f32 %v5830_v42, %v5796_v37  ;;  %v5908_v54 = vadd.f32 %v5873_v27, %v5872_v19  ;;  %v5364_v21 = vpack.c.bf16 %v5331_v49, %v5330_v36  ;;  %v7271_v50 = vadd.f32 %v5064_v46, %v9228_v18  ;;  %v7221_v41 = vpop.f32.mrb[10].mxu0 }
 0x26f   : > { %6529 = vst [vmem:[%s9258_s21 + $0x18] sm:$0xff] %v5365_v39   ;;  %v5548_v43 = vunpack.c.l.bf16 %v5365_v39  ;;  %v5300_v15 = vadd.f32 %v7270_v45, %v9237_v59  ;;  %v7272_v48 = vadd.f32 %v7221_v41, %v9230_v16  ;;  %v5067_v6 = vpop.f32.mrb[11].mxu0  ;;  %v5549_v38 = vunpack.c.h.bf16 %v5365_v39  ;;  %v5667_v16 = vpop.permute.xlu0 %5666 }
 0x270   : > { %v5909_v0 = vadd.f32 %v5908_v54, %v5874_v32  ;;  %6528 = vst [vmem:[%s9258_s21 + $0x10] sm:$0xff] %v5364_v21   ;;  %v5546_v7 = vunpack.c.l.bf16 %v5364_v21  ;;  %v5547_v33 = vunpack.c.h.bf16 %v5364_v21  ;;  %v5832_v51 = vadd.f32 %v5831_v23, %v5797_v10 }
 0x271   : > { %v5301_v18 = vadd.f32 %v7272_v48, %v9237_v59  ;;  %v5800_v28 = vmul.f32 %v5647_v30, %v5548_v43  ;;  %v5298_v34 = vadd.f32 %v7271_v50, %v9237_v59  ;;  %v7273_v29 = vadd.f32 %v5067_v6, %v9232_v1 }
 0x272   : > { %v5798_v12 = vmul.f32 %v9250_v52, %v5546_v7  ;;  %v5799_v13 = vmul.f32 %v5642_v3, %v5547_v33  ;;  %v5910_v56 = vadd.f32 %v5909_v0, %v5875_v35  ;;  %v5336_v44 = vmax.f32 %v5300_v15, 0.0 }
 0x273   : > { %v5337_v63 = vmax.f32 %v5301_v18, 0.0  ;;  %v5801_v31 = vmul.f32 %v5652_v57, %v5549_v38  ;;  %v5299_v52 = vadd.f32 %v7273_v29, %v9237_v59  ;;  %v5334_v37 = vmax.f32 %v5298_v34, 0.0  ;;  %v5677_v19 = vpop.permute.xlu0 %5676 }
 0x274   : > { %v5833_v8 = vadd.f32 %v5832_v51, %v5798_v12  ;;  %v5876_v58 = vmul.f32 %v5798_v12, %v5798_v12  ;;  %v7224_v2 = vpop.f32.mrb[12].mxu0  ;;  %v5877_v9 = vmul.f32 %v5799_v13, %v5799_v13  ;;  %v5878_v10 = vmul.f32 %v5800_v28, %v5800_v28 }
 0x275   : > { %v7274_v3 = vadd.f32 %v7224_v2, %v9239_v25  ;;  %v5080_v40 = vpop.f32.mrb[13].mxu0  ;;  %v5367_v4 = vpack.c.bf16 %v5337_v63, %v5336_v44  ;;  %v5335_v62 = vmax.f32 %v5299_v52, 0.0  ;;  %v5672_v25 = vpop.permute.xlu1 %5671  ;;  %v5879_v27 = vmul.f32 %v5801_v31, %v5801_v31 }
 0x276   : > { %v5834_v5 = vadd.f32 %v5833_v8, %v5799_v13  ;;  %v5911_v30 = vadd.f32 %v5910_v56, %v5876_v58  ;;  %v7275_v47 = vadd.f32 %v5080_v40, %v9241_v11  ;;  %v7225_v1 = vpop.f32.mrb[14].mxu0 }
 0x277   : > { %v5304_v60 = vadd.f32 %v7274_v3, %v9237_v59  ;;  %v7276_v53 = vadd.f32 %v7225_v1, %v9243_v55  ;;  %v5083_v17 = vpop.f32.mrb[15].mxu0  ;;  %6531 = vst [vmem:[%s9258_s21 + $0x28] sm:$0xff] %v5367_v4   ;;  %v5366_v26 = vpack.c.bf16 %v5335_v62, %v5334_v37  ;;  %v5552_v49 = vunpack.c.l.bf16 %v5367_v4  ;;  %v5687_v38 = vpop.permute.xlu0 %5686 }
 0x278   : > { %v5835_v14 = vadd.f32 %v5834_v5, %v5800_v28  ;;  %v5912_v36 = vadd.f32 %v5911_v30, %v5877_v9  ;;  %v5302_v46 = vadd.f32 %v7275_v47, %v9237_v59  ;;  %v7277_v23 = vadd.f32 %v5083_v17, %v9246_v61 }
 0x279   : > { %v5305_v42 = vadd.f32 %v7276_v53, %v9237_v59  ;;  %6530 = vst [vmem:[%s9258_s21 + $0x20] sm:$0xff] %v5366_v26   ;;  %v5550_v57 = vunpack.c.l.bf16 %v5366_v26  ;;  %v5551_v32 = vunpack.c.h.bf16 %v5366_v26  ;;  %v5340_v39 = vmax.f32 %v5304_v60, 0.0  ;;  %v5682_v6 = vpop.permute.xlu1 %5681 }
 0x27a   : > { %v5913_v11 = vadd.f32 %v5912_v36, %v5878_v10  ;;  %v5836_v24 = vadd.f32 %v5835_v14, %v5801_v31  ;;  %v5553_v21 = vunpack.c.h.bf16 %v5367_v4  ;;  %v5303_v15 = vadd.f32 %v7277_v23, %v9237_v59 }
 0x27b   : > { %v5341_v45 = vmax.f32 %v5305_v42, 0.0  ;;  %v5802_v50 = vmul.f32 %v9267_v22, %v5550_v57  ;;  %v5803_v41 = vmul.f32 %v5662_v20, %v5551_v32  ;;  %v5804_v0 = vmul.f32 %v5667_v16, %v5552_v49  ;;  %v9292_v3 = vpop.permute.xlu0 %5696 }
 0x27c   : > { %v5914_v55 = vadd.f32 %v5913_v11, %v5879_v27  ;;  %v7228_v54 = vpop.f32.mrb[16].mxu0  ;;  %v5338_v12 = vmax.f32 %v5302_v46, 0.0  ;;  %v5339_v61 = vmax.f32 %v5303_v15, 0.0  ;;  %v5805_v13 = vmul.f32 %v5672_v25, %v5553_v21 }
 0x27d   : > { %v5369_v35 = vpack.c.bf16 %v5341_v45, %v5340_v39  ;;  %v5096_v43 = vpop.f32.mrb[17].mxu0  ;;  %v5837_v7 = vadd.f32 %v5836_v24, %v5802_v50  ;;  %v5880_v33 = vmul.f32 %v5802_v50, %v5802_v50  ;;  %v5881_v18 = vmul.f32 %v5803_v41, %v5803_v41  ;;  %v5692_v63 = vpop.permute.xlu1 %5691 }
 0x27e   : > { %v7229_v48 = vpop.f32.mrb[18].mxu0  ;;  %v5368_v20 = vpack.c.bf16 %v5339_v61, %v5338_v12  ;;  %v5882_v28 = vmul.f32 %v5804_v0, %v5804_v0  ;;  %v5883_v2 = vmul.f32 %v5805_v13, %v5805_v13 }
 0x27f   : > { %6533 = vst [vmem:[%s9258_s21 + $0x38] sm:$0xff] %v5369_v35   ;;  %v5099_v51 = vpop.f32.mrb[19].mxu0  ;;  %v5838_v56 = vadd.f32 %v5837_v7, %v5803_v41  ;;  %v5915_v22 = vadd.f32 %v5914_v55, %v5880_v33  ;;  %v5556_v8 = vunpack.c.l.bf16 %v5369_v35  ;;  %v5557_v40 = vunpack.c.h.bf16 %v5369_v35  ;;  %v5707_v25 = vpop.permute.xlu0 %5706 }
 0x280   : > { %6532 = vst [vmem:[%s9258_s21 + $0x30] sm:$0xff] %v5368_v20   ;;  %v5554_v58 = vunpack.c.l.bf16 %v5368_v20  ;;  %v5555_v16 = vunpack.c.h.bf16 %v5368_v20 }
 0x281   : > { %v5839_v34 = vadd.f32 %v5838_v56, %v5804_v0  ;;  %v5916_v29 = vadd.f32 %v5915_v22, %v5881_v18  ;;  %v5808_v37 = vmul.f32 %v5687_v38, %v5556_v8  ;;  %v5809_v53 = vmul.f32 %v5692_v63, %v5557_v40  ;;  %v5702_v36 = vpop.permute.xlu1 %5701 }
 0x282   : > { %v5806_v5 = vmul.f32 %v5677_v19, %v5554_v58  ;;  %v5807_v30 = vmul.f32 %v5682_v6, %v5555_v16 }
 0x283   : > { %v5917_v31 = vadd.f32 %v5916_v29, %v5882_v28  ;;  %v5840_v9 = vadd.f32 %v5839_v34, %v5805_v13  ;;  %v5886_v26 = vmul.f32 %v5808_v37, %v5808_v37  ;;  %v5887_v24 = vmul.f32 %v5809_v53, %v5809_v53  ;;  %v9306_v38 = vpop.permute.xlu0 %5716 }
 0x284   : > { %v7232_v44 = vpop.f32.mrb[20].mxu0  ;;  %v5884_v60 = vmul.f32 %v5806_v5, %v5806_v5  ;;  %v5885_v10 = vmul.f32 %v5807_v30, %v5807_v30 }
 0x285   : > { %v5112_v52 = vpop.f32.mrb[21].mxu0  ;;  %v5918_v47 = vadd.f32 %v5917_v31, %v5883_v2  ;;  %v5841_v62 = vadd.f32 %v5840_v9, %v5806_v5  ;;  %v5712_v33 = vpop.permute.xlu1 %5711 }
 0x286   : > { %v7233_v4 = vpop.f32.mrb[22].mxu0 }
 0x287   : > { %v5115_v1 = vpop.f32.mrb[23].mxu0  ;;  %v5842_v17 = vadd.f32 %v5841_v62, %v5807_v30  ;;  %v5919_v14 = vadd.f32 %v5918_v47, %v5884_v60 }
 0x289   : > { %v5843_v42 = vadd.f32 %v5842_v17, %v5808_v37  ;;  %v5920_v27 = vadd.f32 %v5919_v14, %v5885_v10  ;;  %v5722_v47 = vpop.permute.xlu1 %5721  ;;  %v5727_v17 = vpop.permute.xlu0 %5726 }
 0x28b   : > { %v5921_v57 = vadd.f32 %v5920_v27, %v5886_v26  ;;  %v5844_v45 = vadd.f32 %v5843_v42, %v5809_v53 }
 0x28c   : > { %v9294_v11 = vpop.f32.mrb[24].mxu0 }
 0x28d   : > { %v7020_v49 = vpop.f32.mrb[16].mxu1  ;;  %v9296_v19 = vpop.f32.mrb[25].mxu0  ;;  %v5922_v15 = vadd.f32 %v5921_v57, %v5887_v24 }
 0x28e   : > { %v7278_v32 = vadd.f32 %v7228_v54, %v7020_v49  ;;  %v3023_v39 = vpop.f32.mrb[17].mxu1  ;;  %v9298_v55 = vpop.f32.mrb[26].mxu0 }
 0x28f   : > { %v7279_v46 = vadd.f32 %v5096_v43, %v3023_v39  ;;  %v7021_v23 = vpop.f32.mrb[18].mxu1  ;;  %v9300_v21 = vpop.f32.mrb[27].mxu0 }
 0x290   : > { %v5308_v50 = vadd.f32 %v7278_v32, %v9237_v59  ;;  %v7280_v41 = vadd.f32 %v7229_v48, %v7021_v23  ;;  %v3026_v35 = vpop.f32.mrb[19].mxu1 }
 0x291   : > { %v5306_v6 = vadd.f32 %v7279_v46, %v9237_v59  ;;  %v7281_v0 = vadd.f32 %v5099_v51, %v3026_v35 }
 0x292   : > { %v5309_v7 = vadd.f32 %v7280_v41, %v9237_v59  ;;  %v5344_v43 = vmax.f32 %v5308_v50, 0.0 }
 0x293   : > { %v5307_v54 = vadd.f32 %v7281_v0, %v9237_v59  ;;  %v5342_v13 = vmax.f32 %v5306_v6, 0.0  ;;  %v5732_v0 = vpop.permute.xlu1 %5731 }
 0x294   : > { %v5345_v12 = vmax.f32 %v5309_v7, 0.0  ;;  %v9308_v61 = vpop.f32.mrb[28].mxu0 }
 0x295   : > { %v5343_v56 = vmax.f32 %v5307_v54, 0.0  ;;  %v7024_v48 = vpop.f32.mrb[20].mxu1  ;;  %v9310_v18 = vpop.f32.mrb[29].mxu0 }
 0x296   : > { %v5371_v22 = vpack.c.bf16 %v5345_v12, %v5344_v43  ;;  %v7282_v51 = vadd.f32 %v7232_v44, %v7024_v48  ;;  %v3039_v20 = vpop.f32.mrb[21].mxu1  ;;  %v9312_v28 = vpop.f32.mrb[30].mxu0 }
 0x297   : > { %v5370_v34 = vpack.c.bf16 %v5343_v56, %v5342_v13  ;;  %v7283_v29 = vadd.f32 %v5112_v52, %v3039_v20  ;;  %v7025_v8 = vpop.f32.mrb[22].mxu1  ;;  %v9314_v58 = vpop.f32.mrb[31].mxu0 }
 0x298   : > { %6535 = vst [vmem:[%s9258_s21 + $0x48] sm:$0xff] %v5371_v22   ;;  %v5560_v16 = vunpack.c.l.bf16 %v5371_v22  ;;  %v5561_v63 = vunpack.c.h.bf16 %v5371_v22  ;;  %v5312_v2 = vadd.f32 %v7282_v51, %v9237_v59  ;;  %v7284_v31 = vadd.f32 %v7233_v4, %v7025_v8  ;;  %v3042_v9 = vpop.f32.mrb[23].mxu1 }
 0x299   : > { %6534 = vst [vmem:[%s9258_s21 + $0x40] sm:$0xff] %v5370_v34   ;;  %v5558_v40 = vunpack.c.l.bf16 %v5370_v34  ;;  %v5559_v5 = vunpack.c.h.bf16 %v5370_v34  ;;  %v5310_v44 = vadd.f32 %v7283_v29, %v9237_v59  ;;  %v7285_v30 = vadd.f32 %v5115_v1, %v3042_v9  ;;  %v5737_v34 = vpop.permute.xlu0 %5736 }
 0x29a   : > { %v5812_v37 = vmul.f32 %v5707_v25, %v5560_v16  ;;  %v5313_v52 = vadd.f32 %v7284_v31, %v9237_v59  ;;  %v5813_v10 = vmul.f32 %v5712_v33, %v5561_v63  ;;  %v5348_v14 = vmax.f32 %v5312_v2, 0.0 }
 0x29b   : > { %v5810_v62 = vmul.f32 %v9292_v3, %v5558_v40  ;;  %v5811_v60 = vmul.f32 %v5702_v36, %v5559_v5  ;;  %v5311_v53 = vadd.f32 %v7285_v30, %v9237_v59  ;;  %v5346_v49 = vmax.f32 %v5310_v44, 0.0  ;;  %v5742_v40 = vpop.permute.xlu1 %5741 }
 0x29c   : > { %v5349_v4 = vmax.f32 %v5313_v52, 0.0  ;;  %v9323_v26 = vpop.f32.mrb[32].mxu0  ;;  %v5890_v57 = vmul.f32 %v5812_v37, %v5812_v37  ;;  %v5891_v48 = vmul.f32 %v5813_v10, %v5813_v10 }
 0x29d   : > { %v5845_v42 = vadd.f32 %v5844_v45, %v5810_v62  ;;  %v5888_v27 = vmul.f32 %v5810_v62, %v5810_v62  ;;  %v5347_v24 = vmax.f32 %v5311_v53, 0.0  ;;  %v7028_v1 = vpop.f32.mrb[24].mxu1  ;;  %v9325_v25 = vpop.f32.mrb[33].mxu0  ;;  %v5889_v32 = vmul.f32 %v5811_v60, %v5811_v60 }
 0x29e   : > { %v5373_v3 = vpack.c.bf16 %v5349_v4, %v5348_v14  ;;  %v7286_v36 = vadd.f32 %v9294_v11, %v7028_v1  ;;  %v3055_v39 = vpop.f32.mrb[25].mxu1  ;;  %v9328_v46 = vpop.f32.mrb[34].mxu0 }
 0x29f   : > { %v5846_v23 = vadd.f32 %v5845_v42, %v5811_v60  ;;  %v5923_v50 = vadd.f32 %v5922_v15, %v5888_v27  ;;  %v5372_v41 = vpack.c.bf16 %v5347_v24, %v5346_v49  ;;  %v7287_v45 = vadd.f32 %v9296_v19, %v3055_v39  ;;  %v7029_v35 = vpop.f32.mrb[26].mxu1  ;;  %v9331_v6 = vpop.f32.mrb[35].mxu0 }
 0x2a0   : > { %6537 = vst [vmem:[%s9258_s21 + $0x58] sm:$0xff] %v5373_v3   ;;  %v5564_v7 = vunpack.c.l.bf16 %v5373_v3  ;;  %v5565_v33 = vunpack.c.h.bf16 %v5373_v3  ;;  %v5316_v54 = vadd.f32 %v7286_v36, %v9237_v59  ;;  %v7288_v11 = vadd.f32 %v9298_v55, %v7029_v35  ;;  %v3058_v43 = vpop.f32.mrb[27].mxu1  ;;  %v5747_v24 = vpop.permute.xlu0 %5746 }
 0x2a1   : > { %v5847_v12 = vadd.f32 %v5846_v23, %v5812_v37  ;;  %v5924_v13 = vadd.f32 %v5923_v50, %v5889_v32  ;;  %6536 = vst [vmem:[%s9258_s21 + $0x50] sm:$0xff] %v5372_v41   ;;  %v5562_v56 = vunpack.c.l.bf16 %v5372_v41  ;;  %v5563_v15 = vunpack.c.h.bf16 %v5372_v41 }
 0x2a2   : > { %v5816_v29 = vmul.f32 %v5727_v17, %v5564_v7  ;;  %v5817_v8 = vmul.f32 %v5732_v0, %v5565_v33  ;;  %v5317_v16 = vadd.f32 %v7288_v11, %v9237_v59  ;;  %v5352_v31 = vmax.f32 %v5316_v54, 0.0 }
 0x2a3   : > { %v5925_v22 = vadd.f32 %v5924_v13, %v5890_v57  ;;  %v5814_v19 = vmul.f32 %v9306_v38, %v5562_v56  ;;  %v5815_v51 = vmul.f32 %v5722_v47, %v5563_v15  ;;  %v5848_v20 = vadd.f32 %v5847_v12, %v5813_v10 }
 0x2a4   : > { %v5314_v5 = vadd.f32 %v7287_v45, %v9237_v59  ;;  %v5353_v44 = vmax.f32 %v5317_v16, 0.0  ;;  %v7289_v30 = vadd.f32 %v9300_v21, %v3058_v43  ;;  %v5894_v17 = vmul.f32 %v5816_v29, %v5816_v29 }
 0x2a5   : > { %v5849_v63 = vadd.f32 %v5848_v20, %v5814_v19  ;;  %v5892_v2 = vmul.f32 %v5814_v19, %v5814_v19  ;;  %v5926_v55 = vadd.f32 %v5925_v22, %v5891_v48  ;;  %v7032_v9 = vpop.f32.mrb[28].mxu1  ;;  %v5893_v52 = vmul.f32 %v5815_v51, %v5815_v51  ;;  %v5757_v22 = vpop.permute.xlu0 %5756 }
 0x2a6   : > { %v7290_v38 = vadd.f32 %v9308_v61, %v7032_v9  ;;  %v3071_v47 = vpop.f32.mrb[29].mxu1  ;;  %v5375_v10 = vpack.c.bf16 %v5353_v44, %v5352_v31  ;;  %v5315_v14 = vadd.f32 %v7289_v30, %v9237_v59  ;;  %v5350_v1 = vmax.f32 %v5314_v5, 0.0 }
 0x2a7   : > { %v5850_v37 = vadd.f32 %v5849_v63, %v5815_v51  ;;  %v5927_v62 = vadd.f32 %v5926_v55, %v5892_v2  ;;  %v7291_v60 = vadd.f32 %v9310_v18, %v3071_v47  ;;  %v7033_v53 = vpop.f32.mrb[30].mxu1  ;;  %v5895_v32 = vmul.f32 %v5817_v8, %v5817_v8 }
 0x2a8   : > { %v7292_v4 = vadd.f32 %v9312_v28, %v7033_v53  ;;  %v3074_v42 = vpop.f32.mrb[31].mxu1  ;;  %v5320_v21 = vadd.f32 %v7290_v38, %v9237_v59  ;;  %6539 = vst [vmem:[%s9258_s21 + $0x68] sm:$0xff] %v5375_v10   ;;  %v5351_v57 = vmax.f32 %v5315_v14, 0.0  ;;  %v5752_v28 = vpop.permute.xlu1 %5751  ;;  %v5568_v23 = vunpack.c.l.bf16 %v5375_v10 }
 0x2a9   : > { %v5851_v27 = vadd.f32 %v5850_v37, %v5816_v29  ;;  %v5928_v49 = vadd.f32 %v5927_v62, %v5893_v52  ;;  %v7293_v61 = vadd.f32 %v9314_v58, %v3074_v42  ;;  %v5318_v18 = vadd.f32 %v7291_v60, %v9237_v59  ;;  %v5767_v37 = vpop.permute.xlu0 %5766 }
 0x2aa   : > { %v5321_v39 = vadd.f32 %v7292_v4, %v9237_v59  ;;  %v5374_v50 = vpack.c.bf16 %v5351_v57, %v5350_v1  ;;  %v5569_v45 = vunpack.c.h.bf16 %v5375_v10  ;;  %v5356_v58 = vmax.f32 %v5320_v21, 0.0 }
 0x2ab   : > { %v5929_v3 = vadd.f32 %v5928_v49, %v5894_v17  ;;  %v5852_v36 = vadd.f32 %v5851_v27, %v5817_v8  ;;  %v5319_v41 = vadd.f32 %v7293_v61, %v9237_v59  ;;  %v5354_v11 = vmax.f32 %v5318_v18, 0.0 }
 0x2ac   : > { %v5357_v0 = vmax.f32 %v5321_v39, 0.0  ;;  %6538 = vst [vmem:[%s9258_s21 + $0x60] sm:$0xff] %v5374_v50   ;;  %v5566_v33 = vunpack.c.l.bf16 %v5374_v50  ;;  %v5567_v54 = vunpack.c.h.bf16 %v5374_v50  ;;  %v5820_v19 = vmul.f32 %v5747_v24, %v5568_v23  ;;  %v5762_v2 = vpop.permute.xlu1 %5761 }
 0x2ad   : > { %v5930_v35 = vadd.f32 %v5929_v3, %v5895_v32  ;;  %v7036_v7 = vpop.f32.mrb[32].mxu1  ;;  %v5355_v13 = vmax.f32 %v5319_v41, 0.0  ;;  %v5821_v16 = vmul.f32 %v5752_v28, %v5569_v45 }
 0x2ae   : > { %v3087_v43 = vpop.f32.mrb[33].mxu1  ;;  %v5377_v12 = vpack.c.bf16 %v5357_v0, %v5356_v58  ;;  %v7294_v56 = vadd.f32 %v9323_v26, %v7036_v7  ;;  %v5818_v51 = vmul.f32 %v5737_v34, %v5566_v33  ;;  %v5819_v20 = vmul.f32 %v5742_v40, %v5567_v54 }
 0x2af   : > { %v7295_v15 = vadd.f32 %v9325_v25, %v3087_v43  ;;  %v7037_v48 = vpop.f32.mrb[34].mxu1  ;;  %v5376_v63 = vpack.c.bf16 %v5355_v13, %v5354_v11  ;;  %v5898_v25 = vmul.f32 %v5820_v19, %v5820_v19  ;;  %v5899_v34 = vmul.f32 %v5821_v16, %v5821_v16 }
 0x2b0   : > { %v7296_v29 = vadd.f32 %v9328_v46, %v7037_v48  ;;  %v3090_v8 = vpop.f32.mrb[35].mxu1  ;;  %6541 = vst [vmem:[%s9258_s21 + $0x78] sm:$0xff] %v5377_v12   ;;  %v5853_v55 = vadd.f32 %v5852_v36, %v5818_v51  ;;  %v5896_v31 = vmul.f32 %v5818_v51, %v5818_v51  ;;  %v5324_v26 = vadd.f32 %v7294_v56, %v9237_v59  ;;  %v5772_v42 = vpop.permute.xlu1 %5771 }
 0x2b1   : > { %6540 = vst [vmem:[%s9258_s21 + $0x70] sm:$0xff] %v5376_v63   ;;  %v5570_v9 = vunpack.c.l.bf16 %v5376_v63  ;;  %v5571_v5 = vunpack.c.h.bf16 %v5376_v63  ;;  %v5897_v30 = vmul.f32 %v5819_v20, %v5819_v20  ;;  %v5572_v40 = vunpack.c.l.bf16 %v5377_v12 }
 0x2b2   : > { %v5854_v44 = vadd.f32 %v5853_v55, %v5819_v20  ;;  %v5931_v38 = vadd.f32 %v5930_v35, %v5896_v31  ;;  %v5573_v47 = vunpack.c.h.bf16 %v5377_v12  ;;  %v5325_v60 = vadd.f32 %v7296_v29, %v9237_v59 }
 0x2b3   : > { %v5822_v46 = vmul.f32 %v5757_v22, %v5570_v9  ;;  %v7297_v53 = vadd.f32 %v9331_v6, %v3090_v8  ;;  %v5823_v17 = vmul.f32 %v5762_v2, %v5571_v5  ;;  %v5360_v14 = vmax.f32 %v5324_v26, 0.0  ;;  %v5777_v6 = vpop.permute.xlu0 %5776 }
 0x2b4   : > { %v5855_v52 = vadd.f32 %v5854_v44, %v5820_v19  ;;  %v5932_v62 = vadd.f32 %v5931_v38, %v5897_v30  ;;  %v5322_v4 = vadd.f32 %v7295_v15, %v9237_v59  ;;  %v5361_v21 = vmax.f32 %v5325_v60, 0.0  ;;  %v5782_v41 = vpop.permute.xlu1 %5781 }
 0x2b5   : > { %v5900_v10 = vmul.f32 %v5822_v46, %v5822_v46  ;;  %v5323_v61 = vadd.f32 %v7297_v53, %v9237_v59  ;;  %v5824_v24 = vmul.f32 %v5767_v37, %v5572_v40  ;;  %v5825_v36 = vmul.f32 %v5772_v42, %v5573_v47 }
 0x2b6   : > { %v5933_v27 = vadd.f32 %v5932_v62, %v5898_v25  ;;  %v5856_v49 = vadd.f32 %v5855_v52, %v5821_v16  ;;  %v5379_v18 = vpack.c.bf16 %v5361_v21, %v5360_v14  ;;  %v5358_v3 = vmax.f32 %v5322_v4, 0.0 }
 0x2b7   : > { %v5359_v32 = vmax.f32 %v5323_v61, 0.0  ;;  %v5901_v28 = vmul.f32 %v5823_v17, %v5823_v17  ;;  %v5902_v45 = vmul.f32 %v5824_v24, %v5824_v24  ;;  %v5903_v33 = vmul.f32 %v5825_v36, %v5825_v36  ;;  %v5787_v56 = vpop.permute.xlu0 %5786 }
 0x2b8   : > { %v5857_v1 = vadd.f32 %v5856_v49, %v5822_v46  ;;  %v5934_v57 = vadd.f32 %v5933_v27, %v5899_v34  ;;  %6543 = vst [vmem:[%s9258_s21 + $0x88] sm:$0xff] %v5379_v18   ;;  %v5576_v0 = vunpack.c.l.bf16 %v5379_v18  ;;  %v5577_v43 = vunpack.c.h.bf16 %v5379_v18  ;;  %v5792_v51 = vpop.permute.xlu1 %5791 }
 0x2b9   : > { %v5378_v50 = vpack.c.bf16 %v5359_v32, %v5358_v3 }
 0x2ba   : > { %v5858_v39 = vadd.f32 %v5857_v1, %v5823_v17  ;;  %v5935_v23 = vadd.f32 %v5934_v57, %v5900_v10  ;;  %v5828_v48 = vmul.f32 %v5787_v56, %v5576_v0  ;;  %v5829_v20 = vmul.f32 %v5792_v51, %v5577_v43 }
 0x2bb   : > { %6542 = vst [vmem:[%s9258_s21 + $0x80] sm:$0xff] %v5378_v50   ;;  %v5574_v59 = vunpack.c.l.bf16 %v5378_v50  ;;  %v5575_v7 = vunpack.c.h.bf16 %v5378_v50 }
 0x2bc   : > { %v5859_v35 = vadd.f32 %v5858_v39, %v5824_v24  ;;  %v5936_v58 = vadd.f32 %v5935_v23, %v5901_v28  ;;  %v5906_v63 = vmul.f32 %v5828_v48, %v5828_v48  ;;  %v5907_v31 = vmul.f32 %v5829_v20, %v5829_v20 }
 0x2bd   : > { %v5826_v12 = vmul.f32 %v5777_v6, %v5574_v59  ;;  %v5827_v13 = vmul.f32 %v5782_v41, %v5575_v7 }
 0x2be   : > { %v5937_v54 = vadd.f32 %v5936_v58, %v5902_v45  ;;  %v5860_v11 = vadd.f32 %v5859_v35, %v5825_v36 }
 0x2bf   : > { %v5904_v19 = vmul.f32 %v5826_v12, %v5826_v12  ;;  %v5905_v8 = vmul.f32 %v5827_v13, %v5827_v13 }
 0x2c0   : > { %v5938_v15 = vadd.f32 %v5937_v54, %v5903_v33  ;;  %v5861_v22 = vadd.f32 %v5860_v11, %v5826_v12 }
 0x2c2   : > { %v5862_v29 = vadd.f32 %v5861_v22, %v5827_v13  ;;  %v5939_v16 = vadd.f32 %v5938_v15, %v5904_v19 }
 0x2c4   : > { %v5863_v2 = vadd.f32 %v5862_v29, %v5828_v48  ;;  %v5940_v55 = vadd.f32 %v5939_v16, %v5905_v8 }
 0x2c6   : > { %v5864_v9 = vadd.f32 %v5863_v2, %v5829_v20  ;;  %v5941_v5 = vadd.f32 %v5940_v55, %v5906_v63 }
 0x2c8   : > { %v5865_v26 = vrot.slane %v5864_v9, 4  ;;  %v5942_v25 = vadd.f32 %v5941_v5, %v5907_v31 }
 0x2ca   : > { %v5866_v44 = vadd.f32 %v5865_v26, %v5864_v9  ;;  %v5943_v30 = vrot.slane %v5942_v25, 4 }
 0x2cc   : > { %v5867_v38 = vrot.slane %v5866_v44, 2  ;;  %v5944_v34 = vadd.f32 %v5943_v30, %v5942_v25 }
 0x2ce   : > { %v5868_v40 = vadd.f32 %v5867_v38, %v5866_v44  ;;  %v5945_v47 = vrot.slane %v5944_v34, 2 }
 0x2d0   : > { %v5869_v46 = vrot.slane %v5868_v40, 1  ;;  %v5946_v37 = vadd.f32 %v5945_v47, %v5944_v34 }
 0x2d2   : > { %v5870_v52 = vadd.f32 %v5869_v46, %v5868_v40  ;;  %v5947_v62 = vrot.slane %v5946_v37, 1 }
 0x2d4   : > { %5871 = vst [vmem:[%s333_s24] sm:$0x1] %v5870_v52  ;;  %v5948_v60 = vadd.f32 %v5947_v62, %v5946_v37 }
 0x2d6   : > { %5949 = vst [vmem:[%s336_s26] sm:$0x1] %v5948_v60 }
 0x2d7 PF: > { %s19_s27 = sadd.s32 1, %s7650_s27  }
 0x2d8   : > { %p16_p4 = scmp.ge.s32.totalorder %s19_s27, 4  }
 0x2da   :  { %18 = sbr.rel (!%p16_p4) target bundleno = 1 (0x1), region = 109 }

</bundles_post_ra>
